<compile_context>
chip_gen: v7x
topology: tpu7x:2x2x1
jax: 0.10.0
libtpu: 0.0.40
codegen_flags: <defaults>
</compile_context>

<pallas_src>
import jax
import jax.numpy as jnp
from jax import lax
from jax.experimental import pallas as pl
from jax.experimental.pallas import tpu as pltpu

LANE = 128


def _round_up(v, m):
    return ((v + m - 1) // m) * m


# ----------------------------- in-kernel helpers -----------------------------

def _maxpool5_same(a):
    """5x5 max pool, stride 1, 'same' output, on (H, W, C) in a's dtype.

    Zero padding (instead of -inf) is exact: `a` is non-negative (post-ReLU)
    and every window contains its valid center pixel.
    """
    h, w, _ = a.shape

    def pad2(t, axis):
        fs = list(t.shape)
        fs[axis] = 2
        z = jnp.zeros(tuple(fs), t.dtype)
        return jnp.concatenate([z, t, z], axis=axis)

    # row pool (axis 0: outer dim, tile-aligned slices)
    ap = pad2(a, 0)                                    # (h+4, w, c)
    r = lax.slice_in_dim(ap, 0, h, axis=0)
    for d in range(1, 5):                              # static, tiny trip count
        r = jnp.maximum(r, lax.slice_in_dim(ap, d, d + h, axis=0))
    # col pool (axis 1: sublane dim)
    rp = pad2(r, 1)                                    # (h, w+4, c)
    out = lax.slice_in_dim(rp, 0, w, axis=1)
    for d in range(1, 5):
        out = jnp.maximum(out, lax.slice_in_dim(rp, d, d + w, axis=1))
    return out


def _make_spp_kernel(H, W, Cp, C2p, pack_k, flatten):
    """Build the fused SPP kernel for static shapes / config."""

    def mm(a, w):
        # 1x1-conv channel matmul; flatten spatial dims so the MXU sees
        # M = H*W (layout no-op when W % 16 == 0).
        if flatten:
            a2 = a.reshape(-1, a.shape[-1])
            return jnp.dot(a2, w, preferred_element_type=jnp.float32)
        return jnp.einsum('hwc,cd->hwd', a, w,
                          preferred_element_type=jnp.float32)

    def kernel(x_ref, w1_ref, s1_ref, b1_ref, w2_ref, s2_ref, b2_ref, o_ref):
        x = x_ref[0]                                       # (H, W, C1p) bf16

        # cv1: bf16 matmul (f32 accumulate) + folded BN + ReLU in f32.
        y = mm(x, w1_ref[...])
        y = jnp.maximum(y * s1_ref[...] + b1_ref[...], 0.0)

        # Cast once; pooling and cv2 operands stay bf16 (exact for max since
        # rounding is monotone and values are >= 0).
        yb = y.astype(jnp.bfloat16).reshape(H, W, Cp)

        # cascaded spatial pyramid: 5x5 of 5x5 = 9x9, again = 13x13
        p5 = _maxpool5_same(yb)
        p9 = _maxpool5_same(p5)
        p13 = _maxpool5_same(p9)

        if pack_k:
            # pairwise K-packing: two K = 2*Cp matmuls fill a 256-wide MXU.
            acts = (jnp.concatenate([yb, p5], axis=-1),
                    jnp.concatenate([p9, p13], axis=-1))
        else:
            acts = (yb, p5, p9, p13)

        # cv2 without the 4*Cp channel concat: partial matmuls summed into one
        # f32 accumulator, then folded BN + ReLU applied once.
        z = mm(acts[0], w2_ref[0])
        for i in range(1, len(acts)):
            z = z + mm(acts[i], w2_ref[i])
        z = jnp.maximum(z * s2_ref[...] + b2_ref[...], 0.0)

        o_ref[0] = z.astype(jnp.bfloat16).reshape(H, W, C2p)

    return kernel


# --------------------------------- wrapper ------------------------------------

def spp_pallas(x_nhwc, w1, s1, b1, w2, s2, b2):
    N, H, W, C1 = x_nhwc.shape
    C_ = w1.shape[1]
    C2 = w2.shape[1]
    assert w2.shape[0] == 4 * C_

    C1p = _round_up(C1, LANE)
    Cp = _round_up(C_, LANE)
    C2p = _round_up(C2, LANE)

    # K-pack cv2 only when one branch does not already fill the 256-wide MXU.
    pack_k = (Cp == LANE)
    # Flattened (H*W, C) matmuls are a layout no-op when W % 16 == 0 (bf16).
    flatten = (W % 16 == 0)

    # Zero-pad channel axes to lane multiples; extra channels stay exactly 0
    # through relu/pool and contribute nothing to the matmuls.
    w1_p = jnp.pad(w1, ((0, C1p - C1), (0, Cp - C_)))
    s1_p = jnp.pad(s1, ((0, 0), (0, Cp - C_)))
    b1_p = jnp.pad(b1, ((0, 0), (0, Cp - C_)))

    w2_blocks = w2.reshape(4, C_, C2)
    w2_p = jnp.pad(w2_blocks, ((0, 0), (0, Cp - C_), (0, C2p - C2)))
    if pack_k:
        w2_p = w2_p.reshape(2, 2 * Cp, C2p)      # row blocks: [y|p5], [p9|p13]
    s2_p = jnp.pad(s2, ((0, 0), (0, C2p - C2)))
    b2_p = jnp.pad(b2, ((0, 0), (0, C2p - C2)))

    # bf16 matmul / pooling operands; f32 accumulation and scale/bias/relu.
    x_bf = x_nhwc.astype(jnp.bfloat16)
    if C1p != C1:
        x_bf = jnp.pad(x_bf, ((0, 0), (0, 0), (0, 0), (0, C1p - C1)))
    w1_bf = w1_p.astype(jnp.bfloat16)
    w2_bf = w2_p.astype(jnp.bfloat16)

    # Advisory cost on true (unpadded) channel counts.
    flops = 2 * N * H * W * (C1 * C_ + 4 * C_ * C2)
    bytes_accessed = (N * H * W * C1 * 2 + (C1 * C_ + 4 * C_ * C2) * 2
                      + 2 * (C_ + C2) * 4 + N * H * W * C2 * 2)

    # Explicit scoped-VMEM budget derived from the actual block sizes.
    hw = H * W
    blk_bytes = (
        2 * hw * C1p * 2                        # input block (double-buffered)
        + 2 * hw * C2p * 2                      # output block (double-buffered)
        + 2 * (C1p * Cp + 4 * Cp * C2p) * 2     # weights (double-buffered)
        + hw * Cp * 4                           # y (f32)
        + 4 * hw * Cp * 2                       # yb + 3 pooled levels (bf16)
        + 2 * (H + 4) * (W + 4) * Cp * 2        # pooling pad / row temporaries
        + (4 * hw * Cp * 2 if pack_k else 0)    # pairwise packed cv2 operands
        + hw * C2p * 4)                         # cv2 f32 accumulator
    vmem_need = 2 * blk_bytes + (2 << 20)       # generous headroom
    try:
        phys = int(pltpu.get_tpu_info().vmem_capacity_bytes)
    except Exception:
        phys = 64 << 20                         # v7x-safe fallback
    vmem_limit = int(min(max(vmem_need, 32 << 20), int(phys * 0.9)))

    kernel = _make_spp_kernel(H, W, Cp, C2p, pack_k, flatten)
    w2_block_shape = tuple(w2_bf.shape)

    out = pl.pallas_call(
        kernel,
        out_shape=jax.ShapeDtypeStruct((N, H, W, C2p), jnp.bfloat16),
        grid_spec=pltpu.PrefetchScalarGridSpec(
            num_scalar_prefetch=0,
            grid=(N,),
            in_specs=[
                pl.BlockSpec((1, H, W, C1p), lambda n: (n, 0, 0, 0)),
                pl.BlockSpec((C1p, Cp), lambda n: (0, 0)),
                pl.BlockSpec((1, Cp), lambda n: (0, 0)),
                pl.BlockSpec((1, Cp), lambda n: (0, 0)),
                pl.BlockSpec(w2_block_shape, lambda n: (0, 0, 0)),
                pl.BlockSpec((1, C2p), lambda n: (0, 0)),
                pl.BlockSpec((1, C2p), lambda n: (0, 0)),
            ],
            out_specs=pl.BlockSpec((1, H, W, C2p), lambda n: (n, 0, 0, 0)),
        ),
        compiler_params=pltpu.CompilerParams(
            dimension_semantics=("parallel",),
            vmem_limit_bytes=vmem_limit),
        cost_estimate=pl.CostEstimate(
            flops=flops, transcendentals=0, bytes_accessed=bytes_accessed),
    )(x_bf, w1_bf, s1_p, b1_p, w2_bf, s2_p, b2_p)

    return out[..., :C2]


# ----------------------------- pure-JAX reference -----------------------------

def spp_ref(x_nhwc, w1, s1, b1, w2, s2, b2):
    y = jnp.maximum(jnp.einsum('nhwc,cd->nhwd', x_nhwc, w1) * s1 + b1, 0.0)

    def pool(a, k):
        p = k // 2
        return lax.reduce_window(a, -jnp.inf, lax.max, (1, k, k, 1),
                                 (1, 1, 1, 1),
                                 [(0, 0), (p, p), (p, p), (0, 0)])

    cat = jnp.concatenate([y, pool(y, 5), pool(y, 9), pool(y, 13)], axis=-1)
    # match kernel precision: bf16 cv2 matmul operands
    cat = cat.astype(jnp.bfloat16).astype(jnp.float32)
    z = jnp.maximum(jnp.einsum('nhwc,cd->nhwd', cat, w2) * s2 + b2, 0.0)
    return z


# ----------------------------------- main -------------------------------------

if __name__ == "__main__":
    key = jax.random.PRNGKey(0)
    N, C1, H, W = 2, 8, 16, 16
    C2 = 8
    e = 0.5
    C_ = int(C1 * e)
    eps = 1e-5
    ks = jax.random.split(key, 10)

    # input (PyTorch NCHW convention)
    x_nchw = jax.random.normal(ks[0], (N, C1, H, W), jnp.float32)

    # cv1: Conv2d(C1, C_, 1, bias=False) weight laid out as (C1, C_) for x @ W,
    # plus BatchNorm2d(C_) folded into scale/bias.
    w1 = jax.random.normal(ks[1], (C1, C_), jnp.float32) * 0.1
    g1 = jax.random.uniform(ks[2], (1, C_), jnp.float32, 0.5, 1.5)
    beta1 = jax.random.normal(ks[3], (1, C_), jnp.float32) * 0.1
    mu1 = jax.random.normal(ks[4], (1, C_), jnp.float32) * 0.1
    var1 = jax.random.uniform(ks[5], (1, C_), jnp.float32, 0.5, 1.5)
    s1 = g1 / jnp.sqrt(var1 + eps)
    b1 = beta1 - mu1 * s1

    # cv2: Conv2d(4*C_, C2, 1, bias=False) + BatchNorm2d(C2) folded.
    w2 = jax.random.normal(ks[6], (4 * C_, C2), jnp.float32) * 0.1
    g2 = jax.random.uniform(ks[7], (1, C2), jnp.float32, 0.5, 1.5)
    beta2 = jax.random.normal(ks[8], (1, C2), jnp.float32) * 0.1
    mu2 = jnp.zeros((1, C2), jnp.float32)
    var2 = jax.random.uniform(ks[9], (1, C2), jnp.float32, 0.5, 1.5)
    s2 = g2 / jnp.sqrt(var2 + eps)
    b2 = beta2 - mu2 * s2

    # NCHW -> NHWC at the boundary (kernel layout is channels-last)
    x_nhwc = jnp.transpose(x_nchw, (0, 2, 3, 1))

    out = spp_pallas(x_nhwc, w1, s1, b1, w2, s2, b2)
    out = jax.block_until_ready(out)

    # Reference on the same bf16-rounded matmul inputs, f32 math, -inf pools.
    ref = spp_ref(x_nhwc.astype(jnp.bfloat16).astype(jnp.float32),
                  w1.astype(jnp.bfloat16).astype(jnp.float32), s1, b1,
                  w2.astype(jnp.bfloat16).astype(jnp.float32), s2, b2)

    assert out.shape == (N, H, W, C2), out.shape
    assert out.dtype == jnp.bfloat16, out.dtype
    out_f32 = out.astype(jnp.float32)
    max_err = float(jnp.max(jnp.abs(out_f32 - ref)))
    assert jnp.allclose(out_f32, ref, atol=5e-2, rtol=5e-2), max_err

    print("KERNEL_OK")
</pallas_src>

<mosaic_0001>
module attributes {stable_mosaic.version = 11 : i64} {
  func.func @kernel(%arg0: i32, %arg1: memref<1x16x16x128xbf16, #tpu.memory_space<vmem>>, %arg2: memref<128x128xbf16, #tpu.memory_space<vmem>>, %arg3: memref<1x128xf32, #tpu.memory_space<vmem>>, %arg4: memref<1x128xf32, #tpu.memory_space<vmem>>, %arg5: memref<2x256x128xbf16, #tpu.memory_space<vmem>>, %arg6: memref<1x128xf32, #tpu.memory_space<vmem>>, %arg7: memref<1x128xf32, #tpu.memory_space<vmem>>, %arg8: memref<1x16x16x128xbf16, #tpu.memory_space<vmem>>) attributes {dimension_semantics = [#tpu.dimension_semantics<parallel>], iteration_bounds = array<i64: 2>, scalar_prefetch = 0 : i64, scratch_operands = 0 : i64, tpu.core_type = #tpu.core_type<tc>, window_params = [{transform_indices = @transform_0, window_bounds = array<i64: 1, 16, 16, 128>}, {pipeline_mode = #tpu.pipeline_mode<synchronous>, transform_indices = @transform_1, window_bounds = array<i64: 128, 128>}, {pipeline_mode = #tpu.pipeline_mode<synchronous>, transform_indices = @transform_2, window_bounds = array<i64: 1, 128>}, {pipeline_mode = #tpu.pipeline_mode<synchronous>, transform_indices = @transform_3, window_bounds = array<i64: 1, 128>}, {pipeline_mode = #tpu.pipeline_mode<synchronous>, transform_indices = @transform_4, window_bounds = array<i64: 2, 256, 128>}, {pipeline_mode = #tpu.pipeline_mode<synchronous>, transform_indices = @transform_5, window_bounds = array<i64: 1, 128>}, {pipeline_mode = #tpu.pipeline_mode<synchronous>, transform_indices = @transform_6, window_bounds = array<i64: 1, 128>}, {transform_indices = @transform_7, window_bounds = array<i64: 1, 16, 16, 128>}]} {
    %c0 = arith.constant 0 : index
    %c0_0 = arith.constant 0 : index
    %c0_1 = arith.constant 0 : index
    %c0_2 = arith.constant 0 : index
    %0 = vector.load %arg1[%c0, %c0_0, %c0_1, %c0_2] : memref<1x16x16x128xbf16, #tpu.memory_space<vmem>>, vector<1x16x16x128xbf16>
    %1 = vector.shape_cast %0 : vector<1x16x16x128xbf16> to vector<16x16x128xbf16>
    %c0_3 = arith.constant 0 : index
    %c0_4 = arith.constant 0 : index
    %2 = vector.load %arg2[%c0_3, %c0_4] : memref<128x128xbf16, #tpu.memory_space<vmem>>, vector<128x128xbf16>
    %3 = vector.shape_cast %1 : vector<16x16x128xbf16> to vector<256x128xbf16>
    %cst = arith.constant dense<0.000000e+00> : vector<256x128xf32>
    %4 = tpu.matmul %3, %2, %cst {dimension_numbers = #tpu.dot_dimension_numbers<[1], [0], [0], [1], [0, 0, 1, 1], [], []>} : vector<256x128xbf16>, vector<128x128xbf16>, vector<256x128xf32> -> vector<256x128xf32>
    %c0_5 = arith.constant 0 : index
    %c0_6 = arith.constant 0 : index
    %5 = vector.load %arg3[%c0_5, %c0_6] : memref<1x128xf32, #tpu.memory_space<vmem>>, vector<1x128xf32>
    %6 = vector.broadcast %5 : vector<1x128xf32> to vector<256x128xf32>
    %7 = arith.mulf %4, %6 : vector<256x128xf32>
    %c0_7 = arith.constant 0 : index
    %c0_8 = arith.constant 0 : index
    %8 = vector.load %arg4[%c0_7, %c0_8] : memref<1x128xf32, #tpu.memory_space<vmem>>, vector<1x128xf32>
    %9 = vector.broadcast %8 : vector<1x128xf32> to vector<256x128xf32>
    %10 = arith.addf %7, %9 : vector<256x128xf32>
    %cst_9 = arith.constant 0.000000e+00 : f32
    %11 = vector.broadcast %cst_9 : f32 to vector<256x128xf32>
    %12 = arith.maximumf %10, %11 : vector<256x128xf32>
    %13 = arith.truncf %12 : vector<256x128xf32> to vector<256x128xbf16>
    %14 = vector.shape_cast %13 : vector<256x128xbf16> to vector<16x16x128xbf16>
    %cst_10 = arith.constant 0.000000e+00 : bf16
    %15 = vector.broadcast %cst_10 : bf16 to vector<2x16x128xbf16>
    %16 = tpu.concatenate %15, %14, %15 in 0 : vector<2x16x128xbf16>, vector<16x16x128xbf16>, vector<2x16x128xbf16> -> vector<20x16x128xbf16>
    %17 = vector.extract_strided_slice %16 {offsets = [0, 0, 0], sizes = [16, 16, 128], strides = [1, 1, 1]} : vector<20x16x128xbf16> to vector<16x16x128xbf16>
    %18 = vector.extract_strided_slice %16 {offsets = [1, 0, 0], sizes = [16, 16, 128], strides = [1, 1, 1]} : vector<20x16x128xbf16> to vector<16x16x128xbf16>
    %19 = arith.maximumf %17, %18 : vector<16x16x128xbf16>
    %20 = vector.extract_strided_slice %16 {offsets = [2, 0, 0], sizes = [16, 16, 128], strides = [1, 1, 1]} : vector<20x16x128xbf16> to vector<16x16x128xbf16>
    %21 = arith.maximumf %19, %20 : vector<16x16x128xbf16>
    %22 = vector.extract_strided_slice %16 {offsets = [3, 0, 0], sizes = [16, 16, 128], strides = [1, 1, 1]} : vector<20x16x128xbf16> to vector<16x16x128xbf16>
    %23 = arith.maximumf %21, %22 : vector<16x16x128xbf16>
    %24 = vector.extract_strided_slice %16 {offsets = [4, 0, 0], sizes = [16, 16, 128], strides = [1, 1, 1]} : vector<20x16x128xbf16> to vector<16x16x128xbf16>
    %25 = arith.maximumf %23, %24 : vector<16x16x128xbf16>
    %cst_11 = arith.constant 0.000000e+00 : bf16
    %26 = vector.broadcast %cst_11 : bf16 to vector<16x2x128xbf16>
    %27 = tpu.concatenate %26, %25, %26 in 1 : vector<16x2x128xbf16>, vector<16x16x128xbf16>, vector<16x2x128xbf16> -> vector<16x20x128xbf16>
    %28 = vector.extract_strided_slice %27 {offsets = [0, 0, 0], sizes = [16, 16, 128], strides = [1, 1, 1]} : vector<16x20x128xbf16> to vector<16x16x128xbf16>
    %29 = vector.extract_strided_slice %27 {offsets = [0, 1, 0], sizes = [16, 16, 128], strides = [1, 1, 1]} : vector<16x20x128xbf16> to vector<16x16x128xbf16>
    %30 = arith.maximumf %28, %29 : vector<16x16x128xbf16>
    %31 = vector.extract_strided_slice %27 {offsets = [0, 2, 0], sizes = [16, 16, 128], strides = [1, 1, 1]} : vector<16x20x128xbf16> to vector<16x16x128xbf16>
    %32 = arith.maximumf %30, %31 : vector<16x16x128xbf16>
    %33 = vector.extract_strided_slice %27 {offsets = [0, 3, 0], sizes = [16, 16, 128], strides = [1, 1, 1]} : vector<16x20x128xbf16> to vector<16x16x128xbf16>
    %34 = arith.maximumf %32, %33 : vector<16x16x128xbf16>
    %35 = vector.extract_strided_slice %27 {offsets = [0, 4, 0], sizes = [16, 16, 128], strides = [1, 1, 1]} : vector<16x20x128xbf16> to vector<16x16x128xbf16>
    %36 = arith.maximumf %34, %35 : vector<16x16x128xbf16>
    %cst_12 = arith.constant 0.000000e+00 : bf16
    %37 = vector.broadcast %cst_12 : bf16 to vector<2x16x128xbf16>
    %38 = tpu.concatenate %37, %36, %37 in 0 : vector<2x16x128xbf16>, vector<16x16x128xbf16>, vector<2x16x128xbf16> -> vector<20x16x128xbf16>
    %39 = vector.extract_strided_slice %38 {offsets = [0, 0, 0], sizes = [16, 16, 128], strides = [1, 1, 1]} : vector<20x16x128xbf16> to vector<16x16x128xbf16>
    %40 = vector.extract_strided_slice %38 {offsets = [1, 0, 0], sizes = [16, 16, 128], strides = [1, 1, 1]} : vector<20x16x128xbf16> to vector<16x16x128xbf16>
    %41 = arith.maximumf %39, %40 : vector<16x16x128xbf16>
    %42 = vector.extract_strided_slice %38 {offsets = [2, 0, 0], sizes = [16, 16, 128], strides = [1, 1, 1]} : vector<20x16x128xbf16> to vector<16x16x128xbf16>
    %43 = arith.maximumf %41, %42 : vector<16x16x128xbf16>
    %44 = vector.extract_strided_slice %38 {offsets = [3, 0, 0], sizes = [16, 16, 128], strides = [1, 1, 1]} : vector<20x16x128xbf16> to vector<16x16x128xbf16>
    %45 = arith.maximumf %43, %44 : vector<16x16x128xbf16>
    %46 = vector.extract_strided_slice %38 {offsets = [4, 0, 0], sizes = [16, 16, 128], strides = [1, 1, 1]} : vector<20x16x128xbf16> to vector<16x16x128xbf16>
    %47 = arith.maximumf %45, %46 : vector<16x16x128xbf16>
    %cst_13 = arith.constant 0.000000e+00 : bf16
    %48 = vector.broadcast %cst_13 : bf16 to vector<16x2x128xbf16>
    %49 = tpu.concatenate %48, %47, %48 in 1 : vector<16x2x128xbf16>, vector<16x16x128xbf16>, vector<16x2x128xbf16> -> vector<16x20x128xbf16>
    %50 = vector.extract_strided_slice %49 {offsets = [0, 0, 0], sizes = [16, 16, 128], strides = [1, 1, 1]} : vector<16x20x128xbf16> to vector<16x16x128xbf16>
    %51 = vector.extract_strided_slice %49 {offsets = [0, 1, 0], sizes = [16, 16, 128], strides = [1, 1, 1]} : vector<16x20x128xbf16> to vector<16x16x128xbf16>
    %52 = arith.maximumf %50, %51 : vector<16x16x128xbf16>
    %53 = vector.extract_strided_slice %49 {offsets = [0, 2, 0], sizes = [16, 16, 128], strides = [1, 1, 1]} : vector<16x20x128xbf16> to vector<16x16x128xbf16>
    %54 = arith.maximumf %52, %53 : vector<16x16x128xbf16>
    %55 = vector.extract_strided_slice %49 {offsets = [0, 3, 0], sizes = [16, 16, 128], strides = [1, 1, 1]} : vector<16x20x128xbf16> to vector<16x16x128xbf16>
    %56 = arith.maximumf %54, %55 : vector<16x16x128xbf16>
    %57 = vector.extract_strided_slice %49 {offsets = [0, 4, 0], sizes = [16, 16, 128], strides = [1, 1, 1]} : vector<16x20x128xbf16> to vector<16x16x128xbf16>
    %58 = arith.maximumf %56, %57 : vector<16x16x128xbf16>
    %cst_14 = arith.constant 0.000000e+00 : bf16
    %59 = vector.broadcast %cst_14 : bf16 to vector<2x16x128xbf16>
    %60 = tpu.concatenate %59, %58, %59 in 0 : vector<2x16x128xbf16>, vector<16x16x128xbf16>, vector<2x16x128xbf16> -> vector<20x16x128xbf16>
    %61 = vector.extract_strided_slice %60 {offsets = [0, 0, 0], sizes = [16, 16, 128], strides = [1, 1, 1]} : vector<20x16x128xbf16> to vector<16x16x128xbf16>
    %62 = vector.extract_strided_slice %60 {offsets = [1, 0, 0], sizes = [16, 16, 128], strides = [1, 1, 1]} : vector<20x16x128xbf16> to vector<16x16x128xbf16>
    %63 = arith.maximumf %61, %62 : vector<16x16x128xbf16>
    %64 = vector.extract_strided_slice %60 {offsets = [2, 0, 0], sizes = [16, 16, 128], strides = [1, 1, 1]} : vector<20x16x128xbf16> to vector<16x16x128xbf16>
    %65 = arith.maximumf %63, %64 : vector<16x16x128xbf16>
    %66 = vector.extract_strided_slice %60 {offsets = [3, 0, 0], sizes = [16, 16, 128], strides = [1, 1, 1]} : vector<20x16x128xbf16> to vector<16x16x128xbf16>
    %67 = arith.maximumf %65, %66 : vector<16x16x128xbf16>
    %68 = vector.extract_strided_slice %60 {offsets = [4, 0, 0], sizes = [16, 16, 128], strides = [1, 1, 1]} : vector<20x16x128xbf16> to vector<16x16x128xbf16>
    %69 = arith.maximumf %67, %68 : vector<16x16x128xbf16>
    %cst_15 = arith.constant 0.000000e+00 : bf16
    %70 = vector.broadcast %cst_15 : bf16 to vector<16x2x128xbf16>
    %71 = tpu.concatenate %70, %69, %70 in 1 : vector<16x2x128xbf16>, vector<16x16x128xbf16>, vector<16x2x128xbf16> -> vector<16x20x128xbf16>
    %72 = vector.extract_strided_slice %71 {offsets = [0, 0, 0], sizes = [16, 16, 128], strides = [1, 1, 1]} : vector<16x20x128xbf16> to vector<16x16x128xbf16>
    %73 = vector.extract_strided_slice %71 {offsets = [0, 1, 0], sizes = [16, 16, 128], strides = [1, 1, 1]} : vector<16x20x128xbf16> to vector<16x16x128xbf16>
    %74 = arith.maximumf %72, %73 : vector<16x16x128xbf16>
    %75 = vector.extract_strided_slice %71 {offsets = [0, 2, 0], sizes = [16, 16, 128], strides = [1, 1, 1]} : vector<16x20x128xbf16> to vector<16x16x128xbf16>
    %76 = arith.maximumf %74, %75 : vector<16x16x128xbf16>
    %77 = vector.extract_strided_slice %71 {offsets = [0, 3, 0], sizes = [16, 16, 128], strides = [1, 1, 1]} : vector<16x20x128xbf16> to vector<16x16x128xbf16>
    %78 = arith.maximumf %76, %77 : vector<16x16x128xbf16>
    %79 = vector.extract_strided_slice %71 {offsets = [0, 4, 0], sizes = [16, 16, 128], strides = [1, 1, 1]} : vector<16x20x128xbf16> to vector<16x16x128xbf16>
    %80 = arith.maximumf %78, %79 : vector<16x16x128xbf16>
    %81 = tpu.concatenate %14, %36 in 2 : vector<16x16x128xbf16>, vector<16x16x128xbf16> -> vector<16x16x256xbf16>
    %82 = tpu.concatenate %58, %80 in 2 : vector<16x16x128xbf16>, vector<16x16x128xbf16> -> vector<16x16x256xbf16>
    %c0_16 = arith.constant 0 : index
    %c0_17 = arith.constant 0 : index
    %c0_18 = arith.constant 0 : index
    %83 = vector.load %arg5[%c0_16, %c0_17, %c0_18] : memref<2x256x128xbf16, #tpu.memory_space<vmem>>, vector<1x256x128xbf16>
    %84 = vector.shape_cast %83 : vector<1x256x128xbf16> to vector<256x128xbf16>
    %85 = vector.shape_cast %81 : vector<16x16x256xbf16> to vector<256x256xbf16>
    %cst_19 = arith.constant dense<0.000000e+00> : vector<256x128xf32>
    %86 = tpu.matmul %85, %84, %cst_19 {dimension_numbers = #tpu.dot_dimension_numbers<[1], [0], [0], [1], [0, 0, 1, 1], [], []>} : vector<256x256xbf16>, vector<256x128xbf16>, vector<256x128xf32> -> vector<256x128xf32>
    %c1 = arith.constant 1 : index
    %c0_20 = arith.constant 0 : index
    %c0_21 = arith.constant 0 : index
    %87 = vector.load %arg5[%c1, %c0_20, %c0_21] : memref<2x256x128xbf16, #tpu.memory_space<vmem>>, vector<1x256x128xbf16>
    %88 = vector.shape_cast %87 : vector<1x256x128xbf16> to vector<256x128xbf16>
    %89 = vector.shape_cast %82 : vector<16x16x256xbf16> to vector<256x256xbf16>
    %cst_22 = arith.constant dense<0.000000e+00> : vector<256x128xf32>
    %90 = tpu.matmul %89, %88, %cst_22 {dimension_numbers = #tpu.dot_dimension_numbers<[1], [0], [0], [1], [0, 0, 1, 1], [], []>} : vector<256x256xbf16>, vector<256x128xbf16>, vector<256x128xf32> -> vector<256x128xf32>
    %91 = arith.addf %86, %90 : vector<256x128xf32>
    %c0_23 = arith.constant 0 : index
    %c0_24 = arith.constant 0 : index
    %92 = vector.load %arg6[%c0_23, %c0_24] : memref<1x128xf32, #tpu.memory_space<vmem>>, vector<1x128xf32>
    %93 = vector.broadcast %92 : vector<1x128xf32> to vector<256x128xf32>
    %94 = arith.mulf %91, %93 : vector<256x128xf32>
    %c0_25 = arith.constant 0 : index
    %c0_26 = arith.constant 0 : index
    %95 = vector.load %arg7[%c0_25, %c0_26] : memref<1x128xf32, #tpu.memory_space<vmem>>, vector<1x128xf32>
    %96 = vector.broadcast %95 : vector<1x128xf32> to vector<256x128xf32>
    %97 = arith.addf %94, %96 : vector<256x128xf32>
    %cst_27 = arith.constant 0.000000e+00 : f32
    %98 = vector.broadcast %cst_27 : f32 to vector<256x128xf32>
    %99 = arith.maximumf %97, %98 : vector<256x128xf32>
    %100 = arith.truncf %99 : vector<256x128xf32> to vector<256x128xbf16>
    %101 = vector.shape_cast %100 : vector<256x128xbf16> to vector<16x16x128xbf16>
    %c0_28 = arith.constant 0 : index
    %c0_29 = arith.constant 0 : index
    %c0_30 = arith.constant 0 : index
    %c0_31 = arith.constant 0 : index
    %102 = vector.load %arg8[%c0_28, %c0_29, %c0_30, %c0_31] : memref<1x16x16x128xbf16, #tpu.memory_space<vmem>>, vector<1x16x16x128xbf16>
    %103 = vector.shape_cast %102 : vector<1x16x16x128xbf16> to vector<16x16x128xbf16>
    %104 = vector.shape_cast %101 : vector<16x16x128xbf16> to vector<1x16x16x128xbf16>
    tpu.vector_store %arg8[%c0_28, %c0_29, %c0_30, %c0_31], %104 {strides = array<i32>} : memref<1x16x16x128xbf16, #tpu.memory_space<vmem>>, vector<1x16x16x128xbf16>,
    return
  }
  func.func @transform_0(%arg0: i32) -> (i32, i32, i32, i32) {
    %c0_i32 = arith.constant 0 : i32
    %c0_i32_0 = arith.constant 0 : i32
    %c0_i32_1 = arith.constant 0 : i32
    %c0_i32_2 = arith.constant 0 : i32
    return %arg0, %c0_i32, %c0_i32_0, %c0_i32_1 : i32, i32, i32, i32
  }
  func.func @transform_1(%arg0: i32) -> (i32, i32) {
    %c0_i32 = arith.constant 0 : i32
    %c0_i32_0 = arith.constant 0 : i32
    %c0_i32_1 = arith.constant 0 : i32
    return %c0_i32, %c0_i32_0 : i32, i32
  }
  func.func @transform_2(%arg0: i32) -> (i32, i32) {
    %c0_i32 = arith.constant 0 : i32
    %c0_i32_0 = arith.constant 0 : i32
    %c0_i32_1 = arith.constant 0 : i32
    return %c0_i32, %c0_i32_0 : i32, i32
  }
  func.func @transform_3(%arg0: i32) -> (i32, i32) {
    %c0_i32 = arith.constant 0 : i32
    %c0_i32_0 = arith.constant 0 : i32
    %c0_i32_1 = arith.constant 0 : i32
    return %c0_i32, %c0_i32_0 : i32, i32
  }
  func.func @transform_4(%arg0: i32) -> (i32, i32, i32) {
    %c0_i32 = arith.constant 0 : i32
    %c0_i32_0 = arith.constant 0 : i32
    %c0_i32_1 = arith.constant 0 : i32
    %c0_i32_2 = arith.constant 0 : i32
    return %c0_i32, %c0_i32_0, %c0_i32_1 : i32, i32, i32
  }
  func.func @transform_5(%arg0: i32) -> (i32, i32) {
    %c0_i32 = arith.constant 0 : i32
    %c0_i32_0 = arith.constant 0 : i32
    %c0_i32_1 = arith.constant 0 : i32
    return %c0_i32, %c0_i32_0 : i32, i32
  }
  func.func @transform_6(%arg0: i32) -> (i32, i32) {
    %c0_i32 = arith.constant 0 : i32
    %c0_i32_0 = arith.constant 0 : i32
    %c0_i32_1 = arith.constant 0 : i32
    return %c0_i32, %c0_i32_0 : i32, i32
  }
  func.func @transform_7(%arg0: i32) -> (i32, i32, i32, i32) {
    %c0_i32 = arith.constant 0 : i32
    %c0_i32_0 = arith.constant 0 : i32
    %c0_i32_1 = arith.constant 0 : i32
    %c0_i32_2 = arith.constant 0 : i32
    return %arg0, %c0_i32, %c0_i32_0, %c0_i32_1 : i32, i32, i32, i32
  }
}

</mosaic_0001>

<bundles_post_ra>
// kernel: tpu_custom_call.1
= control target key start
LH: loop header
LB: loop body
LE: loop exit
PB: predicated region body
PF: predicated region fallthrough
CT: control target
= control target key end

     0   :  { %12 = vsyncpa [#allocation3], 0  ;;  %s7018_s0 = inlined_call_operand.hbm [shape: bf16[2,16,16,128], index: 0, kind: input, shape index: {}]   ;;  %s7019_s1 = inlined_call_operand.hbm [shape: bf16[128,128], index: 1, kind: input, shape index: {}]   ;;  %s7020_s2 = inlined_call_operand.vmem [shape: f32[1,128], index: 2, kind: input, shape index: {}]   ;;  %s7021_s3 = inlined_call_operand.vmem [shape: f32[1,128], index: 3, kind: input, shape index: {}]   ;;  %s7022_s4 = inlined_call_operand.hbm [shape: bf16[2,256,128], index: 4, kind: input, shape index: {}]   ;;  %s7023_s5 = inlined_call_operand.vmem [shape: f32[1,128], index: 5, kind: input, shape index: {}]   ;;  %s7024_s6 = inlined_call_operand.vmem [shape: f32[1,128], index: 6, kind: input, shape index: {}]   ;;  %s7025_s7 = inlined_call_operand.hbm [shape: bf16[2,16,16,128], index: 7, kind: output, shape index: {}]  }
   0x1   :  { %14 = vsyncpa [#allocation3 + $0x1], 0 }
   0x2   :  { %15 = vsyncpa [#allocation6], 0 }
   0x3   :  { %16 = vsyncpa [#allocation4], 0 }
   0x4   :  { %18 = vsyncpa [#allocation4 + $0x1], 0  ;;  %s4801_s24 = smov 0   ;;  %s4803_s25 = smov 0  }
   0x5   :  { %s4805_s26 = smov 0   ;;  %s4807_s27 = smov 0  }
   0x6 LB: > { %s4822_s28 = sadd.s32 4294967295, %s4750_s27   ;;  %s3915_s29 = sadd.s32 4294967294, %s4750_s27   ;;  %s4750_s27 = sphi %s4807_s27, %s7198_s27   ;;  %s4746_s26 = sphi %s4805_s26, %s7197_s26   ;;  %s4742_s25 = sphi %s4803_s25, %s7196_s25   ;;  %s4738_s24 = sphi %s4801_s24, %s7195_s24  }
   0x7   : > { %p44_p0 = scmp.ne.s32.totalorder %s4742_s25, %s4738_s24  ;;  %p7026_p1 = scmp.eq.s32.totalorder %s4822_s28, 0 }
   0x8   : > { %p200_p3 = scmp.eq.s32.totalorder %s3915_s29, 1  ;;  %p3916_p5 = scmp.ge.s32.totalorder %s4750_s27, 1 }
   0x9   : > { %p4831_p4 = por %p7026_p1, %p44_p0  ;;  %p207_p7 = scmp.lt.s32.totalorder %s4750_s27, 3 }
   0xa   : > { %p4836_p6 = por %p200_p3, %p44_p0  ;;  %s4752_s10 = smov [#allocation5]  }
   0xb   : > { %s7063_s30 = scalar_select %p4831_p4, 1, 0 }
   0xc   : > { %s7064_s8 = scalar_select %p4836_p6, 1, 0 }
   0xd   : > { %p4841_p8 = pnand %p3916_p5, %p207_p7  ;;  %s219_s11 = sshll.u32 %s4752_s10, 4  ;;  %s4845_s11 = int_to_ptr.vmem [resolvable:$true] %s219_s11 }
   0xe   : > { %s4753_s13 = smov [#allocation7]   ;;  %s4594_s17 = scalar_lea.hbm %s7019_s1, 1024 }
   0xf   : > { %p4478_p9 = pneg %p4841_p8  ;;  %s238_s14 = sshll.u32 %s4753_s13, 4  ;;  %s4856_s14 = int_to_ptr.vmem [resolvable:$true] %s238_s14 }
  0x10   : > { %p4595_p12 = scmp.ne.s32.totalorder %s7019_s1, %s4594_s17  ;;  %p4601_p5 = scmp.lt.u32.totalorder %s4594_s17, %s7019_s1 }
  0x11   : > { %p4852_p11 = pnand %p4478_p9, %p7026_p1 }
  0x13   : > { %p4596_p13 = pneg %p4852_p11 }
  0x15   : > { %p4597_p0 = pnand %p4596_p13, %p4595_p12 }
  0x17   : > { %p4598_p3 = pneg %p4597_p0 }
  0x19   : > { %p4603_p7 = pnand %p4601_p5, %p4598_p3 }
  0x1b   : > { %4606 = shalt.err (!%p4603_p7)
}
  0x1c   : > { %s4607_s22 = scalar_lea.vmem %s4845_s11, 1024  ;;  %p4615_p2 = scmp.lt.s32.totalorder %s4845_s11, %s4845_s11 }
  0x1d   : > { %p4608_p9 = scmp.ne.s32.totalorder %s4845_s11, %s4607_s22  ;;  %p4616_p12 = scmp.lt.s32.totalorder %s4607_s22, %s4607_s22 }
  0x1f   : > { %p4610_p10 = pnand %p4608_p9, %p4596_p13  ;;  %p4617_p0 = por %p4616_p12, %p4615_p2 }
  0x21   : > { %p4611_p1 = pneg %p4610_p10 }
  0x23   : > { %p4618_p6 = pnand %p4617_p0, %p4611_p1 }
  0x25   : > { %4621 = shalt.err (!%p4618_p6)
}
  0x26   : > { %s7027_s23 = smov 64   ;;  %s4755_s29 = smov 4  }
  0x27   : > { %4481 = dma.hbm_to_vmem [thread:$0]  (!%p4852_p11), %s7019_s1, 1024, %s4845_s11, [#allocation6], %s7027_s23, %s7027_s23, %s4755_s29  }
  0x28   : > { %s4622_s17 = scalar_lea.hbm %s7022_s4, 4096 }
  0x29   : > { %p4623_p1 = scmp.ne.s32.totalorder %s7022_s4, %s4622_s17  ;;  %p4629_p10 = scmp.lt.u32.totalorder %s4622_s17, %s7022_s4 }
  0x2b   : > { %p4625_p2 = pnand %p4623_p1, %p4596_p13 }
  0x2d   : > { %p4626_p6 = pneg %p4625_p2 }
  0x2f   : > { %p4631_p3 = pnand %p4629_p10, %p4626_p6 }
  0x31   : > { %4634 = shalt.err (!%p4631_p3)
}
  0x32   : > { %s4635_s11 = scalar_lea.vmem %s4856_s14, 4096  ;;  %p4643_p12 = scmp.lt.s32.totalorder %s4856_s14, %s4856_s14 }
  0x33   : > { %p4636_p5 = scmp.ne.s32.totalorder %s4856_s14, %s4635_s11  ;;  %p4644_p0 = scmp.lt.s32.totalorder %s4635_s11, %s4635_s11 }
  0x35   : > { %p4638_p7 = pnand %p4636_p5, %p4596_p13  ;;  %p4645_p1 = por %p4644_p0, %p4643_p12 }
  0x37   : > { %p4639_p9 = pneg %p4638_p7 }
  0x39   : > { %p4646_p2 = pnand %p4645_p1, %p4639_p9 }
  0x3b   : > { %4649 = shalt.err (!%p4646_p2)
}
  0x3c   : > { %4484 = dma.hbm_to_vmem [thread:$0]  (!%p4852_p11), %s7022_s4, 4096, %s4856_s14, [#allocation6], %s7027_s23, %s7027_s23, %s4755_s29  }
  0x3d   : > { %s4917_s12 = sadd.s32 1, %s4750_s27   ;;  %s31_s13 = sadd.s32 1, %s4746_s26 }
  0x3e   : > { %s28_s15 = ssub.s32 %s4750_s27, %s4917_s12  ;;  %p38_p13 = scmp.ne.s32.totalorder %s4746_s26, %s4742_s25 }
  0x3f   : > { %p29_p6 = scmp.eq.s32.totalorder %s28_s15, 0  ;;  %p39_p10 = scmp.eq.s32.totalorder %s4750_s27, 0 }
  0x40   : > { %p7067_p3 = scmp.eq.s32.totalorder %s4822_s28, 1  ;;  %p4495_p7 = scmp.lt.s32.totalorder %s4750_s27, 2 }
  0x41   : > { %s4933_s17 = scalar_select %p29_p6, %s4746_s26, %s31_s13  }
  0x42   : > { %p4927_p5 = por %p7067_p3, %p38_p13  ;;  %p40_p9 = por %p39_p10, %p38_p13 }
  0x43   : > { %s258_s18 = sand.u32 1, %s4746_s26   ;;  %s4025_s14 = sshll.u32 %s4750_s27, 11 }
  0x44   : > { %s7068_s16 = scalar_select %p4927_p5, 1, 0 }
  0x45   : > { %s3920_s19 = sshll.u32 %s258_s18, 7  ;;  %s4940_s11 = scalar_lea.hbm %s7018_s0, %s4025_s14 }
  0x46   : > { %s262_s22 = scalar_lea.vmem [#allocation2], %s3920_s19  ;;  %p4944_p11 = pnand %p4495_p7, %p40_p9 }
  0x47   : > { %s269_s10 = sshll.u32 %s262_s22, 4  ;;  %s4948_s15 = scalar_lea.sflag [#allocation3], %s258_s18  ;;  %s4942_s10 = int_to_ptr.vmem [resolvable:$true] %s269_s10 }
  0x48   : > { %s4650_s23 = scalar_lea.hbm %s4940_s11, 2048  ;;  %p4652_p0 = pneg %p4944_p11 }
  0x49   : > { %p4651_p12 = scmp.ne.s32.totalorder %s4940_s11, %s4650_s23  ;;  %s4655_s20 = scalar_lea.hbm %s7018_s0, 4096 }
  0x4a   : > { %p4656_p13 = scmp.lt.u32.totalorder %s4940_s11, %s7018_s0  ;;  %p4657_p6 = scmp.lt.u32.totalorder %s4655_s20, %s4650_s23 }
  0x4b   : > { %p4653_p1 = pnand %p4652_p0, %p4651_p12  ;;  %p4659_p3 = scmp.lt.u32.totalorder %s4650_s23, %s4940_s11 }
  0x4c   : > { %p4658_p10 = por %p4657_p6, %p4656_p13 }
  0x4d   : > { %p4654_p2 = pneg %p4653_p1 }
  0x4e   : > { %p4660_p7 = por %p4659_p3, %p4658_p10 }
  0x50   : > { %p4661_p9 = pnand %p4660_p7, %p4654_p2 }
  0x52   : > { %4664 = shalt.err (!%p4661_p9)
}
  0x53   : > { %s4665_s18 = scalar_lea.vmem %s4942_s10, 2048  ;;  %s4756_s19 = smov [#allocation2]  }
  0x54   : > { %p4666_p12 = scmp.ne.s32.totalorder %s4942_s10, %s4665_s18  ;;  %s4670_s14 = sshll.u32 %s4756_s19, 4  ;;  %s4671_s14 = int_to_ptr.vmem [resolvable:$false] %s4670_s14 }
  0x55   : > { %s4672_s21 = scalar_lea.vmem %s4671_s14, 4096  ;;  %p4673_p4 = scmp.lt.s32.totalorder %s4942_s10, %s4671_s14 }
  0x56   : > { %p4668_p1 = pnand %p4666_p12, %p4652_p0  ;;  %p4674_p13 = scmp.lt.s32.totalorder %s4672_s21, %s4665_s18 }
  0x58   : > { %p4669_p5 = pneg %p4668_p1  ;;  %p4675_p6 = por %p4674_p13, %p4673_p4 }
  0x5a   : > { %p4676_p10 = pnand %p4675_p6, %p4669_p5 }
  0x5c   : > { %4679 = shalt.err (!%p4676_p10)
}
  0x5d   : > { %s7070_s23 = smov 64   ;;  %281 = sbr.rel (%p4841_p8) target bundleno = 1031 (0x407), region = 48 }
  0x5e   : > { %4488 = dma.hbm_to_vmem [thread:$0]  (!%p4944_p11), %s4940_s11, 2048, %s4942_s10, %s4948_s15, %s7070_s23, %s7070_s23, %s4755_s29  }
  0x64   : > { %s4982_s20 = sand.u32 1, %s4742_s25   ;;  %p7071_p4 = scmp.ne.s32.totalorder %s7063_s30, 0 }
  0x65   : > { %s3924_s22 = sshll.u32 %s4982_s20, 7  ;;  %s284_s18 = scalar_lea.sflag [#allocation3], %s4982_s20 }
  0x66   : > { %s4988_s13 = scalar_lea.vmem [#allocation2], %s3924_s22 }
  0x67   : > { %4725 = dma.done.wait (%p7071_p4), %s284_s18, 2048  }
  0x68   : > { %4727 = vsyncadd (%p7071_p4), %s284_s18, 4294965248  ;;  %p7072_p5 = scmp.eq.s32.totalorder %s4822_s28, 0 }
  0x6a   : > { %4729 = dma.done.wait (%p7072_p5), [#allocation6], 5120   ;;  %p7073_p8 = pmov %p7072_p5 }
  0x6b   : > { %v4538_v0 = vld [vmem:[#allocation5] sm:$0xff]   ;;  %v4539_v1 = vld [vmem:[#allocation5 + $0x8] sm:$0xff]   ;;  %v4540_v2 = vld [vmem:[#allocation5 + $0x10] sm:$0xff]   ;;  %vm898_vm0 = vcmask 1040384   ;;  %vm1189_vm1 = vcmask 1046528   ;;  %vm1447_vm3 = vcmask 1045504  }
  0x6c   : > { %4731 = vsyncadd (%p7073_p8), [#allocation6], 4294962176  ;;  %4402 = vmatprep.subr.bf16.mxu0 %v4538_v0  ;;  %4450 = vmatprep.subr.bf16.mxu1 %v4538_v0  ;;  %v4541_v3 = vld [vmem:[#allocation5 + $0x18] sm:$0xff]   ;;  %v4546_v4 = vld [vmem:[%s4988_s13] sm:$0xff]   ;;  %vm964_vm2 = vsmask.f32 7424 }
  0x6d   : > { %4403 = vmatpush3.bf16.msra.mxu0 %v4538_v0  ;;  %4458 = vmatpush3.bf16.msra.mxu1 %v4538_v0  ;;  %v4547_v5 = vld [vmem:[%s4988_s13 + $0x40] sm:$0xff]   ;;  %v4543_v7 = vld [vmem:[#allocation5 + $0x28] sm:$0xff]   ;;  %v4544_v8 = vld [vmem:[#allocation5 + $0x30] sm:$0xff]   ;;  %vm1270_vm4 = vsmask.f32 6400  ;;  %s6840_s21 = scalar_lea.vmem [#allocation8], %s3924_s22 }
  0x6e   : > { %4404 = vmatprep.subr.bf16.mxu0 %v4539_v1  ;;  %4451 = vmatprep.subr.bf16.mxu1 %v4539_v1  ;;  %v4542_v6 = vld [vmem:[#allocation5 + $0x20] sm:$0xff]   ;;  %v4545_v9 = vld [vmem:[#allocation5 + $0x38] sm:$0xff]   ;;  %v4548_v10 = vld [vmem:[%s4988_s13 + $0x8] sm:$0xff]   ;;  %s4058_s23 = sshll.u32 %s4822_s28, 11  ;;  %s3823_s22 = sshll.u32 %s6840_s21, 4  ;;  %s6973_s22 = int_to_ptr.vmem [resolvable:$true] %s3823_s22 }
  0x6f   : > { %4418 = vmatprep.mubr.bf16.mxu0 %v4546_v4  ;;  %4434 = vmatprep.mubr.bf16.mxu1 %v4547_v5  ;;  %v4549_v11 = vld [vmem:[%s4988_s13 + $0x48] sm:$0xff]   ;;  %v4550_v12 = vld [vmem:[%s4988_s13 + $0x10] sm:$0xff]   ;;  %v4552_v14 = vld [vmem:[%s4988_s13 + $0x18] sm:$0xff]   ;;  %s6971_s30 = scalar_lea.hbm %s7025_s7, %s4058_s23  ;;  %s3810_s9 = scalar_lea.sflag [#allocation4], %s4982_s20 }
  0x70   : > { %v4551_v13 = vld [vmem:[%s4988_s13 + $0x50] sm:$0xff]   ;;  %v4553_v15 = vld [vmem:[%s4988_s13 + $0x58] sm:$0xff]   ;;  %v4554_v16 = vld [vmem:[%s4988_s13 + $0x20] sm:$0xff]   ;;  %s4680_s29 = scalar_lea.vmem %s6973_s22, 2048  ;;  %p7192_p0 = scmp.ne.s32.totalorder %s7068_s16, 0 }
  0x71   : > { %4405 = vmatpush3.bf16.msra.mxu0 %v4539_v1  ;;  %4459 = vmatpush3.bf16.msra.mxu1 %v4539_v1  ;;  %v4555_v17 = vld [vmem:[%s4988_s13 + $0x60] sm:$0xff]   ;;  %v4556_v18 = vld [vmem:[%s4988_s13 + $0x28] sm:$0xff]   ;;  %v4558_v20 = vld [vmem:[%s4988_s13 + $0x30] sm:$0xff]   ;;  %p4681_p11 = scmp.ne.s32.totalorder %s6973_s22, %s4680_s29  ;;  %s4758_s28 = smov [#allocation8]  }
  0x72   : > { %4406 = vmatprep.subr.bf16.mxu0 %v4540_v2  ;;  %4452 = vmatprep.subr.bf16.mxu1 %v4540_v2  ;;  %v4557_v19 = vld [vmem:[%s4988_s13 + $0x68] sm:$0xff]   ;;  %v4559_v21 = vld [vmem:[%s4988_s13 + $0x70] sm:$0xff]   ;;  %v4560_v22 = vld [vmem:[%s4988_s13 + $0x38] sm:$0xff]   ;;  %s4684_s11 = sshll.u32 %s4758_s28, 4  ;;  %s4685_s11 = int_to_ptr.vmem [resolvable:$false] %s4684_s11 }
  0x73   : > { %v4561_v23 = vld [vmem:[%s4988_s13 + $0x78] sm:$0xff]   ;;  %v4562_v24 = vld [vmem:[#allocation7 + $0x40] sm:$0xff]   ;;  %v4564_v26 = vld [vmem:[#allocation7 + $0x48] sm:$0xff]   ;;  %p4682_p2 = pnand %p4681_p11, %p7192_p0  ;;  %s4686_s10 = scalar_lea.vmem %s4685_s11, 4096 }
  0x74   : > { %v4563_v25 = vld [vmem:[#allocation7] sm:$0xff]   ;;  %v4565_v27 = vld [vmem:[#allocation7 + $0x8] sm:$0xff]   ;;  %v4566_v28 = vld [vmem:[#allocation7 + $0x50] sm:$0xff]   ;;  %p4687_p7 = scmp.lt.s32.totalorder %s6973_s22, %s4685_s11  ;;  %p4688_p9 = scmp.lt.s32.totalorder %s4686_s10, %s4680_s29 }
  0x75   : > { %4407 = vmatpush3.bf16.msra.mxu0 %v4540_v2  ;;  %4460 = vmatpush3.bf16.msra.mxu1 %v4540_v2  ;;  %v4567_v29 = vld [vmem:[#allocation7 + $0x10] sm:$0xff]   ;;  %v4568_v30 = vld [vmem:[#allocation7 + $0x58] sm:$0xff]   ;;  %v4570_v32 = vld [vmem:[#allocation7 + $0x60] sm:$0xff]   ;;  %p4683_p3 = pneg %p4682_p2 }
  0x76   : > { %4408 = vmatprep.subr.bf16.mxu0 %v4541_v3  ;;  %4453 = vmatprep.subr.bf16.mxu1 %v4541_v3  ;;  %v4569_v31 = vld [vmem:[#allocation7 + $0x18] sm:$0xff]   ;;  %v4571_v33 = vld [vmem:[#allocation7 + $0x20] sm:$0xff]   ;;  %v4572_v34 = vld [vmem:[#allocation7 + $0x68] sm:$0xff]   ;;  %p4689_p12 = por %p4688_p9, %p4687_p7 }
  0x77   : > { %v4573_v35 = vld [vmem:[#allocation7 + $0x28] sm:$0xff]   ;;  %v4574_v36 = vld [vmem:[#allocation7 + $0x70] sm:$0xff]   ;;  %v4576_v38 = vld [vmem:[#allocation7 + $0x78] sm:$0xff]  }
  0x78   : > { %v4575_v37 = vld [vmem:[#allocation7 + $0x30] sm:$0xff]   ;;  %v4577_v39 = vld [vmem:[#allocation7 + $0x38] sm:$0xff]   ;;  %v4578_v40 = vld [vmem:[#allocation7 + $0xc0] sm:$0xff]   ;;  %p4690_p1 = pnand %p4689_p12, %p4683_p3 }
  0x79   : > { %4409 = vmatpush3.bf16.msra.mxu0 %v4541_v3  ;;  %4461 = vmatpush3.bf16.msra.mxu1 %v4541_v3  ;;  %v4579_v41 = vld [vmem:[#allocation7 + $0x80] sm:$0xff]   ;;  %v4580_v42 = vld [vmem:[#allocation7 + $0xc8] sm:$0xff]   ;;  %v4582_v44 = vld [vmem:[#allocation7 + $0xd0] sm:$0xff]  }
  0x7a   : > { %4410 = vmatprep.subr.bf16.mxu0 %v4542_v6  ;;  %4454 = vmatprep.subr.bf16.mxu1 %v4542_v6  ;;  %v4581_v43 = vld [vmem:[#allocation7 + $0x88] sm:$0xff]   ;;  %v5017_v45 = vld [vmem:[%s7020_s2] ss:$0 sm:$0xff]  ;;  %v4583_v49 = vld [vmem:[#allocation7 + $0x90] sm:$0xff]  }
  0x7b   : > { %v5022_v47 = vld [vmem:[%s7021_s3] ss:$0 sm:$0xff]  ;;  %v4584_v54 = vld [vmem:[#allocation7 + $0xd8] sm:$0xff]  }
  0x7c   : > { %v4585_v5 = vld [vmem:[#allocation7 + $0x98] sm:$0xff]  }
  0x7d   : > { %4411 = vmatpush3.bf16.msra.mxu0 %v4542_v6  ;;  %4462 = vmatpush3.bf16.msra.mxu1 %v4542_v6 }
  0x7e   : > { %4412 = vmatprep.subr.bf16.mxu0 %v4543_v7  ;;  %4455 = vmatprep.subr.bf16.mxu1 %v4543_v7 }
  0x81   : > { %4413 = vmatpush3.bf16.msra.mxu0 %v4543_v7  ;;  %4463 = vmatpush3.bf16.msra.mxu1 %v4543_v7 }
  0x82   : > { %4414 = vmatprep.subr.bf16.mxu0 %v4544_v8  ;;  %4456 = vmatprep.subr.bf16.mxu1 %v4544_v8 }
  0x85   : > { %4415 = vmatpush3.bf16.msra.mxu0 %v4544_v8  ;;  %4464 = vmatpush3.bf16.msra.mxu1 %v4544_v8 }
  0x86   : > { %4416 = vmatprep.subr.bf16.mxu0 %v4545_v9  ;;  %4457 = vmatprep.subr.bf16.mxu1 %v4545_v9 }
  0x89   : > { %4417 = vmatpush3.bf16.msra.mxu0 %v4545_v9  ;;  %4465 = vmatpush3.bf16.msra.mxu1 %v4545_v9  ;;  %v4586_v9 = vld [vmem:[#allocation7 + $0xe0] sm:$0xff]  }
  0x8a   : > { %4290 = vmatprep.subr.bf16.mxu0 %v4562_v24  ;;  %4178 = vmatprep.subr.bf16.mxu1 %v4578_v40  ;;  %v7030_v40 = vmov 0  }
  0x8c   : > { %4419 = vmatmul.mubr.bf16.vlgmr.msra.gmra.mrb[0].mxu0 %v4548_v10  ;;  %4435 = vmatmul.mubr.bf16.vlgmr.msra.gmra.mrb[0].mxu1 %v4549_v11 }
  0x8d   : > { %4422 = vmatprep.mubr.bf16.mxu0 %v4550_v12  ;;  %4438 = vmatprep.mubr.bf16.mxu1 %v4551_v13 }
  0x8e   : > { %4291 = vmatpush3.bf16.msra.mxu0 %v4563_v25  ;;  %4179 = vmatpush3.bf16.msra.mxu1 %v4579_v41 }
  0x8f   : > { %4292 = vmatprep.subr.bf16.mxu0 %v4564_v26  ;;  %4180 = vmatprep.subr.bf16.mxu1 %v4580_v42 }
  0x92   : > { %4293 = vmatpush3.bf16.msra.mxu0 %v4565_v27  ;;  %4181 = vmatpush3.bf16.msra.mxu1 %v4581_v43 }
  0x93   : > { %4294 = vmatprep.subr.bf16.mxu0 %v4566_v28  ;;  %4182 = vmatprep.subr.bf16.mxu1 %v4582_v44 }
  0x94   : > { %4423 = vmatmul.mubr.bf16.gmra.mrb[4].mxu0 %v4552_v14  ;;  %4439 = vmatmul.mubr.bf16.gmra.mrb[4].mxu1 %v4553_v15 }
  0x95   : > { %4426 = vmatprep.mubr.bf16.mxu0 %v4554_v16  ;;  %4442 = vmatprep.mubr.bf16.mxu1 %v4555_v17 }
  0x96   : > { %4295 = vmatpush3.bf16.msra.mxu0 %v4567_v29  ;;  %4183 = vmatpush3.bf16.msra.mxu1 %v4583_v49 }
  0x97   : > { %4296 = vmatprep.subr.bf16.mxu0 %v4568_v30  ;;  %4184 = vmatprep.subr.bf16.mxu1 %v4584_v54  ;;  %v4590_v54 = vld [vmem:[#allocation7 + $0xf0] sm:$0xff]  }
  0x9a   : > { %4297 = vmatpush3.bf16.msra.mxu0 %v4569_v31  ;;  %4185 = vmatpush3.bf16.msra.mxu1 %v4585_v5 }
  0x9b   : > { %4298 = vmatprep.subr.bf16.mxu0 %v4570_v32  ;;  %4186 = vmatprep.subr.bf16.mxu1 %v4586_v9 }
  0x9c   : > { %4427 = vmatmul.mubr.bf16.gmra.mrb[8].mxu0 %v4556_v18  ;;  %4443 = vmatmul.mubr.bf16.gmra.mrb[8].mxu1 %v4557_v19 }
  0x9d   : > { %4430 = vmatprep.mubr.bf16.mxu0 %v4558_v20  ;;  %4446 = vmatprep.mubr.bf16.mxu1 %v4559_v21  ;;  %v4587_v21 = vld [vmem:[#allocation7 + $0xa0] sm:$0xff]  }
  0x9e   : > { %4299 = vmatpush3.bf16.msra.mxu0 %v4571_v33  ;;  %4187 = vmatpush3.bf16.msra.mxu1 %v4587_v21 }
  0x9f   : > { %4300 = vmatprep.subr.bf16.mxu0 %v4572_v34 }
  0xa2   : > { %4301 = vmatpush3.bf16.msra.mxu0 %v4573_v35 }
  0xa3   : > { %4302 = vmatprep.subr.bf16.mxu0 %v4574_v36 }
  0xa4   : > { %4431 = vmatmul.mubr.bf16.gmra.mrb[12].mxu0 %v4560_v22  ;;  %4447 = vmatmul.mubr.bf16.gmra.mrb[12].mxu1 %v4561_v23 }
  0xa6   : > { %4303 = vmatpush3.bf16.msra.mxu0 %v4575_v37 }
  0xa7   : > { %4304 = vmatprep.subr.bf16.mxu0 %v4576_v38 }
  0xaa   : > { %4305 = vmatpush3.bf16.msra.mxu0 %v4577_v39 }
 0x15f   : > { %v4420_v46 = vpop.f32.mrb[0].mxu0  ;;  %v4436_v48 = vpop.f32.mrb[0].mxu1 }
 0x160   : > { %v689_v50 = vmul.f32 %v4420_v46, %v5017_v45  ;;  %v553_v51 = vpop.f32.mrb[1].mxu0  ;;  %v705_v52 = vmul.f32 %v4436_v48, %v5017_v45  ;;  %v617_v53 = vpop.f32.mrb[1].mxu1 }
 0x161   : > { %v687_v55 = vmul.f32 %v5017_v45, %v553_v51  ;;  %v4421_v56 = vpop.f32.mrb[2].mxu0  ;;  %v703_v57 = vmul.f32 %v5017_v45, %v617_v53  ;;  %v4437_v58 = vpop.f32.mrb[2].mxu1  ;;  %v4589_v53 = vld [vmem:[#allocation7 + $0xa8] sm:$0xff]  }
 0x162   : > { %v728_v59 = vadd.f32 %v5022_v47, %v689_v50  ;;  %v690_v60 = vmul.f32 %v4421_v56, %v5017_v45  ;;  %v556_v61 = vpop.f32.mrb[3].mxu0  ;;  %v744_v62 = vadd.f32 %v5022_v47, %v705_v52  ;;  %v706_v63 = vmul.f32 %v4437_v58, %v5017_v45  ;;  %v620_v0 = vpop.f32.mrb[3].mxu1  ;;  %v4588_v52 = vld [vmem:[#allocation7 + $0xe8] sm:$0xff]  }
 0x163   : > { %v726_v1 = vadd.f32 %v5022_v47, %v687_v55  ;;  %v688_v2 = vmul.f32 %v5017_v45, %v556_v61  ;;  %v742_v3 = vadd.f32 %v5022_v47, %v703_v57  ;;  %v704_v4 = vmul.f32 %v5017_v45, %v620_v0  ;;  %4188 = vmatprep.subr.bf16.mxu1 %v4588_v52  ;;  %v4593_v52 = vld [vmem:[#allocation7 + $0xb8] sm:$0xff]  }
 0x164   : > { %v729_v6 = vadd.f32 %v5022_v47, %v690_v60  ;;  %v776_v7 = vmax.f32 %v744_v62, 0.0  ;;  %v745_v8 = vadd.f32 %v5022_v47, %v706_v63  ;;  %v760_v13 = vmax.f32 %v728_v59, 0.0  ;;  %4189 = vmatpush3.bf16.msra.mxu1 %v4589_v53 }
 0x165   : > { %v727_v10 = vadd.f32 %v5022_v47, %v688_v2  ;;  %v774_v11 = vmax.f32 %v742_v3, 0.0  ;;  %v743_v12 = vadd.f32 %v5022_v47, %v704_v4  ;;  %v758_v16 = vmax.f32 %v726_v1, 0.0  ;;  %4190 = vmatprep.subr.bf16.mxu1 %v4590_v54 }
 0x166   : > { %v761_v14 = vmax.f32 %v729_v6, 0.0  ;;  %v777_v15 = vmax.f32 %v745_v8, 0.0 }
 0x167   : > { %v759_v17 = vmax.f32 %v727_v10, 0.0  ;;  %v4424_v18 = vpop.f32.mrb[4].mxu0  ;;  %v775_v19 = vmax.f32 %v743_v12, 0.0  ;;  %v4440_v20 = vpop.f32.mrb[4].mxu1 }
 0x168   : > { %v5040_v22 = vpack.c.bf16 %v761_v14, %v760_v13  ;;  %v693_v23 = vmul.f32 %v4424_v18, %v5017_v45  ;;  %v569_v24 = vpop.f32.mrb[5].mxu0  ;;  %v5043_v25 = vpack.c.bf16 %v777_v15, %v776_v7  ;;  %v709_v26 = vmul.f32 %v4440_v20, %v5017_v45  ;;  %v633_v27 = vpop.f32.mrb[5].mxu1  ;;  %v4591_v7 = vld [vmem:[#allocation7 + $0xb0] sm:$0xff]  }
 0x169   : > { %v5046_v28 = vpack.c.bf16 %v759_v17, %v758_v16  ;;  %v691_v29 = vmul.f32 %v5017_v45, %v569_v24  ;;  %v4425_v30 = vpop.f32.mrb[6].mxu0  ;;  %v5049_v31 = vpack.c.bf16 %v775_v19, %v774_v11  ;;  %v707_v32 = vmul.f32 %v5017_v45, %v633_v27  ;;  %v4441_v33 = vpop.f32.mrb[6].mxu1  ;;  %4191 = vmatpush3.bf16.msra.mxu1 %v4591_v7 }
 0x16a   : > { %v732_v34 = vadd.f32 %v5022_v47, %v693_v23  ;;  %v694_v35 = vmul.f32 %v4425_v30, %v5017_v45  ;;  %v572_v36 = vpop.f32.mrb[7].mxu0  ;;  %v748_v37 = vadd.f32 %v5022_v47, %v709_v26  ;;  %v710_v38 = vmul.f32 %v4441_v33, %v5017_v45  ;;  %v636_v39 = vpop.f32.mrb[7].mxu1 }
 0x16b   : > { %v5058_v41 = vmax.bf16 %v7030_v40, %v5046_v28  ;;  %v807_v42 = vmax.bf16 %v5040_v22, %v5046_v28  ;;  %v730_v43 = vadd.f32 %v5022_v47, %v691_v29  ;;  %v692_v44 = vmul.f32 %v5017_v45, %v572_v36 }
 0x16c   : > { %v733_v46 = vadd.f32 %v5022_v47, %v694_v35  ;;  %v764_v49 = vmax.f32 %v732_v34, 0.0  ;;  %v746_v51 = vadd.f32 %v5022_v47, %v707_v32  ;;  %v780_v56 = vmax.f32 %v748_v37, 0.0 }
 0x16d   : > { %v821_v48 = vmax.bf16 %v5058_v41, %v5040_v22  ;;  %v731_v50 = vadd.f32 %v5022_v47, %v692_v44  ;;  %v749_v57 = vadd.f32 %v5022_v47, %v710_v38  ;;  %v708_v58 = vmul.f32 %v5017_v45, %v636_v39 }
 0x16e   : > { %v765_v55 = vmax.f32 %v733_v46, 0.0  ;;  %v762_v59 = vmax.f32 %v730_v43, 0.0  ;;  %v815_v61 = vmax.bf16 %v5043_v25, %v5049_v31  ;;  %v778_v63 = vmax.f32 %v746_v51, 0.0  ;;  %v4592_v51 = vld [vmem:[#allocation7 + $0xf8] sm:$0xff]  }
 0x16f   : > { %v763_v60 = vmax.f32 %v731_v50, 0.0  ;;  %v4428_v62 = vpop.f32.mrb[8].mxu0  ;;  %v4444_v0 = vpop.f32.mrb[8].mxu1  ;;  %v781_v4 = vmax.f32 %v749_v57, 0.0  ;;  %v747_v5 = vadd.f32 %v5022_v47, %v708_v58  ;;  %4192 = vmatprep.subr.bf16.mxu1 %v4592_v51 }
 0x170   : > { %v5073_v1 = vpack.c.bf16 %v765_v55, %v764_v49  ;;  %v697_v2 = vmul.f32 %v4428_v62, %v5017_v45  ;;  %v585_v3 = vpop.f32.mrb[9].mxu0  ;;  %v649_v6 = vpop.f32.mrb[9].mxu1  ;;  %v713_v11 = vmul.f32 %v4444_v0, %v5017_v45  ;;  %4193 = vmatpush3.bf16.msra.mxu1 %v4593_v52 }
 0x171   : > { %v5077_v8 = vpack.c.bf16 %v763_v60, %v762_v59  ;;  %v695_v9 = vmul.f32 %v5017_v45, %v585_v3  ;;  %v4429_v10 = vpop.f32.mrb[10].mxu0  ;;  %v711_v12 = vmul.f32 %v5017_v45, %v649_v6  ;;  %v4445_v13 = vpop.f32.mrb[10].mxu1  ;;  %v5084_v16 = vpack.c.bf16 %v781_v4, %v780_v56 }
 0x172   : > { %v736_v14 = vadd.f32 %v5022_v47, %v697_v2  ;;  %v698_v15 = vmul.f32 %v4429_v10, %v5017_v45  ;;  %v588_v17 = vpop.f32.mrb[11].mxu0  ;;  %v779_v18 = vmax.f32 %v747_v5, 0.0  ;;  %v652_v19 = vpop.f32.mrb[11].mxu1  ;;  %v752_v35 = vadd.f32 %v5022_v47, %v713_v11 }
 0x173   : > { %7074 = vst [vmem:[#allocation12_spill] sm:$0xff] %v5084_v16  ;;  %v808_v20 = vmax.bf16 %v5077_v8, %v5040_v22  ;;  %v809_v21 = vmax.bf16 %v5073_v1, %v5077_v8  ;;  %v822_v23 = vmax.bf16 %v807_v42, %v5077_v8  ;;  %v734_v24 = vadd.f32 %v5022_v47, %v695_v9 }
 0x174   : > { %v768_v26 = vmax.f32 %v736_v14, 0.0  ;;  %v737_v27 = vadd.f32 %v5022_v47, %v698_v15  ;;  %v696_v29 = vmul.f32 %v5017_v45, %v588_v17  ;;  %v5094_v30 = vpack.c.bf16 %v779_v18, %v778_v63 }
 0x175   : > { %v823_v32 = vmax.bf16 %v808_v20, %v5073_v1  ;;  %v837_v33 = vmax.bf16 %v822_v23, %v5073_v1  ;;  %v766_v34 = vmax.f32 %v734_v24, 0.0  ;;  %v784_v43 = vmax.f32 %v752_v35, 0.0 }
 0x176   : > { %v769_v36 = vmax.f32 %v737_v27, 0.0  ;;  %v735_v37 = vadd.f32 %v5022_v47, %v696_v29  ;;  %v816_v38 = vmax.bf16 %v5094_v30, %v5043_v25  ;;  %v817_v39 = vmax.bf16 %v5084_v16, %v5094_v30 }
 0x177   : > { %v830_v42 = vmax.bf16 %v815_v61, %v5094_v30  ;;  %v750_v44 = vadd.f32 %v5022_v47, %v711_v12  ;;  %v714_v46 = vmul.f32 %v4445_v13, %v5017_v45  ;;  %v4432_v49 = vpop.f32.mrb[12].mxu0  ;;  %v4448_v50 = vpop.f32.mrb[12].mxu1  ;;  %v712_v55 = vmul.f32 %v5017_v45, %v652_v19 }
 0x178   : > { %v5107_v53 = vpack.c.bf16 %v769_v36, %v768_v26  ;;  %v767_v54 = vmax.f32 %v735_v37, 0.0  ;;  %v5111_v56 = vmax.bf16 %v816_v38, %v5084_v16  ;;  %v601_v57 = vpop.f32.mrb[13].mxu0  ;;  %v665_v58 = vpop.f32.mrb[13].mxu1  ;;  %v701_v62 = vmul.f32 %v4432_v49, %v5017_v45 }
 0x179   : > { %v782_v59 = vmax.f32 %v750_v44, 0.0  ;;  %v753_v60 = vadd.f32 %v5022_v47, %v714_v46  ;;  %v845_v61 = vmax.bf16 %v830_v42, %v5084_v16  ;;  %v4433_v63 = vpop.f32.mrb[14].mxu0  ;;  %v4449_v0 = vpop.f32.mrb[14].mxu1  ;;  %v751_v3 = vadd.f32 %v5022_v47, %v712_v55 }
 0x17a   : > { %v5116_v2 = vpack.c.bf16 %v767_v54, %v766_v34  ;;  %v717_v4 = vmul.f32 %v4448_v50, %v5017_v45  ;;  %v699_v5 = vmul.f32 %v5017_v45, %v601_v57  ;;  %v5121_v6 = vpop.f32.mrb[15].mxu0  ;;  %v5123_v7 = vpop.f32.mrb[15].mxu1  ;;  %v5126_v10 = vadd.f32 %v5022_v47, %v701_v62 }
 0x17b   : > { %v785_v9 = vmax.f32 %v753_v60, 0.0  ;;  %v715_v11 = vmul.f32 %v5017_v45, %v665_v58  ;;  %v702_v12 = vmul.f32 %v4433_v63, %v5017_v45  ;;  %v783_v20 = vmax.f32 %v751_v3, 0.0 }
 0x17c   : > { %v810_v13 = vmax.bf16 %v5116_v2, %v5073_v1  ;;  %v5135_v15 = vmax.bf16 %v809_v21, %v5116_v2  ;;  %v838_v17 = vmax.bf16 %v823_v32, %v5116_v2  ;;  %v852_v18 = vmax.bf16 %v837_v33, %v5116_v2 }
 0x17d   : > { %v5139_v19 = vpack.c.bf16 %v785_v9, %v784_v43  ;;  %v772_v23 = vmax.f32 %v5126_v10, 0.0  ;;  %v5144_v26 = vadd.f32 %v5022_v47, %v717_v4  ;;  %v5147_v27 = vadd.f32 %v5022_v47, %v699_v5 }
 0x17e   : > { %v853_v24 = vmax.bf16 %v838_v17, %v5107_v53  ;;  %v5150_v21 = vadd.f32 %v5022_v47, %v715_v11  ;;  %v884_v29 = vrot.slane %v852_v18, 7  ;;  %v5152_v32 = vpack.c.bf16 %v783_v20, %v782_v59 }
 0x17f   : > { %7075 = vst [vmem:[#allocation13_spill] sm:$0xff] %v5139_v19  ;;  %v5155_v33 = vadd.f32 %v5022_v47, %v702_v12  ;;  %v718_v34 = vmul.f32 %v4449_v0, %v5017_v45  ;;  %v788_v36 = vmax.f32 %v5144_v26, 0.0 }
 0x180   : > { %7076 = vst [vmem:[#allocation14_spill] sm:$0xff] %v5152_v32  ;;  %v885_v35 = vrot.slane %v853_v24, 7  ;;  %v5162_v42 = vsel %vm898_vm0, 0, %v884_v29  ;;  %v5165_v43 = vsel %vm898_vm0, %v884_v29, 0  ;;  %v846_v44 = vmax.bf16 %v5111_v56, %v5152_v32 }
 0x181   : > { %v860_v46 = vmax.bf16 %v845_v61, %v5152_v32  ;;  %v985_v51 = vshrl.u32 %v5162_v42, 16  ;;  %v987_v52 = vshll.u32 %v5162_v42, 16  ;;  %v991_v54 = vshll.u32 %v5165_v43, 16 }
 0x182   : > { %v910_v49 = vsel %vm898_vm0, 0, %v885_v35  ;;  %v951_v50 = vsel %vm898_vm0, %v885_v35, 0  ;;  %v1196_v60 = vrot.slane %v5162_v42, 1  ;;  %v1197_v56 = vrot.slane %v5165_v43, 1 }
 0x183   : > { %v995_v55 = vshrl.u32 %v910_v49, 16  ;;  %v997_v57 = vshll.u32 %v910_v49, 16  ;;  %v1001_v58 = vshll.u32 %v951_v50, 16  ;;  %v989_v59 = vrot.slane %v987_v52, 1 }
 0x184   : > { %v1199_v62 = vrot.slane %v910_v49, 1  ;;  %v993_v61 = vrot.slane %v991_v54, 1  ;;  %v1200_v3 = vrot.slane %v951_v50, 1  ;;  %v1198_v5 = vsel %vm1189_vm1, %v1196_v60, %v1197_v56 }
 0x185   : > { %v999_v63 = vrot.slane %v997_v57, 1  ;;  %v1003_v0 = vrot.slane %v1001_v58, 1  ;;  %v990_v4 = vor.u32 %v989_v59, %v985_v51  ;;  %v1289_v9 = vrot.slane %v985_v51, 1 }
 0x186   : > { %v1290_v11 = vrot.slane %v987_v52, 2  ;;  %v1201_v17 = vsel %vm1189_vm1, %v1199_v62, %v1200_v3  ;;  %v1292_v18 = vshrl.u32 %v5165_v43, 16  ;;  %v1295_v20 = vrot.slane %v991_v54, 2 }
 0x187   : > { %v1000_v12 = vor.u32 %v999_v63, %v995_v55  ;;  %v994_v24 = vsel %vm964_vm2, %v990_v4, %v993_v61  ;;  %v1298_v35 = vrot.slane %v995_v55, 1  ;;  %v1299_v40 = vrot.slane %v997_v57, 2 }
 0x188   : > { %v1291_v29 = vor.u32 %v1290_v11, %v1289_v9  ;;  %v1143_v14 = vmax.bf16 %v994_v24, %v5162_v42  ;;  %v1294_v59 = vrot.slane %v1292_v18, 1  ;;  %v1301_v37 = vshrl.u32 %v951_v50, 16 }
 0x189   : > { %v1004_v38 = vsel %vm964_vm2, %v1000_v12, %v1003_v0  ;;  %v1300_v51 = vor.u32 %v1299_v40, %v1298_v35  ;;  %v1304_v52 = vrot.slane %v1001_v58, 2  ;;  %v1457_v57 = vrot.slane %v910_v49, 2 }
 0x18a   : > { %v1144_v60 = vmax.bf16 %v1004_v38, %v910_v49  ;;  %v5184_v62 = vmax.bf16 %v1198_v5, %v1143_v14  ;;  %v1296_v54 = vor.u32 %v1295_v20, %v1294_v59  ;;  %v1303_v63 = vrot.slane %v1301_v37, 1 }
 0x18b   : > { %v1458_v0 = vrot.slane %v951_v50, 2  ;;  %v5190_v3 = vmax.bf16 %v846_v44, %v5139_v19  ;;  %v892_v38 = vrot.slane %v860_v46, 7  ;;  %v773_v40 = vmax.f32 %v5155_v33, 0.0 }
 0x18c   : > { %v5187_v55 = vmax.bf16 %v1201_v17, %v1144_v60  ;;  %v1305_v4 = vor.u32 %v1304_v52, %v1303_v63  ;;  %v757_v58 = vadd.f32 %v5022_v47, %v718_v34  ;;  %v700_v5 = vmul.f32 %v5017_v45, %v5121_v6 }
 0x18d   : > { %v5195_v14 = vsel %vm1447_vm3, %v1457_v57, %v1458_v0  ;;  %v7032_v37 = vrot.slane %v5190_v3, 7  ;;  %v825_v44 = vmax.bf16 %v810_v13, %v5107_v53  ;;  %v5205_v49 = vsel %vm898_vm0, 0, %v892_v38 }
 0x18e   : > { %v5208_v33 = vsel %vm898_vm0, %v892_v38, 0  ;;  %v5212_v34 = vpack.c.bf16 %v773_v40, %v772_v23  ;;  %v789_v46 = vmax.f32 %v757_v58, 0.0  ;;  %v739_v50 = vadd.f32 %v5022_v47, %v700_v5 }
 0x18f   : > { %v5217_v6 = vsel %vm898_vm0, 0, %v7032_v37  ;;  %v839_v13 = vmax.bf16 %v5135_v15, %v5107_v53  ;;  %v716_v9 = vmul.f32 %v5017_v45, %v5123_v7  ;;  %v818_v23 = vmax.bf16 %v5152_v32, %v5084_v16 }
 0x190   : > { %7077 = vst [vmem:[#allocation15_spill] sm:$0xff] %v5217_v6  ;;  %v814_v11 = vmax.bf16 %v5049_v31, %v5212_v34  ;;  %v5228_v10 = vpack.c.bf16 %v789_v46, %v788_v36  ;;  %v819_v12 = vmax.bf16 %v5139_v19, %v5152_v32  ;;  %v771_v17 = vmax.f32 %v739_v50, 0.0 }
 0x191   : > { %v755_v18 = vadd.f32 %v5022_v47, %v716_v9  ;;  %v832_v45 = vmax.bf16 %v817_v39, %v5152_v32  ;;  %v5243_v7 = vmax.bf16 %v821_v48, %v5077_v8  ;;  %v833_v26 = vmax.bf16 %v818_v23, %v5139_v19 }
 0x192   : > { %7078 = vst [vmem:[#allocation16_spill] sm:$0xff] %v5228_v10  ;;  %v829_v15 = vmax.bf16 %v814_v11, %v5043_v25  ;;  %v5248_v36 = vsel %vm1270_vm4, %v1291_v29, %v1296_v54  ;;  %v5251_v47 = vsel %vm1270_vm4, %v1300_v51, %v1305_v4  ;;  %v7079_v20 = vmax.f32 %v5147_v27, 0.0 }
 0x193   : > { %v787_v39 = vmax.f32 %v755_v18, 0.0  ;;  %v847_v35 = vmax.bf16 %v832_v45, %v5139_v19  ;;  %v882_v41 = vrot.slane %v5243_v7, 7  ;;  %v7080_v52 = vmax.bf16 %v5107_v53, %v5116_v2 }
 0x194   : > { %v5255_v24 = vpack.c.bf16 %v771_v17, %v7079_v20  ;;  %v844_v48 = vmax.bf16 %v829_v15, %v5094_v30  ;;  %v7081_v4 = vmax.f32 %v5150_v21, 0.0  ;;  %v7084_v59 = vmov 0  }
 0x195   : > { %v5284_v40 = vsel %vm898_vm0, 0, %v882_v41 }
 0x196   : > { %v812_v27 = vmax.bf16 %v5255_v24, %v5107_v53  ;;  %v813_v51 = vmax.bf16 %v5212_v34, %v5255_v24  ;;  %v826_v54 = vmax.bf16 %v7080_v52, %v5255_v24  ;;  %v840_v63 = vmax.bf16 %v825_v44, %v5255_v24 }
 0x197   : > { %v5276_v57 = vmax.bf16 %v844_v48, %v5084_v16  ;;  %v854_v0 = vmax.bf16 %v839_v13, %v5255_v24  ;;  %v5281_v38 = vpack.c.bf16 %v787_v39, %v7081_v4 }
 0x198   : > { %v827_v58 = vmax.bf16 %v812_v27, %v5212_v34  ;;  %v828_v5 = vmax.bf16 %v813_v51, %v5049_v31  ;;  %v841_v46 = vmax.bf16 %v826_v54, %v5212_v34  ;;  %v5290_v44 = vmax.bf16 %v840_v63, %v5212_v34 }
 0x199   : > { %7082 = vst [vmem:[#allocation17_spill] sm:$0xff] %v5281_v38  ;;  %v886_v50 = vrot.slane %v854_v0, 7  ;;  %v820_v13 = vmax.bf16 %v5281_v38, %v5139_v19  ;;  %v834_v21 = vmax.bf16 %v819_v12, %v5281_v38  ;;  %v848_v9 = vmax.bf16 %v833_v26, %v5281_v38 }
 0x19a   : > { %v842_v11 = vmax.bf16 %v827_v58, %v5049_v31  ;;  %v843_v23 = vmax.bf16 %v828_v5, %v5043_v25  ;;  %v5299_v17 = vmax.bf16 %v841_v46, %v5049_v31  ;;  %v7033_v18 = vrot.slane %v5290_v44, 7 }
 0x19b   : > { %v913_v45 = vsel %vm898_vm0, 0, %v886_v50  ;;  %v952_v15 = vsel %vm898_vm0, %v886_v50, 0  ;;  %v5305_v20 = vmax.bf16 %v820_v13, %v5228_v10  ;;  %v849_v12 = vmax.bf16 %v834_v21, %v5228_v10 }
 0x19c   : > { %v5309_v26 = vmax.bf16 %v842_v11, %v5043_v25  ;;  %v5312_v39 = vmax.bf16 %v843_v23, %v5094_v30  ;;  %v5318_v27 = vsel %vm898_vm0, 0, %v7033_v18  ;;  %v1005_v51 = vshrl.u32 %v913_v45, 16 }
 0x19d   : > { %7083 = vst [vmem:[#allocation18_spill] sm:$0xff] %v5305_v20  ;;  %v1007_v52 = vshll.u32 %v913_v45, 16  ;;  %v1011_v54 = vshll.u32 %v952_v15, 16  ;;  %v1202_v63 = vrot.slane %v913_v45, 1  ;;  %v1203_v0 = vrot.slane %v952_v15, 1 }
 0x19e   : > { %v1310_v4 = vshrl.u32 %v952_v15, 16  ;;  %v1460_v58 = vrot.slane %v913_v45, 2  ;;  %v1461_v5 = vrot.slane %v952_v15, 2  ;;  %v1307_v13 = vrot.slane %v1005_v51, 1 }
 0x19f   : > { %v1009_v46 = vrot.slane %v1007_v52, 1  ;;  %v1013_v50 = vrot.slane %v1011_v54, 1  ;;  %v1308_v21 = vrot.slane %v1007_v52, 2  ;;  %v1204_v11 = vsel %vm1189_vm1, %v1202_v63, %v1203_v0 }
 0x1a0   : > { %v1312_v23 = vrot.slane %v1310_v4, 1  ;;  %v1313_v37 = vrot.slane %v1011_v54, 2  ;;  %v1462_v48 = vsel %vm1447_vm3, %v1460_v58, %v1461_v5  ;;  %v862_v60 = vmax.bf16 %v847_v35, %v5281_v38 }
 0x1a1   : > { %v1010_v18 = vor.u32 %v1009_v46, %v1005_v51  ;;  %v1309_v29 = vor.u32 %v1308_v21, %v1307_v13  ;;  %v863_v56 = vmax.bf16 %v848_v9, %v5228_v10  ;;  %v5325_v20 = vmax.bf16 %v7084_v59, %v849_v12 }
 0x1a2   : > { %v1314_v61 = vor.u32 %v1313_v37, %v1312_v23  ;;  %v948_v15 = vsel %vm898_vm0, %v882_v41, 0  ;;  %v965_v52 = vshrl.u32 %v5284_v40, 16  ;;  %v894_v0 = vrot.slane %v862_v60, 7 }
 0x1a3   : > { %7085 = vst [vmem:[#allocation19_spill] sm:$0xff] %v5325_v20  ;;  %v1014_v63 = vsel %vm964_vm2, %v1010_v18, %v1013_v50  ;;  %v895_v54 = vrot.slane %v863_v56, 7  ;;  %v967_v4 = vshll.u32 %v5284_v40, 16  ;;  %v971_v9 = vshll.u32 %v948_v15, 16 }
 0x1a4   : > { %v1145_v51 = vmax.bf16 %v1014_v63, %v913_v45  ;;  %v1315_v58 = vsel %vm1270_vm4, %v1309_v29, %v1314_v61  ;;  %v5334_v37 = vsel %vm898_vm0, 0, %v894_v0  ;;  %v5340_v41 = vsel %vm898_vm0, %v894_v0, 0 }
 0x1a5   : > { %7086 = vst [vmem:[#allocation20_spill] sm:$0xff] %v5334_v37  ;;  %v5337_v12 = vsel %vm898_vm0, 0, %v895_v54  ;;  %7088 = vst [vmem:[#allocation22_spill] sm:$0xff] %v5340_v41  ;;  %v5343_v60 = vsel %vm898_vm0, %v895_v54, 0  ;;  %v7040_v18 = vshrl.u32 %v5334_v37, 16  ;;  %v7035_v61 = vshll.u32 %v5334_v37, 16 }
 0x1a6   : > { %7087 = vst [vmem:[#allocation21_spill] sm:$0xff] %v5337_v12  ;;  %7089 = vst [vmem:[#allocation23_spill] sm:$0xff] %v5343_v60  ;;  %v1258_v56 = vmax.bf16 %v1204_v11, %v1145_v51  ;;  %v1091_v29 = vshll.u32 %v5340_v41, 16  ;;  %v7034_v5 = vshll.u32 %v5337_v12, 16  ;;  %v7036_v46 = vshll.u32 %v5343_v60, 16 }
 0x1a7   : > { %v1089_v21 = vrot.slane %v7035_v61, 1  ;;  %v1382_v51 = vshrl.u32 %v5340_v41, 16  ;;  %v1391_v45 = vshrl.u32 %v5343_v60, 16  ;;  %v969_v61 = vrot.slane %v967_v4, 1 }
 0x1a8   : > { %v1435_v13 = vmax.bf16 %v1315_v58, %v1258_v56  ;;  %v5354_v23 = vrot.slane %v1091_v29, 1  ;;  %v5359_v63 = vrot.slane %v7034_v5, 1  ;;  %v5363_v0 = vrot.slane %v7036_v46, 1 }
 0x1a9   : > { %v5371_v56 = vor.u32 %v1089_v21, %v7040_v18  ;;  %v5373_v35 = vrot.slane %v1091_v29, 2  ;;  %v5376_v5 = vrot.slane %v1382_v51, 1  ;;  %v973_v50 = vrot.slane %v971_v9, 1 }
 0x1aa   : > { %7090 = vst [vmem:[#allocation24_spill] sm:$0xff] %v5354_v23  ;;  %7091 = vst [vmem:[#allocation25_spill] sm:$0xff] %v5359_v63  ;;  %v5367_v58 = vmax.bf16 %v1462_v48, %v1435_v13  ;;  %v1190_v46 = vrot.slane %v5284_v40, 1  ;;  %v5379_v11 = vrot.slane %v1391_v45, 1  ;;  %v1191_v54 = vrot.slane %v948_v15, 1 }
 0x1ab   : > { %7092 = vst [vmem:[#allocation26_spill] sm:$0xff] %v5363_v0  ;;  %7093 = vst [vmem:[#allocation27_spill] sm:$0xff] %v5371_v56  ;;  %v1271_v10 = vrot.slane %v965_v52, 1  ;;  %v1272_v48 = vrot.slane %v967_v4, 2  ;;  %v970_v13 = vor.u32 %v969_v61, %v965_v52  ;;  %v1274_v38 = vshrl.u32 %v948_v15, 16 }
 0x1ac   : > { %7094 = vst [vmem:[#allocation28_spill] sm:$0xff] %v5373_v35  ;;  %7095 = vst [vmem:[#allocation29_spill] sm:$0xff] %v5376_v5  ;;  %v1277_v19 = vrot.slane %v971_v9, 2  ;;  %v1448_v21 = vrot.slane %v5284_v40, 2  ;;  %v1192_v29 = vsel %vm1189_vm1, %v1190_v46, %v1191_v54  ;;  %v1449_v20 = vrot.slane %v948_v15, 2 }
 0x1ad   : > { %7096 = vst [vmem:[#allocation30_spill] sm:$0xff] %v5379_v11  ;;  %v1273_v18 = vor.u32 %v1272_v48, %v1271_v10  ;;  %v7097_v51 = vmax.bf16 %v5243_v7, %v5073_v1  ;;  %v974_v0 = vsel %vm964_vm2, %v970_v13, %v973_v50  ;;  %v1276_v45 = vrot.slane %v1274_v38, 1 }
 0x1ae   : > { %v7098_v11 = vrot.slane %v5165_v43, 2  ;;  %v7099_v4 = vrot.slane %v5162_v42, 2  ;;  %v7100_v9 = vmax.bf16 %v5251_v47, %v5187_v55  ;;  %v1141_v10 = vmax.bf16 %v974_v0, %v5284_v40 }
 0x1af   : > { %v883_v60 = vrot.slane %v7097_v51, 7  ;;  %v1450_v7 = vsel %vm1447_vm3, %v1448_v21, %v1449_v20  ;;  %v1278_v46 = vor.u32 %v1277_v19, %v1276_v45 }
 0x1b0   : > { %v1456_v52 = vsel %vm1447_vm3, %v7099_v4, %v7098_v11  ;;  %v5396_v61 = vmax.bf16 %v5195_v14, %v7100_v9  ;;  %v1254_v54 = vmax.bf16 %v1192_v29, %v1141_v10  ;;  %v7101_v29 = vmax.bf16 %v5248_v36, %v5184_v62 }
 0x1b1   : > { %v904_v15 = vsel %vm898_vm0, 0, %v883_v60  ;;  %v949_v38 = vsel %vm898_vm0, %v883_v60, 0  ;;  %v1279_v55 = vsel %vm1270_vm4, %v1273_v18, %v1278_v46  ;;  %v7102_v18 = vrot.slane %v5290_v44, 7 }
 0x1b2   : > { %v975_v43 = vshrl.u32 %v904_v15, 16  ;;  %v977_v50 = vshll.u32 %v904_v15, 16  ;;  %v981_v42 = vshll.u32 %v949_v38, 16  ;;  %v1193_v11 = vrot.slane %v904_v15, 1 }
 0x1b3   : > { %v1194_v48 = vrot.slane %v949_v38, 1  ;;  %v1283_v13 = vshrl.u32 %v949_v38, 16  ;;  %v1431_v40 = vmax.bf16 %v1279_v55, %v1254_v54  ;;  %v1451_v19 = vrot.slane %v904_v15, 2 }
 0x1b4   : > { %v979_v14 = vrot.slane %v977_v50, 1  ;;  %v983_v47 = vrot.slane %v981_v42, 1  ;;  %v1280_v51 = vrot.slane %v975_v43, 1  ;;  %v1281_v0 = vrot.slane %v977_v50, 2 }
 0x1b5   : > { %v1195_v20 = vsel %vm1189_vm1, %v1193_v11, %v1194_v48  ;;  %v1285_v21 = vrot.slane %v1283_v13, 1  ;;  %v1286_v60 = vrot.slane %v981_v42, 2  ;;  %v1452_v45 = vrot.slane %v949_v38, 2 }
 0x1b6   : > { %v980_v4 = vor.u32 %v979_v14, %v975_v43  ;;  %v1512_v9 = vmax.bf16 %v1450_v7, %v1431_v40  ;;  %v1282_v63 = vor.u32 %v1281_v0, %v1280_v51  ;;  %v1514_v10 = vmax.bf16 %v1456_v52, %v7101_v29 }
 0x1b7   : > { %v953_v46 = vsel %vm898_vm0, %v7102_v18, 0  ;;  %v1287_v55 = vor.u32 %v1286_v60, %v1285_v21  ;;  %v1453_v50 = vsel %vm1447_vm3, %v1451_v19, %v1452_v45  ;;  %v1015_v43 = vshrl.u32 %v5318_v27, 16 }
 0x1b8   : > { %v984_v54 = vsel %vm964_vm2, %v980_v4, %v983_v47  ;;  %v1528_v42 = vmax.bf16 %v7084_v59, %v1512_v9  ;;  %3410 = vmatprep.mubr.bf16.mxu0 %v1512_v9  ;;  %v1017_v38 = vshll.u32 %v5318_v27, 16  ;;  %v1021_v11 = vshll.u32 %v953_v46, 16 }
 0x1b9   : > { %v1142_v7 = vmax.bf16 %v984_v54, %v904_v15  ;;  %3411 = vmatmul.mubr.bf16.vlgmr.msra.gmra.mrb[16].mxu0 %v5046_v28  ;;  %v1288_v62 = vsel %vm1270_vm4, %v1282_v63, %v1287_v55  ;;  %v1205_v36 = vrot.slane %v5318_v27, 1  ;;  %v1206_v44 = vrot.slane %v953_v46, 1 }
 0x1ba   : > { %v1316_v52 = vrot.slane %v1015_v43, 1  ;;  %v1019_v13 = vrot.slane %v1017_v38, 1  ;;  %v1023_v14 = vrot.slane %v1021_v11, 1  ;;  %v1317_v47 = vrot.slane %v1017_v38, 2 }
 0x1bb   : > { %v1255_v48 = vmax.bf16 %v1195_v20, %v1142_v7  ;;  %v1207_v51 = vsel %vm1189_vm1, %v1205_v36, %v1206_v44  ;;  %v1319_v40 = vshrl.u32 %v953_v46, 16  ;;  %v1322_v0 = vrot.slane %v1021_v11, 2 }
 0x1bc   : > { %v1463_v15 = vrot.slane %v5318_v27, 2  ;;  %v1020_v4 = vor.u32 %v1019_v13, %v1015_v43  ;;  %v1318_v60 = vor.u32 %v1317_v47, %v1316_v52  ;;  %v1464_v28 = vrot.slane %v953_v46, 2 }
 0x1bd   : > { %v1432_v21 = vmax.bf16 %v1288_v62, %v1255_v48  ;;  %v1321_v19 = vrot.slane %v1319_v40, 1  ;;  %v1531_v63 = vmax.bf16 %v5396_v61, %v1514_v10  ;;  %v7103_v20 = vrot.slane %v5299_v17, 7 }
 0x1be   : > { %v1024_v54 = vsel %vm964_vm2, %v1020_v4, %v1023_v14  ;;  %v1465_v55 = vsel %vm1447_vm3, %v1463_v15, %v1464_v28 }
 0x1bf   : > { %v5426_v29 = vsel %vm898_vm0, 0, %v7103_v20  ;;  %v1513_v18 = vmax.bf16 %v1453_v50, %v1432_v21  ;;  %v7104_v43 = vmov %v7103_v20  ;;  %v1146_v7 = vmax.bf16 %v1024_v54, %v5318_v27 }
 0x1c0   : > { %v5433_v46 = vsel %vm898_vm0, %v7104_v43, 0  ;;  %v1323_v38 = vor.u32 %v1322_v0, %v1321_v19  ;;  %v5437_v11 = vmax.bf16 %v1531_v63, %v5367_v58  ;;  %v1025_v62 = vshrl.u32 %v5426_v29, 16 }
 0x1c1   : > { %v1529_v36 = vmax.bf16 %v1513_v18, %v1512_v9  ;;  %v1530_v44 = vmax.bf16 %v1514_v10, %v1513_v18  ;;  %v1543_v50 = vmax.bf16 %v1528_v42, %v1513_v18  ;;  %3418 = vmatprep.mubr.bf16.mxu0 %v1513_v18  ;;  %v1027_v52 = vshll.u32 %v5426_v29, 16 }
 0x1c2   : > { %3419 = vmatmul.mubr.bf16.gmra.mrb[20].mxu0 %v5040_v22  ;;  %v1259_v17 = vmax.bf16 %v1207_v51, %v1146_v7  ;;  %v1324_v48 = vsel %vm1270_vm4, %v1318_v60, %v1323_v38  ;;  %v7045_v13 = vshll.u32 %v5433_v46, 16  ;;  %v1208_v27 = vrot.slane %v5426_v29, 1 }
 0x1c3   : > { %v1544_v14 = vmax.bf16 %v1529_v36, %v1514_v10  ;;  %v5446_v47 = vmax.bf16 %v1530_v44, %v5396_v61  ;;  %v1558_v40 = vmax.bf16 %v1543_v50, %v1514_v10  ;;  %3426 = vmatprep.mubr.bf16.mxu0 %v1514_v10  ;;  %v1029_v9 = vrot.slane %v1027_v52, 1 }
 0x1c4   : > { %v1436_v42 = vmax.bf16 %v1324_v48, %v1259_v17  ;;  %v5450_v0 = vrot.slane %v7045_v13, 1  ;;  %v1209_v22 = vrot.slane %v5433_v46, 1  ;;  %v5453_v51 = vrot.slane %v1025_v62, 1 }
 0x1c5   : > { %v1559_v15 = vmax.bf16 %v1544_v14, %v5396_v61  ;;  %v1573_v4 = vmax.bf16 %v1558_v40, %v5396_v61  ;;  %v1604_v60 = vrot.slane %v1558_v40, 7  ;;  %v5461_v10 = vor.u32 %v1029_v9, %v1025_v62 }
 0x1c6   : > { %v5459_v28 = vmax.bf16 %v1465_v55, %v1436_v42  ;;  %v5464_v19 = vsel %vm1189_vm1, %v1208_v27, %v1209_v22  ;;  %v5466_v63 = vrot.slane %v1027_v52, 2 }
 0x1c7   : > { %v1574_v20 = vmax.bf16 %v1559_v15, %v5367_v58  ;;  %v1605_v18 = vrot.slane %v1573_v4, 7  ;;  %v5470_v54 = vsel %vm898_vm0, 0, %v1604_v60  ;;  %v5473_v43 = vsel %vm898_vm0, %v1604_v60, 0 }
 0x1c8   : > { %v1684_v7 = vshrl.u32 %v5470_v54, 16  ;;  %v1686_v55 = vshll.u32 %v5470_v54, 16  ;;  %v1690_v38 = vshll.u32 %v5473_v43, 16  ;;  %v1908_v62 = vrot.slane %v5470_v54, 1 }
 0x1c9   : > { %v1606_v36 = vrot.slane %v1574_v20, 7  ;;  %v5480_v44 = vsel %vm898_vm0, 0, %v1605_v18  ;;  %v5483_v50 = vsel %vm898_vm0, %v1605_v18, 0  ;;  %v1909_v52 = vrot.slane %v5473_v43, 1 }
 0x1ca   : > { %v1688_v17 = vrot.slane %v1686_v55, 1  ;;  %v1692_v48 = vrot.slane %v1690_v38, 1  ;;  %v1694_v27 = vshrl.u32 %v5480_v44, 16  ;;  %v1696_v14 = vshll.u32 %v5480_v44, 16  ;;  %3427 = vmatmul.mubr.bf16.gmra.mrb[24].mxu0 %v5077_v8 }
 0x1cb   : > { %v5490_v40 = vsel %vm898_vm0, 0, %v1606_v36  ;;  %v5493_v9 = vsel %vm898_vm0, %v1606_v36, 0  ;;  %v1700_v42 = vshll.u32 %v5483_v50, 16  ;;  %v1910_v22 = vsel %vm1189_vm1, %v1908_v62, %v1909_v52  ;;  %3434 = vmatprep.mubr.bf16.mxu0 %v5396_v61 }
 0x1cc   : > { %v1689_v15 = vor.u32 %v1688_v17, %v1684_v7  ;;  %v1698_v4 = vrot.slane %v1696_v14, 1  ;;  %v1704_v60 = vshrl.u32 %v5490_v40, 16  ;;  %v1706_v20 = vshll.u32 %v5490_v40, 16 }
 0x1cd   : > { %v1702_v18 = vrot.slane %v1700_v42, 1  ;;  %v1710_v8 = vshll.u32 %v5493_v9, 16  ;;  %v1911_v13 = vrot.slane %v5480_v44, 1  ;;  %v1912_v36 = vrot.slane %v5483_v50, 1 }
 0x1ce   : > { %v1693_v21 = vsel %vm964_vm2, %v1689_v15, %v1692_v48  ;;  %v1699_v45 = vor.u32 %v1698_v4, %v1694_v27  ;;  %v1708_v12 = vrot.slane %v1706_v20, 1  ;;  %v1914_v62 = vrot.slane %v5490_v40, 1 }
 0x1cf   : > { %v1712_v52 = vrot.slane %v1710_v8, 1  ;;  %v1860_v17 = vmax.bf16 %v1693_v21, %v5470_v54  ;;  %v1913_v32 = vsel %vm1189_vm1, %v1911_v13, %v1912_v36  ;;  %v1915_v35 = vrot.slane %v5493_v9, 1 }
 0x1d0   : > { %v1703_v5 = vsel %vm964_vm2, %v1699_v45, %v1702_v18  ;;  %v1709_v41 = vor.u32 %v1708_v12, %v1704_v60  ;;  %v1988_v37 = vrot.slane %v1684_v7, 1  ;;  %v1989_v16 = vrot.slane %v1686_v55, 2 }
 0x1d1   : > { %v1861_v56 = vmax.bf16 %v1703_v5, %v5480_v44  ;;  %v1916_v48 = vsel %vm1189_vm1, %v1914_v62, %v1915_v35  ;;  %v5511_v15 = vmax.bf16 %v1910_v22, %v1860_v17  ;;  %v1991_v4 = vshrl.u32 %v5473_v43, 16 }
 0x1d2   : > { %v1713_v23 = vsel %vm964_vm2, %v1709_v41, %v1712_v52  ;;  %v1990_v21 = vor.u32 %v1989_v16, %v1988_v37  ;;  %v1994_v6 = vrot.slane %v1690_v38, 2  ;;  %v1997_v13 = vrot.slane %v1694_v27, 1  ;;  %3435 = vmatmul.mubr.bf16.gmra.mrb[28].mxu0 %v5073_v1 }
 0x1d3   : > { %v1862_v45 = vmax.bf16 %v1713_v23, %v5490_v40  ;;  %v5517_v12 = vmax.bf16 %v1913_v32, %v1861_v56  ;;  %v1993_v7 = vrot.slane %v1991_v4, 1  ;;  %v1998_v55 = vrot.slane %v1696_v14, 2  ;;  %3442 = vmatprep.mubr.bf16.mxu0 %v5367_v58 }
 0x1d4   : > { %v2000_v35 = vshrl.u32 %v5483_v50, 16  ;;  %v2003_v5 = vrot.slane %v1700_v42, 2  ;;  %v5521_v22 = vrot.slane %v1704_v60, 1  ;;  %v5523_v18 = vrot.slane %v1706_v20, 2 }
 0x1d5   : > { %v5525_v16 = vmax.bf16 %v1916_v48, %v1862_v45  ;;  %v1995_v37 = vor.u32 %v1994_v6, %v1993_v7  ;;  %v1999_v41 = vor.u32 %v1998_v55, %v1997_v13  ;;  %v2009_v1 = vshrl.u32 %v5493_v9, 16 }
 0x1d6   : > { %v2002_v23 = vrot.slane %v2000_v35, 1  ;;  %v2008_v32 = vor.u32 %v5523_v18, %v5521_v22  ;;  %v5530_v56 = vrot.slane %v1710_v8, 2  ;;  %v2164_v38 = vrot.slane %v5470_v54, 2 }
 0x1d7   : > { %v5533_v27 = vrot.slane %v2009_v1, 1  ;;  %v2165_v14 = vrot.slane %v5473_v43, 2  ;;  %v2167_v42 = vrot.slane %v5480_v44, 2  ;;  %v2168_v60 = vrot.slane %v5483_v50, 2 }
 0x1d8   : > { %v2004_v6 = vor.u32 %v2003_v5, %v2002_v23  ;;  %v1533_v62 = vmax.bf16 %v5459_v28, %v5367_v58  ;;  %v7105_v52 = vmax.bf16 %v5367_v58, %v5396_v61  ;;  %v1561_v48 = vmax.bf16 %v5437_v11, %v5459_v28 }
 0x1d9   : > { %v2013_v8 = vor.u32 %v5530_v56, %v5533_v27  ;;  %v7106_v4 = vmax.bf16 %v5446_v47, %v5367_v58  ;;  %v1034_v45 = vsel %vm964_vm2, %v5461_v10, %v5450_v0  ;;  %v1327_v7 = vor.u32 %v5466_v63, %v5453_v51 }
 0x1da   : > { %v5548_v17 = vmax.bf16 %v7105_v52, %v5459_v28  ;;  %3443 = vmatmul.mubr.bf16.gmra.mrb[32].mxu0 %v5116_v2  ;;  %v1328_v61 = vshrl.u32 %v5433_v46, 16  ;;  %v7107_v55 = vshll.u32 %v5433_v46, 16  ;;  %v1147_v58 = vmax.bf16 %v1034_v45, %v5426_v29 }
 0x1db   : > { %v1575_v13 = vmax.bf16 %v7106_v4, %v5459_v28  ;;  %3450 = vmatprep.mubr.bf16.mxu0 %v5459_v28  ;;  %v1466_v47 = vrot.slane %v5426_v29, 2  ;;  %v1467_v2 = vrot.slane %v5433_v46, 2  ;;  %v889_v0 = vrot.slane %v5309_v26, 7 }
 0x1dc   : > { %v1331_v35 = vrot.slane %v7107_v55, 2  ;;  %v1330_v5 = vrot.slane %v1328_v61, 1  ;;  %v1996_v10 = vsel %vm1270_vm4, %v1990_v21, %v1995_v37  ;;  %v5572_v51 = vsel %vm1270_vm4, %v1999_v41, %v2004_v6 }
 0x1dd   : > { %v1607_v11 = vrot.slane %v1575_v13, 7  ;;  %v1260_v23 = vmax.bf16 %v5464_v19, %v1147_v58  ;;  %v1468_v29 = vsel %vm1447_vm3, %v1466_v47, %v1467_v2  ;;  %v922_v27 = vsel %vm898_vm0, 0, %v889_v0 }
 0x1de   : > { %v1332_v41 = vor.u32 %v1331_v35, %v1330_v5  ;;  %v955_v6 = vsel %vm898_vm0, %v889_v0, 0  ;;  %v1035_v4 = vshrl.u32 %v922_v27, 16  ;;  %v1037_v13 = vshll.u32 %v922_v27, 16 }
 0x1df   : > { %v5575_v63 = vsel %vm898_vm0, 0, %v1607_v11  ;;  %v5578_v1 = vsel %vm898_vm0, %v1607_v11, 0  ;;  %v1041_v55 = vshll.u32 %v955_v6, 16  ;;  %v1211_v11 = vrot.slane %v922_v27, 1 }
 0x1e0   : > { %v7055_v56 = vshll.u32 %v5575_v63, 16  ;;  %v7056_v26 = vshll.u32 %v5578_v1, 16  ;;  %v2018_v37 = vshrl.u32 %v5578_v1, 16  ;;  %v1333_v61 = vsel %vm1270_vm4, %v1327_v7, %v1332_v41 }
 0x1e1   : > { %v1437_v35 = vmax.bf16 %v1333_v61, %v1260_v23  ;;  %v1039_v58 = vrot.slane %v1037_v13, 1  ;;  %v1212_v47 = vrot.slane %v955_v6, 1  ;;  %v1334_v2 = vrot.slane %v1035_v4, 1 }
 0x1e2   : > { %v1718_v19 = vrot.slane %v7055_v56, 1  ;;  %v5593_v52 = vrot.slane %v7056_v26, 1  ;;  %v5595_v45 = vrot.slane %v2018_v37, 1  ;;  %3451 = vmatmul.mubr.bf16.gmra.mrb[36].mxu0 %v5107_v53  ;;  %v1043_v5 = vrot.slane %v1041_v55, 1 }
 0x1e3   : > { %v1335_v0 = vrot.slane %v1037_v13, 2  ;;  %v1337_v21 = vshrl.u32 %v955_v6, 16  ;;  %v1340_v56 = vrot.slane %v1041_v55, 2  ;;  %v5599_v26 = vmax.bf16 %v1468_v29, %v1437_v35 }
 0x1e4   : > { %v1040_v46 = vor.u32 %v1039_v58, %v1035_v4  ;;  %v1213_v37 = vsel %vm1189_vm1, %v1211_v11, %v1212_v47  ;;  %v1469_v20 = vrot.slane %v922_v27, 2  ;;  %v1470_v41 = vrot.slane %v955_v6, 2 }
 0x1e5   : > { %v1336_v36 = vor.u32 %v1335_v0, %v1334_v2  ;;  %v1339_v7 = vrot.slane %v1337_v21, 1  ;;  %v2014_v53 = vsel %vm1270_vm4, %v2008_v32, %v2013_v8  ;;  %v1534_v23 = vmax.bf16 %v5599_v26, %v5459_v28  ;;  %3458 = vmatprep.mubr.bf16.mxu0 %v5599_v26 }
 0x1e6   : > { %v5609_v13 = vmax.bf16 %v1533_v62, %v5599_v26  ;;  %v1562_v29 = vmax.bf16 %v5548_v17, %v5599_v26  ;;  %v1576_v4 = vmax.bf16 %v1561_v48, %v5599_v26  ;;  %v1044_v21 = vsel %vm964_vm2, %v1040_v46, %v1043_v5 }
 0x1e7   : > { %v1341_v6 = vor.u32 %v1340_v56, %v1339_v7  ;;  %v1471_v22 = vsel %vm1447_vm3, %v1469_v20, %v1470_v41  ;;  %v2148_v18 = vmax.bf16 %v1996_v10, %v5511_v15  ;;  %v1148_v8 = vmax.bf16 %v1044_v21, %v922_v27 }
 0x1e8   : > { %v1608_v32 = vrot.slane %v1576_v4, 7  ;;  %v2149_v28 = vmax.bf16 %v5572_v51, %v5517_v12  ;;  %v2150_v62 = vmax.bf16 %v2014_v53, %v5525_v16  ;;  %v2166_v48 = vsel %vm1447_vm3, %v2164_v38, %v2165_v14 }
 0x1e9   : > { %v1342_v17 = vsel %vm1270_vm4, %v1336_v36, %v1341_v6  ;;  %v2169_v15 = vsel %vm1447_vm3, %v2167_v42, %v2168_v60  ;;  %v7108_v20 = vrot.slane %v5493_v9, 2  ;;  %v7109_v12 = vrot.slane %v5490_v40, 2 }
 0x1ea   : > { %v5638_v36 = vsel %vm898_vm0, 0, %v1608_v32  ;;  %v5641_v43 = vsel %vm898_vm0, %v1608_v32, 0  ;;  %3459 = vmatmul.mubr.bf16.gmra.mrb[40].mxu0 %v5255_v24  ;;  %v1261_v54 = vmax.bf16 %v1213_v37, %v1148_v8  ;;  %v5644_v50 = vmax.bf16 %v2166_v48, %v2148_v18 }
 0x1eb   : > { %v2172_v16 = vsel %vm1447_vm3, %v7109_v12, %v7108_v20  ;;  %v1724_v44 = vshrl.u32 %v5638_v36, 16  ;;  %v1726_v38 = vshll.u32 %v5638_v36, 16  ;;  %v1730_v9 = vshll.u32 %v5641_v43, 16 }
 0x1ec   : > { %v1921_v40 = vrot.slane %v5641_v43, 1  ;;  %v2027_v14 = vshrl.u32 %v5641_v43, 16  ;;  %v1438_v42 = vmax.bf16 %v1342_v17, %v1261_v54  ;;  %v5651_v60 = vmax.bf16 %v2169_v15, %v2149_v28 }
 0x1ed   : > { %v5653_v10 = vmax.bf16 %v2172_v16, %v2150_v62  ;;  %v1728_v24 = vrot.slane %v1726_v38, 1  ;;  %v5659_v51 = vrot.slane %v1730_v9, 1  ;;  %v2244_v46 = vmax.bf16 %v7084_v59, %v5644_v50 }
 0x1ee   : > { %v7110_v56 = vshrl.u32 %v5575_v63, 16  ;;  %v5665_v61 = vrot.slane %v2027_v14, 1  ;;  %v5667_v55 = vmax.bf16 %v1471_v22, %v1438_v42  ;;  %v1917_v11 = vrot.slane %v5575_v63, 1 }
 0x1ef   : > { %v2259_v47 = vmax.bf16 %v2244_v46, %v5651_v60  ;;  %v7112_v5 = vshll.u32 %v5575_v63, 16  ;;  %v7113_v37 = vshll.u32 %v5578_v1, 16  ;;  %v7114_v6 = vrot.slane %v5578_v1, 1 }
 0x1f0   : > { %v1719_v27 = vor.u32 %v1718_v19, %v7110_v56  ;;  %v7111_v35 = vmov %v7110_v56  ;;  %v5682_v41 = vmax.bf16 %v1534_v23, %v5667_v55  ;;  %v1577_v4 = vmax.bf16 %v1562_v29, %v5667_v55  ;;  %3466 = vmatprep.mubr.bf16.mxu0 %v5667_v55 }
 0x1f1   : > { %v2015_v58 = vrot.slane %v7111_v35, 1  ;;  %v2016_v0 = vrot.slane %v7112_v5, 2  ;;  %v2021_v19 = vrot.slane %v7113_v37, 2  ;;  %v1919_v22 = vsel %vm1189_vm1, %v1917_v11, %v7114_v6 }
 0x1f2   : > { %v1723_v2 = vsel %vm964_vm2, %v1719_v27, %v5593_v52  ;;  %v2274_v52 = vmax.bf16 %v2259_v47, %v5653_v10  ;;  %v1609_v32 = vrot.slane %v1577_v4, 7  ;;  %3467 = vmatmul.mubr.bf16.gmra.mrb[44].mxu0 %v5212_v34  ;;  %v2173_v8 = vrot.slane %v5575_v63, 2 }
 0x1f3   : > { %v1863_v21 = vmax.bf16 %v1723_v2, %v5575_v63  ;;  %v2017_v18 = vor.u32 %v2016_v0, %v2015_v58  ;;  %v2022_v23 = vor.u32 %v2021_v19, %v5595_v45  ;;  %v2174_v29 = vrot.slane %v5578_v1, 2 }
 0x1f4   : > { %v2320_v28 = vrot.slane %v2274_v52, 7  ;;  %v890_v17 = vrot.slane %v5312_v39, 7  ;;  %v1729_v48 = vor.u32 %v1728_v24, %v1724_v44  ;;  %v5701_v15 = vsel %vm898_vm0, 0, %v1609_v32 }
 0x1f5   : > { %v1975_v62 = vmax.bf16 %v1919_v22, %v1863_v21  ;;  %v5704_v20 = vsel %vm898_vm0, %v1609_v32, 0  ;;  %v2023_v34 = vsel %vm1270_vm4, %v2017_v18, %v2022_v23  ;;  %v2175_v45 = vsel %vm1447_vm3, %v2173_v8, %v2174_v29 }
 0x1f6   : > { %v7058_v1 = vshll.u32 %v5701_v15, 16  ;;  %v7057_v12 = vshll.u32 %v5704_v20, 16  ;;  %v2036_v16 = vshrl.u32 %v5704_v20, 16  ;;  %v2337_v54 = vsel %vm898_vm0, 0, %v2320_v28 }
 0x1f7   : > { %v2384_v14 = vsel %vm898_vm0, %v2320_v28, 0  ;;  %v2151_v42 = vmax.bf16 %v2023_v34, %v1975_v62  ;;  %v2400_v56 = vshrl.u32 %v2337_v54, 16  ;;  %v2402_v27 = vshll.u32 %v2337_v54, 16 }
 0x1f8   : > { %v5717_v24 = vrot.slane %v7058_v1, 1  ;;  %v5721_v46 = vrot.slane %v7057_v12, 1  ;;  %v5723_v11 = vrot.slane %v2036_v16, 1  ;;  %v2406_v35 = vshll.u32 %v2384_v14, 16 }
 0x1f9   : > { %v2624_v58 = vrot.slane %v2337_v54, 1  ;;  %v2625_v47 = vrot.slane %v2384_v14, 1  ;;  %v2404_v2 = vrot.slane %v2402_v27, 1  ;;  %v2704_v5 = vrot.slane %v2400_v56, 1 }
 0x1fa   : > { %v2705_v0 = vrot.slane %v2402_v27, 2  ;;  %v2707_v37 = vshrl.u32 %v2384_v14, 16  ;;  %v2408_v19 = vrot.slane %v2406_v35, 1  ;;  %v2710_v21 = vrot.slane %v2406_v35, 2 }
 0x1fb   : > { %v2626_v4 = vsel %vm1189_vm1, %v2624_v58, %v2625_v47  ;;  %v2880_v6 = vrot.slane %v2337_v54, 2  ;;  %v2405_v22 = vor.u32 %v2404_v2, %v2400_v56  ;;  %v2881_v23 = vrot.slane %v2384_v14, 2 }
 0x1fc   : > { %v2706_v18 = vor.u32 %v2705_v0, %v2704_v5  ;;  %v2709_v32 = vrot.slane %v2707_v37, 1  ;;  %v5726_v8 = vmax.bf16 %v2175_v45, %v2151_v42  ;;  %v5729_v29 = vsel %vm898_vm0, 0, %v890_v17 }
 0x1fd   : > { %v956_v28 = vsel %vm898_vm0, %v890_v17, 0  ;;  %v5734_v62 = vsel %vm964_vm2, %v1729_v48, %v5659_v51  ;;  %v2409_v34 = vsel %vm964_vm2, %v2405_v22, %v2408_v19  ;;  %v2882_v27 = vsel %vm1447_vm3, %v2880_v6, %v2881_v23 }
 0x1fe   : > { %v2711_v16 = vor.u32 %v2710_v21, %v2709_v32  ;;  %v1045_v56 = vshrl.u32 %v5729_v29, 16  ;;  %v2576_v35 = vmax.bf16 %v2409_v34, %v2337_v54  ;;  %v2289_v45 = vmax.bf16 %v2274_v52, %v5726_v8 }
 0x1ff   : > { %v1047_v14 = vshll.u32 %v5729_v29, 16  ;;  %v1051_v42 = vshll.u32 %v956_v28, 16  ;;  %v1214_v17 = vrot.slane %v5729_v29, 1  ;;  %v1215_v47 = vrot.slane %v956_v28, 1 }
 0x200   : > { %v2712_v58 = vsel %vm1270_vm4, %v2706_v18, %v2711_v16  ;;  %v1343_v51 = vrot.slane %v1045_v56, 1  ;;  %v2688_v48 = vmax.bf16 %v2626_v4, %v2576_v35  ;;  %v2321_v2 = vrot.slane %v2289_v45, 7 }
 0x201   : > { %v1049_v5 = vrot.slane %v1047_v14, 1  ;;  %v1053_v0 = vrot.slane %v1051_v42, 1  ;;  %v1216_v37 = vsel %vm1189_vm1, %v1214_v17, %v1215_v47  ;;  %v1344_v19 = vrot.slane %v1047_v14, 2 }
 0x202   : > { %v1346_v21 = vshrl.u32 %v956_v28, 16  ;;  %v1349_v54 = vrot.slane %v1051_v42, 2  ;;  %v2864_v6 = vmax.bf16 %v2712_v58, %v2688_v48  ;;  %v2340_v52 = vsel %vm898_vm0, 0, %v2321_v2 }
 0x203   : > { %v2385_v22 = vsel %vm898_vm0, %v2321_v2, 0  ;;  %v1050_v32 = vor.u32 %v1049_v5, %v1045_v56  ;;  %v2410_v18 = vshrl.u32 %v2340_v52, 16  ;;  %v2412_v23 = vshll.u32 %v2340_v52, 16 }
 0x204   : > { %v2416_v34 = vshll.u32 %v2385_v22, 16  ;;  %v2627_v16 = vrot.slane %v2340_v52, 1  ;;  %v2944_v12 = vmax.bf16 %v2882_v27, %v2864_v6  ;;  %v2628_v4 = vrot.slane %v2385_v22, 1 }
 0x205   : > { %v2716_v35 = vshrl.u32 %v2385_v22, 16  ;;  %v2883_v45 = vrot.slane %v2340_v52, 2  ;;  %v2414_v1 = vrot.slane %v2412_v23, 1  ;;  %v2713_v17 = vrot.slane %v2410_v18, 1 }
 0x206   : > { %v2418_v39 = vrot.slane %v2416_v34, 1  ;;  %v2714_v14 = vrot.slane %v2412_v23, 2  ;;  %3153 = vmatprep.mubr.bf16.mxu1 %v2944_v12  ;;  %v2629_v42 = vsel %vm1189_vm1, %v2627_v16, %v2628_v4  ;;  %v2719_v47 = vrot.slane %v2416_v34, 2 }
 0x207   : > { %v2718_v58 = vrot.slane %v2716_v35, 1  ;;  %v2884_v48 = vrot.slane %v2385_v22, 2  ;;  %3154 = vmatmul.mubr.bf16.vlgmr.msra.gmra.mrb[16].mxu1 %v5644_v50  ;;  %v2415_v56 = vor.u32 %v2414_v1, %v2410_v18  ;;  %v1054_v5 = vsel %vm964_vm2, %v1050_v32, %v1053_v0 }
 0x208   : > { %v2715_v2 = vor.u32 %v2714_v14, %v2713_v17  ;;  %v1345_v27 = vor.u32 %v1344_v19, %v1343_v51  ;;  %v1149_v7 = vmax.bf16 %v1054_v5, %v5729_v29  ;;  %v1348_v63 = vrot.slane %v1346_v21, 1 }
 0x209   : > { %v2720_v6 = vor.u32 %v2719_v47, %v2718_v58  ;;  %v2885_v53 = vsel %vm1447_vm3, %v2883_v45, %v2884_v48  ;;  %v2419_v12 = vsel %vm964_vm2, %v2415_v56, %v2418_v39  ;;  %v1472_v23 = vrot.slane %v5729_v29, 2 }
 0x20a   : > { %v1473_v16 = vrot.slane %v956_v28, 2  ;;  %v1864_v22 = vmax.bf16 %v5734_v62, %v5638_v36  ;;  %v2577_v34 = vmax.bf16 %v2419_v12, %v2340_v52  ;;  %v1262_v18 = vmax.bf16 %v1216_v37, %v1149_v7 }
 0x20b   : > { %v2721_v1 = vsel %vm1270_vm4, %v2715_v2, %v2720_v6  ;;  %v1350_v0 = vor.u32 %v1349_v54, %v1348_v63  ;;  %v1920_v19 = vrot.slane %v5638_v36, 1  ;;  %v2024_v21 = vrot.slane %v1724_v44, 1 }
 0x20c   : > { %v1474_v51 = vsel %vm1447_vm3, %v1472_v23, %v1473_v16  ;;  %v2025_v39 = vrot.slane %v1726_v38, 2  ;;  %v2689_v29 = vmax.bf16 %v2629_v42, %v2577_v34  ;;  %v2030_v62 = vrot.slane %v1730_v9, 2 }
 0x20d   : > { %v1351_v28 = vsel %vm1270_vm4, %v1345_v27, %v1350_v0  ;;  %v2176_v52 = vrot.slane %v5638_v36, 2  ;;  %v1922_v63 = vsel %vm1189_vm1, %v1920_v19, %v1921_v40  ;;  %v2177_v54 = vrot.slane %v5641_v43, 2 }
 0x20e   : > { %v1439_v7 = vmax.bf16 %v1351_v28, %v1262_v18  ;;  %v2026_v37 = vor.u32 %v2025_v39, %v2024_v21  ;;  %v2865_v44 = vmax.bf16 %v2721_v1, %v2689_v29  ;;  %v1976_v32 = vmax.bf16 %v1922_v63, %v1864_v22 }
 0x20f   : > { %v2031_v38 = vor.u32 %v2030_v62, %v5665_v61  ;;  %v2245_v4 = vmax.bf16 %v5651_v60, %v5644_v50  ;;  %v2178_v9 = vsel %vm1447_vm3, %v2176_v52, %v2177_v54  ;;  %v891_v36 = vrot.slane %v5276_v57, 7 }
 0x210   : > { %v5773_v35 = vmax.bf16 %v1474_v51, %v1439_v7  ;;  %v7115_v45 = vshrl.u32 %v5701_v15, 16  ;;  %v2945_v17 = vmax.bf16 %v2885_v53, %v2865_v44  ;;  %v1923_v61 = vrot.slane %v5701_v15, 1 }
 0x211   : > { %v2032_v43 = vsel %vm1270_vm4, %v2026_v37, %v2031_v38  ;;  %v2260_v14 = vmax.bf16 %v2245_v4, %v5653_v10  ;;  %v7116_v42 = vmax.bf16 %v5667_v55, %v5599_v26  ;;  %v7117_v53 = vmax.bf16 %v5609_v13, %v5667_v55 }
 0x212   : > { %v1739_v40 = vor.u32 %v5717_v24, %v7115_v45  ;;  %v1536_v50 = vmax.bf16 %v5773_v35, %v5667_v55  ;;  %v1564_v57 = vmax.bf16 %v5682_v41, %v5773_v35  ;;  %3474 = vmatprep.mubr.bf16.mxu0 %v5773_v35  ;;  %3161 = vmatprep.mubr.bf16.mxu1 %v2945_v17  ;;  %v928_v26 = vsel %vm898_vm0, 0, %v891_v36 }
 0x213   : > { %v5789_v58 = vmax.bf16 %v7116_v42, %v5773_v35  ;;  %v1578_v24 = vmax.bf16 %v7117_v53, %v5773_v35  ;;  %3475 = vmatmul.mubr.bf16.gmra.mrb[48].mxu0 %v5049_v31  ;;  %v2152_v47 = vmax.bf16 %v2032_v43, %v1976_v32  ;;  %v2275_v48 = vmax.bf16 %v2260_v14, %v5726_v8 }
 0x214   : > { %v957_v56 = vsel %vm898_vm0, %v891_v36, 0  ;;  %3162 = vmatmul.mubr.bf16.gmra.mrb[20].mxu1 %v5651_v60  ;;  %v1055_v5 = vshrl.u32 %v928_v26, 16  ;;  %v1057_v27 = vshll.u32 %v928_v26, 16  ;;  %v1217_v12 = vrot.slane %v928_v26, 1 }
 0x215   : > { %v1610_v2 = vrot.slane %v1578_v24, 7  ;;  %v1061_v6 = vshll.u32 %v957_v56, 16  ;;  %v5803_v13 = vmax.bf16 %v2178_v9, %v2152_v47  ;;  %v1218_v23 = vrot.slane %v957_v56, 1 }
 0x216   : > { %v1355_v16 = vshrl.u32 %v957_v56, 16  ;;  %v1059_v34 = vrot.slane %v1057_v27, 1  ;;  %v1352_v7 = vrot.slane %v1055_v5, 1  ;;  %v1353_v63 = vrot.slane %v1057_v27, 2 }
 0x217   : > { %v5806_v31 = vsel %vm898_vm0, 0, %v1610_v2  ;;  %v5809_v22 = vsel %vm898_vm0, %v1610_v2, 0  ;;  %v1063_v1 = vrot.slane %v1061_v6, 1  ;;  %v2290_v39 = vmax.bf16 %v2275_v48, %v5803_v13 }
 0x218   : > { %v1744_v18 = vshrl.u32 %v5806_v31, 16  ;;  %v1746_v0 = vshll.u32 %v5806_v31, 16  ;;  %v1750_v51 = vshll.u32 %v5809_v22, 16  ;;  %v1927_v19 = vrot.slane %v5809_v22, 1 }
 0x219   : > { %v2045_v21 = vshrl.u32 %v5809_v22, 16  ;;  %v1060_v29 = vor.u32 %v1059_v34, %v1055_v5  ;;  %v1219_v28 = vsel %vm1189_vm1, %v1217_v12, %v1218_v23  ;;  %v2322_v54 = vrot.slane %v2290_v39, 7 }
 0x21a   : > { %v5820_v62 = vrot.slane %v1746_v0, 1  ;;  %v5824_v52 = vrot.slane %v1750_v51, 1  ;;  %v1357_v32 = vrot.slane %v1355_v16, 1  ;;  %v1354_v4 = vor.u32 %v1353_v63, %v1352_v7 }
 0x21b   : > { %v5826_v37 = vrot.slane %v2045_v21, 1  ;;  %v1064_v44 = vsel %vm964_vm2, %v1060_v29, %v1063_v1  ;;  %v1358_v9 = vrot.slane %v1061_v6, 2  ;;  %v1475_v36 = vrot.slane %v928_v26, 2 }
 0x21c   : > { %v1150_v38 = vmax.bf16 %v1064_v44, %v928_v26  ;;  %v2343_v45 = vsel %vm898_vm0, 0, %v2322_v54  ;;  %v2386_v17 = vsel %vm898_vm0, %v2322_v54, 0  ;;  %v1476_v43 = vrot.slane %v957_v56, 2 }
 0x21d   : > { %v1743_v14 = vsel %vm964_vm2, %v1739_v40, %v5721_v46  ;;  %v2420_v42 = vshrl.u32 %v2343_v45, 16  ;;  %v2422_v53 = vshll.u32 %v2343_v45, 16  ;;  %v2426_v24 = vshll.u32 %v2386_v17, 16 }
 0x21e   : > { %v2630_v47 = vrot.slane %v2343_v45, 1  ;;  %v2631_v48 = vrot.slane %v2386_v17, 1  ;;  %v2725_v2 = vshrl.u32 %v2386_v17, 16  ;;  %v2886_v5 = vrot.slane %v2343_v45, 2 }
 0x21f   : > { %v2887_v27 = vrot.slane %v2386_v17, 2  ;;  %v2424_v12 = vrot.slane %v2422_v53, 1  ;;  %v2428_v23 = vrot.slane %v2426_v24, 1  ;;  %v2722_v6 = vrot.slane %v2420_v42, 1 }
 0x220   : > { %v2723_v26 = vrot.slane %v2422_v53, 2  ;;  %v2632_v16 = vsel %vm1189_vm1, %v2630_v47, %v2631_v48  ;;  %v2727_v34 = vrot.slane %v2725_v2, 1  ;;  %v2728_v1 = vrot.slane %v2426_v24, 2 }
 0x221   : > { %v2888_v56 = vsel %vm1447_vm3, %v2886_v5, %v2887_v27  ;;  %v2425_v21 = vor.u32 %v2424_v12, %v2420_v42  ;;  %v1263_v40 = vmax.bf16 %v1219_v28, %v1150_v38  ;;  %v1359_v39 = vor.u32 %v1358_v9, %v1357_v32 }
 0x222   : > { %v2724_v46 = vor.u32 %v2723_v26, %v2722_v6  ;;  %v2729_v29 = vor.u32 %v2728_v1, %v2727_v34  ;;  %v1477_v7 = vsel %vm1447_vm3, %v1475_v36, %v1476_v43  ;;  %v1865_v63 = vmax.bf16 %v1743_v14, %v5701_v15 }
 0x223   : > { %v7118_v54 = vrot.slane %v5704_v20, 1  ;;  %v2429_v17 = vsel %vm964_vm2, %v2425_v21, %v2428_v23  ;;  %v1360_v53 = vsel %vm1270_vm4, %v1354_v4, %v1359_v39  ;;  %v7119_v42 = vshrl.u32 %v5701_v15, 16 }
 0x224   : > { %v7120_v28 = vshll.u32 %v5701_v15, 16  ;;  %v2578_v38 = vmax.bf16 %v2429_v17, %v2343_v45  ;;  %v2730_v9 = vsel %vm1270_vm4, %v2724_v46, %v2729_v29  ;;  %v1440_v36 = vmax.bf16 %v1360_v53, %v1263_v40 }
 0x225   : > { %v1925_v44 = vsel %vm1189_vm1, %v1923_v61, %v7118_v54  ;;  %v2033_v24 = vrot.slane %v7119_v42, 1  ;;  %v7121_v47 = vshll.u32 %v5704_v20, 16  ;;  %v2179_v61 = vrot.slane %v5701_v15, 2 }
 0x226   : > { %v2034_v32 = vrot.slane %v7120_v28, 2  ;;  %v1977_v43 = vmax.bf16 %v1925_v44, %v1865_v63  ;;  %v2180_v2 = vrot.slane %v5704_v20, 2  ;;  %v2690_v4 = vmax.bf16 %v2632_v16, %v2578_v38 }
 0x227   : > { %v2039_v48 = vrot.slane %v7121_v47, 2  ;;  %v5853_v5 = vmax.bf16 %v1477_v7, %v1440_v36  ;;  %v2246_v27 = vmax.bf16 %v5653_v10, %v5651_v60  ;;  %v1065_v45 = vshrl.u32 %v5205_v49, 16 }
 0x228   : > { %v2035_v14 = vor.u32 %v2034_v32, %v2033_v24  ;;  %v2181_v23 = vsel %vm1447_vm3, %v2179_v61, %v2180_v2  ;;  %v1067_v6 = vshll.u32 %v5205_v49, 16  ;;  %v1071_v26 = vshll.u32 %v5208_v33, 16 }
 0x229   : > { %v2040_v12 = vor.u32 %v2039_v48, %v5723_v11  ;;  %v2866_v34 = vmax.bf16 %v2730_v9, %v2690_v4  ;;  %v1537_v15 = vmax.bf16 %v5853_v5, %v5773_v35  ;;  %v5868_v20 = vmax.bf16 %v1536_v50, %v5853_v5  ;;  %3482 = vmatprep.mubr.bf16.mxu0 %v5853_v5 }
 0x22a   : > { %v1565_v60 = vmax.bf16 %v5789_v58, %v5853_v5  ;;  %v1579_v11 = vmax.bf16 %v1564_v57, %v5853_v5  ;;  %3483 = vmatmul.mubr.bf16.gmra.mrb[52].mxu0 %v5043_v25  ;;  %v2261_v1 = vmax.bf16 %v2246_v27, %v5726_v8  ;;  %v1069_v21 = vrot.slane %v1067_v6, 1 }
 0x22b   : > { %v2041_v16 = vsel %vm1270_vm4, %v2035_v14, %v2040_v12  ;;  %v2946_v55 = vmax.bf16 %v2888_v56, %v2866_v34  ;;  %v1073_v46 = vrot.slane %v1071_v26, 1  ;;  %v1220_v40 = vrot.slane %v5205_v49, 1 }
 0x22c   : > { %v2153_v50 = vmax.bf16 %v2041_v16, %v1977_v43  ;;  %v1611_v39 = vrot.slane %v1579_v11, 7  ;;  %v2276_v29 = vmax.bf16 %v2261_v1, %v5803_v13  ;;  %v1070_v7 = vor.u32 %v1069_v21, %v1065_v45 }
 0x22d   : > { %v1221_v63 = vrot.slane %v5208_v33, 1  ;;  %3169 = vmatprep.mubr.bf16.mxu1 %v2946_v55  ;;  %v1361_v25 = vrot.slane %v1065_v45, 1  ;;  %v1362_v57 = vrot.slane %v1067_v6, 2  ;;  %v1364_v54 = vshrl.u32 %v5208_v33, 16 }
 0x22e   : > { %v5883_v41 = vmax.bf16 %v2181_v23, %v2153_v50  ;;  %v5887_v44 = vsel %vm898_vm0, 0, %v1611_v39  ;;  %v5890_v56 = vsel %vm898_vm0, %v1611_v39, 0  ;;  %3170 = vmatmul.mubr.bf16.gmra.mrb[24].mxu1 %v5653_v10  ;;  %v1074_v17 = vsel %vm964_vm2, %v1070_v7, %v1073_v46 }
 0x22f   : > { %v1222_v53 = vsel %vm1189_vm1, %v1220_v40, %v1221_v63  ;;  %v1754_v42 = vshrl.u32 %v5887_v44, 16  ;;  %v1756_v24 = vshll.u32 %v5887_v44, 16  ;;  %v1760_v28 = vshll.u32 %v5890_v56, 16 }
 0x230   : > { %v1930_v32 = vrot.slane %v5890_v56, 1  ;;  %v2054_v38 = vshrl.u32 %v5890_v56, 16  ;;  %v2291_v9 = vmax.bf16 %v2276_v29, %v5883_v41  ;;  %v1151_v36 = vmax.bf16 %v1074_v17, %v5205_v49 }
 0x231   : > { %v1363_v43 = vor.u32 %v1362_v57, %v1361_v25  ;;  %v5904_v14 = vrot.slane %v1756_v24, 1  ;;  %v5908_v47 = vrot.slane %v1760_v28, 1  ;;  %v1366_v48 = vrot.slane %v1364_v54, 1 }
 0x232   : > { %v1367_v61 = vrot.slane %v1071_v26, 2  ;;  %v5910_v2 = vrot.slane %v2054_v38, 1  ;;  %v2323_v4 = vrot.slane %v2291_v9, 7  ;;  %v1264_v27 = vmax.bf16 %v1222_v53, %v1151_v36 }
 0x233   : > { %v1478_v45 = vrot.slane %v5205_v49, 2  ;;  %v1479_v23 = vrot.slane %v5208_v33, 2  ;;  %v1749_v6 = vor.u32 %v5820_v62, %v1744_v18  ;;  %v1926_v34 = vrot.slane %v5806_v31, 1 }
 0x234   : > { %v1368_v12 = vor.u32 %v1367_v61, %v1366_v48  ;;  %v2346_v11 = vsel %vm898_vm0, 0, %v2323_v4  ;;  %v2387_v16 = vsel %vm898_vm0, %v2323_v4, 0  ;;  %v2042_v26 = vrot.slane %v1744_v18, 1 }
 0x235   : > { %v2043_v1 = vrot.slane %v1746_v0, 2  ;;  %v2430_v49 = vshrl.u32 %v2346_v11, 16  ;;  %v2432_v21 = vshll.u32 %v2346_v11, 16  ;;  %v2436_v55 = vshll.u32 %v2387_v16, 16 }
 0x236   : > { %v2633_v33 = vrot.slane %v2346_v11, 1  ;;  %v2634_v50 = vrot.slane %v2387_v16, 1  ;;  %v2734_v46 = vshrl.u32 %v2387_v16, 16  ;;  %v2889_v40 = vrot.slane %v2346_v11, 2 }
 0x237   : > { %v2890_v62 = vrot.slane %v2387_v16, 2  ;;  %v2434_v39 = vrot.slane %v2432_v21, 1  ;;  %v2438_v29 = vrot.slane %v2436_v55, 1  ;;  %v2731_v7 = vrot.slane %v2430_v49, 1 }
 0x238   : > { %v2732_v63 = vrot.slane %v2432_v21, 2  ;;  %v2635_v25 = vsel %vm1189_vm1, %v2633_v33, %v2634_v50  ;;  %v2736_v57 = vrot.slane %v2734_v46, 1  ;;  %v2737_v54 = vrot.slane %v2436_v55, 2  ;;  %v7123_v33 = vld [vmem:[#allocation15_spill] sm:$0xff] }
 0x239   : > { %v2891_v18 = vsel %vm1447_vm3, %v2889_v40, %v2890_v62  ;;  %v2435_v17 = vor.u32 %v2434_v39, %v2430_v49  ;;  %v1369_v53 = vsel %vm1270_vm4, %v1363_v43, %v1368_v12  ;;  %v1480_v38 = vsel %vm1447_vm3, %v1478_v45, %v1479_v23 }
 0x23a   : > { %v2733_v0 = vor.u32 %v2732_v63, %v2731_v7  ;;  %v2738_v9 = vor.u32 %v2737_v54, %v2736_v57  ;;  %v1441_v36 = vmax.bf16 %v1369_v53, %v1264_v27  ;;  %v1753_v48 = vsel %vm964_vm2, %v1749_v6, %v5824_v52 }
 0x23b   : > { %v1928_v61 = vsel %vm1189_vm1, %v1926_v34, %v1927_v19  ;;  %v2439_v4 = vsel %vm964_vm2, %v2435_v17, %v2438_v29  ;;  %v1866_v16 = vmax.bf16 %v1753_v48, %v5806_v31  ;;  %v2044_v21 = vor.u32 %v2043_v1, %v2042_v26 }
 0x23c   : > { %v2048_v49 = vrot.slane %v1750_v51, 2  ;;  %v2579_v43 = vmax.bf16 %v2439_v4, %v2346_v11  ;;  %v2739_v45 = vsel %vm1270_vm4, %v2733_v0, %v2738_v9  ;;  %v5938_v12 = vmax.bf16 %v1480_v38, %v1441_v36 }
 0x23d   : > { %v2182_v27 = vrot.slane %v5806_v31, 2  ;;  %v1978_v52 = vmax.bf16 %v1928_v61, %v1866_v16  ;;  %v2183_v19 = vrot.slane %v5809_v22, 2  ;;  %v2247_v6 = vmax.bf16 %v5726_v8, %v5653_v10 }
 0x23e   : > { %v2049_v23 = vor.u32 %v2048_v49, %v5826_v37  ;;  %v2691_v34 = vmax.bf16 %v2635_v25, %v2579_v43  ;;  %v1538_v26 = vmax.bf16 %v5938_v12, %v5853_v5  ;;  %v5951_v51 = vmax.bf16 %v1537_v15, %v5938_v12  ;;  %3490 = vmatprep.mubr.bf16.mxu0 %v5938_v12 }
 0x23f   : > { %v1566_v31 = vmax.bf16 %v5868_v20, %v5938_v12  ;;  %v1580_v10 = vmax.bf16 %v1565_v60, %v5938_v12  ;;  %3491 = vmatmul.mubr.bf16.gmra.mrb[56].mxu0 %v5094_v30  ;;  %v2184_v37 = vsel %vm1447_vm3, %v2182_v27, %v2183_v19  ;;  %v2262_v35 = vmax.bf16 %v2247_v6, %v5803_v13 }
 0x240   : > { %v2050_v22 = vsel %vm1270_vm4, %v2044_v21, %v2049_v23  ;;  %v2867_v15 = vmax.bf16 %v2739_v45, %v2691_v34  ;;  %v7122_v1 = vrot.slane %v5190_v3, 7  ;;  %v1075_v50 = vshrl.u32 %v7123_v33, 16 }
 0x241   : > { %v2154_v11 = vmax.bf16 %v2050_v22, %v1978_v52  ;;  %v1612_v46 = vrot.slane %v1580_v10, 7  ;;  %v2277_v58 = vmax.bf16 %v2262_v35, %v5883_v41  ;;  %v1077_v30 = vshll.u32 %v7123_v33, 16 }
 0x242   : > { %v5967_v55 = vsel %vm898_vm0, %v7122_v1, 0  ;;  %v2947_v40 = vmax.bf16 %v2891_v18, %v2867_v15  ;;  %v1223_v39 = vrot.slane %v7123_v33, 1  ;;  %v1370_v61 = vrot.slane %v1075_v50, 1 }
 0x243   : > { %v1081_v60 = vshll.u32 %v5967_v55, 16  ;;  %v5973_v62 = vmax.bf16 %v2184_v37, %v2154_v11  ;;  %v1224_v29 = vrot.slane %v5967_v55, 1  ;;  %v5978_v3 = vsel %vm898_vm0, 0, %v1612_v46 }
 0x244   : > { %v5981_v7 = vsel %vm898_vm0, %v1612_v46, 0  ;;  %v1079_v63 = vrot.slane %v1077_v30, 1  ;;  %3177 = vmatprep.mubr.bf16.mxu1 %v2947_v40  ;;  %v1764_v57 = vshrl.u32 %v5978_v3, 16  ;;  %v1766_v54 = vshll.u32 %v5978_v3, 16 }
 0x245   : > { %v1083_v25 = vrot.slane %v1081_v60, 1  ;;  %v1770_v18 = vshll.u32 %v5981_v7, 16  ;;  %v1933_v17 = vrot.slane %v5981_v7, 1  ;;  %v2063_v0 = vshrl.u32 %v5981_v7, 16  ;;  %3178 = vmatmul.mubr.bf16.gmra.mrb[28].mxu1 %v5726_v8 }
 0x246   : > { %v2292_v53 = vmax.bf16 %v2277_v58, %v5973_v62  ;;  %v1080_v38 = vor.u32 %v1079_v63, %v1075_v50  ;;  %v1225_v9 = vsel %vm1189_vm1, %v1223_v39, %v1224_v29  ;;  %v5993_v36 = vrot.slane %v1766_v54, 1 }
 0x247   : > { %v5997_v48 = vrot.slane %v1770_v18, 1  ;;  %v1371_v4 = vrot.slane %v1077_v30, 2  ;;  %v5999_v16 = vrot.slane %v2063_v0, 1  ;;  %v1373_v43 = vshrl.u32 %v5967_v55, 16 }
 0x248   : > { %v2324_v21 = vrot.slane %v2292_v53, 7  ;;  %v1084_v49 = vsel %vm964_vm2, %v1080_v38, %v1083_v25  ;;  %v1376_v52 = vrot.slane %v1081_v60, 2  ;;  %v1481_v23 = vrot.slane %v7123_v33, 2 }
 0x249   : > { %v1152_v45 = vmax.bf16 %v1084_v49, %v7123_v33  ;;  %v1372_v27 = vor.u32 %v1371_v4, %v1370_v61  ;;  %v1375_v34 = vrot.slane %v1373_v43, 1  ;;  %v1482_v10 = vrot.slane %v5967_v55, 2 }
 0x24a   : > { %v2349_v19 = vsel %vm898_vm0, 0, %v2324_v21  ;;  %v2388_v6 = vsel %vm898_vm0, %v2324_v21, 0  ;;  %v1759_v4 = vor.u32 %v5904_v14, %v1754_v42  ;;  %v1929_v21 = vrot.slane %v5887_v44, 1 }
 0x24b   : > { %v2440_v22 = vshrl.u32 %v2349_v19, 16  ;;  %v2442_v37 = vshll.u32 %v2349_v19, 16  ;;  %v2446_v35 = vshll.u32 %v2388_v6, 16  ;;  %v2636_v15 = vrot.slane %v2349_v19, 1 }
 0x24c   : > { %v2637_v11 = vrot.slane %v2388_v6, 1  ;;  %v2743_v1 = vshrl.u32 %v2388_v6, 16  ;;  %v2892_v50 = vrot.slane %v2349_v19, 2  ;;  %v2893_v46 = vrot.slane %v2388_v6, 2 }
 0x24d   : > { %v2444_v58 = vrot.slane %v2442_v37, 1  ;;  %v2448_v30 = vrot.slane %v2446_v35, 1  ;;  %v2740_v60 = vrot.slane %v2440_v22, 1  ;;  %v2741_v40 = vrot.slane %v2442_v37, 2 }
 0x24e   : > { %v2638_v33 = vsel %vm1189_vm1, %v2636_v15, %v2637_v11  ;;  %v2745_v39 = vrot.slane %v2743_v1, 1  ;;  %v2746_v29 = vrot.slane %v2446_v35, 2  ;;  %v2894_v63 = vsel %vm1447_vm3, %v2892_v50, %v2893_v46  ;;  %v7124_v11 = vld [vmem:[#allocation24_spill] sm:$0xff]  ;;  %v7125_v1 = vld [vmem:[#allocation27_spill] sm:$0xff] }
 0x24f   : > { %v2445_v25 = vor.u32 %v2444_v58, %v2440_v22  ;;  %v2742_v55 = vor.u32 %v2741_v40, %v2740_v60  ;;  %v1265_v0 = vmax.bf16 %v1225_v9, %v1152_v45  ;;  %v1377_v53 = vor.u32 %v1376_v52, %v1375_v34 }
 0x250   : > { %v2747_v38 = vor.u32 %v2746_v29, %v2745_v39  ;;  %v1483_v61 = vsel %vm1447_vm3, %v1481_v23, %v1482_v10  ;;  %v2051_v6 = vrot.slane %v1754_v42, 1  ;;  %v2052_v9 = vrot.slane %v1756_v24, 2 }
 0x251   : > { %v2449_v49 = vsel %vm964_vm2, %v2445_v25, %v2448_v30  ;;  %v1378_v43 = vsel %vm1270_vm4, %v1372_v27, %v1377_v53  ;;  %v1763_v34 = vsel %vm964_vm2, %v1759_v4, %v5908_v47  ;;  %v1931_v10 = vsel %vm1189_vm1, %v1929_v21, %v1930_v32  ;;  %v7133_v21 = vld [vmem:[#allocation29_spill] sm:$0xff] }
 0x252   : > { %v2580_v45 = vmax.bf16 %v2449_v49, %v2349_v19  ;;  %v2748_v52 = vsel %vm1270_vm4, %v2742_v55, %v2747_v38  ;;  %v1442_v23 = vmax.bf16 %v1378_v43, %v1265_v0  ;;  %v1867_v14 = vmax.bf16 %v1763_v34, %v5887_v44  ;;  %v7134_v49 = vld [vmem:[#allocation28_spill] sm:$0xff] }
 0x253   : > { %v2053_v27 = vor.u32 %v2052_v9, %v2051_v6  ;;  %v2057_v42 = vrot.slane %v1760_v28, 2  ;;  %v2185_v24 = vrot.slane %v5887_v44, 2  ;;  %v2186_v19 = vrot.slane %v5890_v56, 2 }
 0x254   : > { %v2692_v22 = vmax.bf16 %v2638_v33, %v2580_v45  ;;  %v6030_v37 = vmax.bf16 %v1483_v61, %v1442_v23  ;;  %v1979_v35 = vmax.bf16 %v1931_v10, %v1867_v14  ;;  %v2248_v15 = vmax.bf16 %v5803_v13, %v5726_v8  ;;  %v7126_v8 = vld [vmem:[#allocation12_spill] sm:$0xff]  ;;  %v7128_v33 = vld [vmem:[#allocation22_spill] sm:$0xff] }
 0x255   : > { %v2058_v47 = vor.u32 %v2057_v42, %v5910_v2  ;;  %v1094_v32 = vsel %vm964_vm2, %v7125_v1, %v7124_v11  ;;  %v2187_v46 = vsel %vm1447_vm3, %v2185_v24, %v2186_v19  ;;  %v7129_v39 = vrot.slane %v7128_v33, 1 }
 0x256   : > { %v2868_v50 = vmax.bf16 %v2748_v52, %v2692_v22  ;;  %v6044_v28 = vmax.bf16 %v1538_v26, %v6030_v37  ;;  %v1567_v44 = vmax.bf16 %v5951_v51, %v6030_v37  ;;  %v1581_v56 = vmax.bf16 %v1566_v31, %v6030_v37  ;;  %3498 = vmatprep.mubr.bf16.mxu0 %v6030_v37  ;;  %v7127_v26 = vld [vmem:[#allocation20_spill] sm:$0xff]  ;;  %v7136_v51 = vld [vmem:[#allocation21_spill] sm:$0xff] }
 0x257   : > { %3499 = vmatmul.mubr.bf16.gmra.mrb[60].mxu0 %v7126_v8  ;;  %v2059_v2 = vsel %vm1270_vm4, %v2053_v27, %v2058_v47  ;;  %v2263_v5 = vmax.bf16 %v2248_v15, %v5883_v41  ;;  %v1153_v58 = vmax.bf16 %v1094_v32, %v7127_v26  ;;  %v7130_v20 = vrot.slane %v7127_v26, 1 }
 0x258   : > { %v2948_v30 = vmax.bf16 %v2894_v63, %v2868_v50  ;;  %v1613_v60 = vrot.slane %v1581_v56, 7  ;;  %v2155_v40 = vmax.bf16 %v2059_v2, %v1979_v35  ;;  %v7131_v55 = vshrl.u32 %v7127_v26, 16 }
 0x259   : > { %v1228_v31 = vsel %vm1189_vm1, %v7130_v20, %v7129_v39  ;;  %v2278_v29 = vmax.bf16 %v2263_v5, %v5973_v62  ;;  %v7132_v53 = vshll.u32 %v7127_v26, 16  ;;  %v1386_v43 = vor.u32 %v7134_v49, %v7133_v21 }
 0x25a   : > { %v1266_v25 = vmax.bf16 %v1228_v31, %v1153_v58  ;;  %v1379_v0 = vrot.slane %v7131_v55, 1  ;;  %3185 = vmatprep.mubr.bf16.mxu1 %v2948_v30  ;;  %v6069_v63 = vsel %vm898_vm0, 0, %v1613_v60  ;;  %v6072_v61 = vsel %vm898_vm0, %v1613_v60, 0 }
 0x25b   : > { %v1380_v38 = vrot.slane %v7132_v53, 2  ;;  %v6074_v4 = vmax.bf16 %v2187_v46, %v2155_v40  ;;  %v1774_v6 = vshrl.u32 %v6069_v63, 16  ;;  %v1776_v9 = vshll.u32 %v6069_v63, 16  ;;  %3186 = vmatmul.mubr.bf16.gmra.mrb[32].mxu1 %v5803_v13 }
 0x25c   : > { %v1780_v45 = vshll.u32 %v6072_v61, 16  ;;  %v1936_v52 = vrot.slane %v6072_v61, 1  ;;  %v2072_v23 = vshrl.u32 %v6072_v61, 16  ;;  %v1484_v10 = vrot.slane %v7127_v26, 2 }
 0x25d   : > { %v2293_v34 = vmax.bf16 %v2278_v29, %v6074_v4  ;;  %v1381_v14 = vor.u32 %v1380_v38, %v1379_v0  ;;  %v6088_v27 = vrot.slane %v1776_v9, 1  ;;  %v1485_v22 = vrot.slane %v7128_v33, 2 }
 0x25e   : > { %v6092_v42 = vrot.slane %v1780_v45, 1  ;;  %v1769_v24 = vor.u32 %v5993_v36, %v1764_v57  ;;  %v6098_v19 = vrot.slane %v2072_v23, 1  ;;  %v1932_v15 = vrot.slane %v5978_v3, 1 }
 0x25f   : > { %v2325_v35 = vrot.slane %v2293_v34, 7  ;;  %v1387_v47 = vsel %vm1270_vm4, %v1381_v14, %v1386_v43  ;;  %v1486_v1 = vsel %vm1447_vm3, %v1484_v10, %v1485_v22  ;;  %v2060_v50 = vrot.slane %v1764_v57, 1 }
 0x260   : > { %v1443_v11 = vmax.bf16 %v1387_v47, %v1266_v25  ;;  %v1773_v32 = vsel %vm964_vm2, %v1769_v24, %v5997_v48  ;;  %v1934_v2 = vsel %vm1189_vm1, %v1932_v15, %v1933_v17  ;;  %v2061_v49 = vrot.slane %v1766_v54, 2 }
 0x261   : > { %v2352_v56 = vsel %vm898_vm0, 0, %v2325_v35  ;;  %v2389_v36 = vsel %vm898_vm0, %v2325_v35, 0  ;;  %v1868_v8 = vmax.bf16 %v1773_v32, %v5978_v3  ;;  %v2066_v43 = vrot.slane %v1770_v18, 2  ;;  %v7135_v18 = vld [vmem:[#allocation14_spill] sm:$0xff] }
 0x262   : > { %v2450_v46 = vshrl.u32 %v2352_v56, 16  ;;  %v2452_v5 = vshll.u32 %v2352_v56, 16  ;;  %v2456_v26 = vshll.u32 %v2389_v36, 16  ;;  %v2639_v58 = vrot.slane %v2352_v56, 1 }
 0x263   : > { %v2640_v30 = vrot.slane %v2389_v36, 1  ;;  %v2752_v60 = vshrl.u32 %v2389_v36, 16  ;;  %v2895_v48 = vrot.slane %v2352_v56, 2  ;;  %v2896_v40 = vrot.slane %v2389_v36, 2 }
 0x264   : > { %v2454_v33 = vrot.slane %v2452_v5, 1  ;;  %v2458_v57 = vrot.slane %v2456_v26, 1  ;;  %v2749_v39 = vrot.slane %v2450_v46, 1  ;;  %v2750_v20 = vrot.slane %v2452_v5, 2 }
 0x265   : > { %v2641_v31 = vsel %vm1189_vm1, %v2639_v58, %v2640_v30  ;;  %v2754_v29 = vrot.slane %v2752_v60, 1  ;;  %v2755_v25 = vrot.slane %v2456_v26, 2  ;;  %v2897_v55 = vsel %vm1447_vm3, %v2895_v48, %v2896_v40 }
 0x266   : > { %v2455_v0 = vor.u32 %v2454_v33, %v2450_v46  ;;  %v2751_v17 = vor.u32 %v2750_v20, %v2749_v39  ;;  %v6115_v53 = vmax.bf16 %v1486_v1, %v1443_v11  ;;  %v1980_v38 = vmax.bf16 %v1934_v2, %v1868_v8  ;;  %v7138_v1 = vld [vmem:[#allocation25_spill] sm:$0xff] }
 0x267   : > { %v2756_v21 = vor.u32 %v2755_v25, %v2754_v29  ;;  %v2188_v23 = vrot.slane %v5978_v3, 2  ;;  %v2189_v22 = vrot.slane %v5981_v7, 2  ;;  %v2062_v3 = vor.u32 %v2061_v49, %v2060_v50 }
 0x268   : > { %v2459_v34 = vsel %vm964_vm2, %v2455_v0, %v2458_v57  ;;  %v1568_v14 = vmax.bf16 %v6044_v28, %v6115_v53  ;;  %v1582_v10 = vmax.bf16 %v1567_v44, %v6115_v53  ;;  %3506 = vmatprep.mubr.bf16.mxu0 %v6115_v53  ;;  %v2067_v35 = vor.u32 %v2066_v43, %v5999_v16 }
 0x269   : > { %v2581_v54 = vmax.bf16 %v2459_v34, %v2352_v56  ;;  %v2757_v24 = vsel %vm1270_vm4, %v2751_v17, %v2756_v21  ;;  %3507 = vmatmul.mubr.bf16.gmra.mrb[64].mxu0 %v7135_v18  ;;  %v2190_v15 = vsel %vm1447_vm3, %v2188_v23, %v2189_v22  ;;  %v2249_v11 = vmax.bf16 %v5883_v41, %v5803_v13 }
 0x26a   : > { %v1614_v47 = vrot.slane %v1582_v10, 7  ;;  %v7137_v44 = vshrl.u32 %v7136_v51, 16  ;;  %v2068_v7 = vsel %vm1270_vm4, %v2062_v3, %v2067_v35  ;;  %v1229_v56 = vrot.slane %v7136_v51, 1 }
 0x26b   : > { %v2693_v36 = vmax.bf16 %v2641_v31, %v2581_v54  ;;  %v2156_v46 = vmax.bf16 %v2068_v7, %v1980_v38  ;;  %v2264_v13 = vmax.bf16 %v2249_v11, %v5973_v62  ;;  %v7140_v31 = vld [vmem:[#allocation26_spill] sm:$0xff]  ;;  %v7141_v38 = vld [vmem:[#allocation23_spill] sm:$0xff]  ;;  %v7143_v49 = vshll.u32 %v7136_v51, 16 }
 0x26c   : > { %v1100_v32 = vor.u32 %v7138_v1, %v7137_v44  ;;  %v7139_v8 = vmov %v7137_v44  ;;  %v6145_v16 = vsel %vm898_vm0, 0, %v1614_v47  ;;  %v6148_v2 = vsel %vm898_vm0, %v1614_v47, 0  ;;  %v7145_v47 = vld [vmem:[#allocation30_spill] sm:$0xff] }
 0x26d   : > { %v1388_v50 = vrot.slane %v7139_v8, 1  ;;  %v2869_v5 = vmax.bf16 %v2757_v24, %v2693_v36  ;;  %v1784_v26 = vshrl.u32 %v6145_v16, 16  ;;  %v1786_v58 = vshll.u32 %v6145_v16, 16 }
 0x26e   : > { %v1790_v30 = vshll.u32 %v6148_v2, 16  ;;  %v1939_v60 = vrot.slane %v6148_v2, 1  ;;  %v2081_v48 = vshrl.u32 %v6148_v2, 16  ;;  %v6156_v40 = vmax.bf16 %v2190_v15, %v2156_v46 }
 0x26f   : > { %v2279_v33 = vmax.bf16 %v2264_v13, %v6074_v4  ;;  %v2949_v57 = vmax.bf16 %v2897_v55, %v2869_v5  ;;  %v6161_v39 = vrot.slane %v1786_v58, 1  ;;  %v1104_v29 = vsel %vm964_vm2, %v1100_v32, %v7140_v31 }
 0x270   : > { %v6165_v20 = vrot.slane %v1790_v30, 1  ;;  %v6169_v25 = vrot.slane %v2081_v48, 1  ;;  %v1154_v17 = vmax.bf16 %v1104_v29, %v7136_v51  ;;  %v7142_v21 = vrot.slane %v7141_v38, 1 }
 0x271   : > { %v2294_v0 = vmax.bf16 %v2279_v33, %v6156_v40  ;;  %3193 = vmatprep.mubr.bf16.mxu1 %v2949_v57  ;;  %v1389_v43 = vrot.slane %v7143_v49, 2  ;;  %v7144_v23 = vshll.u32 %v7141_v38, 16  ;;  %v1487_v10 = vrot.slane %v7136_v51, 2 }
 0x272   : > { %v1231_v55 = vsel %vm1189_vm1, %v1229_v56, %v7142_v21  ;;  %v1488_v22 = vrot.slane %v7141_v38, 2  ;;  %3194 = vmatmul.mubr.bf16.gmra.mrb[36].mxu1 %v5883_v41  ;;  %v1779_v18 = vor.u32 %v6088_v27, %v1774_v6  ;;  %v1935_v3 = vrot.slane %v6069_v63, 1 }
 0x273   : > { %v1394_v34 = vrot.slane %v7144_v23, 2  ;;  %v2326_v54 = vrot.slane %v2294_v0, 7  ;;  %v1267_v24 = vmax.bf16 %v1231_v55, %v1154_v17  ;;  %v1390_v35 = vor.u32 %v1389_v43, %v1388_v50 }
 0x274   : > { %v1489_v11 = vsel %vm1447_vm3, %v1487_v10, %v1488_v22  ;;  %v2069_v51 = vrot.slane %v1774_v6, 1  ;;  %v1783_v32 = vsel %vm964_vm2, %v1779_v18, %v6092_v42  ;;  %v1937_v27 = vsel %vm1189_vm1, %v1935_v3, %v1936_v52 }
 0x275   : > { %v1395_v15 = vor.u32 %v1394_v34, %v7145_v47  ;;  %v2355_v44 = vsel %vm898_vm0, 0, %v2326_v54  ;;  %v2390_v1 = vsel %vm898_vm0, %v2326_v54, 0  ;;  %v1869_v21 = vmax.bf16 %v1783_v32, %v6069_v63 }
 0x276   : > { %v2460_v36 = vshrl.u32 %v2355_v44, 16  ;;  %v2462_v7 = vshll.u32 %v2355_v44, 16  ;;  %v2466_v56 = vshll.u32 %v2390_v1, 16  ;;  %v2642_v8 = vrot.slane %v2355_v44, 1 }
 0x277   : > { %v2643_v50 = vrot.slane %v2390_v1, 1  ;;  %v2761_v46 = vshrl.u32 %v2390_v1, 16  ;;  %v2898_v13 = vrot.slane %v2355_v44, 2  ;;  %v2899_v5 = vrot.slane %v2390_v1, 2 }
 0x278   : > { %v2464_v6 = vrot.slane %v2462_v7, 1  ;;  %v2468_v48 = vrot.slane %v2466_v56, 1  ;;  %v2758_v33 = vrot.slane %v2460_v36, 1  ;;  %v2759_v57 = vrot.slane %v2462_v7, 2 }
 0x279   : > { %v2644_v31 = vsel %vm1189_vm1, %v2642_v8, %v2643_v50  ;;  %v2763_v29 = vrot.slane %v2761_v46, 1  ;;  %v2764_v42 = vrot.slane %v2466_v56, 2  ;;  %v2900_v0 = vsel %vm1447_vm3, %v2898_v13, %v2899_v5 }
 0x27a   : > { %v2465_v17 = vor.u32 %v2464_v6, %v2460_v36  ;;  %v2760_v52 = vor.u32 %v2759_v57, %v2758_v33  ;;  %v1396_v38 = vsel %vm1270_vm4, %v1390_v35, %v1395_v15  ;;  %v2070_v43 = vrot.slane %v1776_v9, 2  ;;  %v7146_v15 = vld [vmem:[#allocation19_spill] sm:$0xff] }
 0x27b   : > { %v2765_v55 = vor.u32 %v2764_v42, %v2763_v29  ;;  %v1444_v49 = vmax.bf16 %v1396_v38, %v1267_v24  ;;  %v2075_v23 = vrot.slane %v1780_v45, 2  ;;  %v1981_v10 = vmax.bf16 %v1937_v27, %v1869_v21 }
 0x27c   : > { %v2469_v34 = vsel %vm964_vm2, %v2465_v17, %v2468_v48  ;;  %v2191_v22 = vrot.slane %v6069_v63, 2  ;;  %v2192_v54 = vrot.slane %v6072_v61, 2  ;;  %v2071_v47 = vor.u32 %v2070_v43, %v2069_v51  ;;  %v7149_v51 = vld [vmem:[#allocation13_spill] sm:$0xff] }
 0x27d   : > { %v2582_v18 = vmax.bf16 %v2469_v34, %v2355_v44  ;;  %v2766_v3 = vsel %vm1270_vm4, %v2760_v52, %v2765_v55  ;;  %v6210_v35 = vmax.bf16 %v1489_v11, %v1444_v49  ;;  %v2076_v24 = vor.u32 %v2075_v23, %v6098_v19 }
 0x27e   : > { %v2193_v9 = vsel %vm1447_vm3, %v2191_v22, %v2192_v54  ;;  %v2250_v45 = vmax.bf16 %v5973_v62, %v5883_v41  ;;  %v7147_v1 = vrot.slane %v7146_v15, 7 }
 0x27f   : > { %v2694_v63 = vmax.bf16 %v2644_v31, %v2582_v18  ;;  %v1583_v61 = vmax.bf16 %v1568_v14, %v6210_v35  ;;  %3514 = vmatprep.mubr.bf16.mxu0 %v6210_v35  ;;  %v2077_v44 = vsel %vm1270_vm4, %v2071_v47, %v2076_v24 }
 0x280   : > { %v6219_v32 = vsel %vm898_vm0, 0, %v7147_v1  ;;  %v7148_v19 = vmov %v7147_v1  ;;  %3515 = vmatmul.mubr.bf16.gmra.mrb[68].mxu0 %v7149_v51  ;;  %v2265_v27 = vmax.bf16 %v2250_v45, %v6074_v4  ;;  %v2157_v56 = vmax.bf16 %v2077_v44, %v1981_v10 }
 0x281   : > { %v6229_v11 = vsel %vm898_vm0, %v7148_v19, 0  ;;  %v1105_v41 = vshrl.u32 %v6219_v32, 16  ;;  %v1107_v36 = vshll.u32 %v6219_v32, 16  ;;  %v2870_v14 = vmax.bf16 %v2766_v3, %v2694_v63 }
 0x282   : > { %v1111_v28 = vshll.u32 %v6229_v11, 16  ;;  %v1615_v7 = vrot.slane %v1583_v61, 7  ;;  %v1232_v8 = vrot.slane %v6219_v32, 1  ;;  %v2280_v50 = vmax.bf16 %v2265_v27, %v6156_v40 }
 0x283   : > { %v1109_v46 = vrot.slane %v1107_v36, 1  ;;  %v1233_v5 = vrot.slane %v6229_v11, 1  ;;  %v2950_v6 = vmax.bf16 %v2900_v0, %v2870_v14  ;;  %v6246_v57 = vmax.bf16 %v2193_v9, %v2157_v56 }
 0x284   : > { %v1113_v13 = vrot.slane %v1111_v28, 1  ;;  %v6241_v48 = vsel %vm898_vm0, 0, %v1615_v7  ;;  %v6244_v33 = vsel %vm898_vm0, %v1615_v7, 0  ;;  %v1397_v43 = vrot.slane %v1105_v41, 1 }
 0x285   : > { %v7061_v31 = vshrl.u32 %v6241_v48, 16  ;;  %v7060_v29 = vshll.u32 %v6241_v48, 16  ;;  %v7059_v42 = vshll.u32 %v6244_v33, 16  ;;  %3201 = vmatprep.mubr.bf16.mxu1 %v2950_v6  ;;  %v2090_v52 = vshrl.u32 %v6244_v33, 16 }
 0x286   : > { %v2295_v0 = vmax.bf16 %v2280_v50, %v6246_v57  ;;  %v1110_v38 = vor.u32 %v1109_v46, %v1105_v41  ;;  %v1234_v21 = vsel %vm1189_vm1, %v1232_v8, %v1233_v5  ;;  %3202 = vmatmul.mubr.bf16.gmra.mrb[40].mxu1 %v5973_v62  ;;  %v1398_v23 = vrot.slane %v1107_v36, 2 }
 0x287   : > { %v6257_v55 = vrot.slane %v7060_v29, 1  ;;  %v6261_v49 = vrot.slane %v7059_v42, 1  ;;  %v6264_v34 = vrot.slane %v2090_v52, 1  ;;  %v1400_v54 = vshrl.u32 %v6229_v11, 16 }
 0x288   : > { %v2327_v10 = vrot.slane %v2295_v0, 7  ;;  %v1114_v22 = vsel %vm964_vm2, %v1110_v38, %v1113_v13  ;;  %v1399_v3 = vor.u32 %v1398_v23, %v1397_v43  ;;  %v1403_v47 = vrot.slane %v1111_v28, 2 }
 0x289   : > { %v1155_v18 = vmax.bf16 %v1114_v22, %v6219_v32  ;;  %v1490_v24 = vrot.slane %v6219_v32, 2  ;;  %v1402_v15 = vrot.slane %v1400_v54, 1  ;;  %v1491_v1 = vrot.slane %v6229_v11, 2 }
 0x28a   : > { %v2358_v9 = vsel %vm898_vm0, 0, %v2327_v10  ;;  %v2391_v45 = vsel %vm898_vm0, %v2327_v10, 0  ;;  %v1539_v38 = vmax.bf16 %v6030_v37, %v5938_v12  ;;  %v1789_v43 = vor.u32 %v6161_v39, %v1784_v26 }
 0x28b   : > { %v2470_v63 = vshrl.u32 %v2358_v9, 16  ;;  %v2472_v61 = vshll.u32 %v2358_v9, 16  ;;  %v2476_v19 = vshll.u32 %v2391_v45, 16  ;;  %v2645_v41 = vrot.slane %v2358_v9, 1 }
 0x28c   : > { %v2646_v51 = vrot.slane %v2391_v45, 1  ;;  %v2770_v44 = vshrl.u32 %v2391_v45, 16  ;;  %v2901_v27 = vrot.slane %v2358_v9, 2  ;;  %v2902_v36 = vrot.slane %v2391_v45, 2 }
 0x28d   : > { %v2474_v14 = vrot.slane %v2472_v61, 1  ;;  %v2478_v7 = vrot.slane %v2476_v19, 1  ;;  %v2767_v28 = vrot.slane %v2470_v63, 1  ;;  %v2768_v56 = vrot.slane %v2472_v61, 2 }
 0x28e   : > { %v2647_v32 = vsel %vm1189_vm1, %v2645_v41, %v2646_v51  ;;  %v2772_v8 = vrot.slane %v2770_v44, 1  ;;  %v2773_v50 = vrot.slane %v2476_v19, 2  ;;  %v2903_v46 = vsel %vm1447_vm3, %v2901_v27, %v2902_v36 }
 0x28f   : > { %v2475_v13 = vor.u32 %v2474_v14, %v2470_v63  ;;  %v2769_v11 = vor.u32 %v2768_v56, %v2767_v28  ;;  %v1268_v5 = vmax.bf16 %v1234_v21, %v1155_v18  ;;  %v1404_v6 = vor.u32 %v1403_v47, %v1402_v15  ;;  %v7150_v14 = vld [vmem:[#allocation17_spill] sm:$0xff] }
 0x290   : > { %v2774_v52 = vor.u32 %v2773_v50, %v2772_v8  ;;  %v1492_v0 = vsel %vm1447_vm3, %v1490_v24, %v1491_v1  ;;  %v1938_v22 = vrot.slane %v6145_v16, 1  ;;  %v2078_v21 = vrot.slane %v1784_v26, 1  ;;  %v6297_v26 = vpop.f32.mrb[16].mxu0 }
 0x291   : > { %v2479_v23 = vsel %vm964_vm2, %v2475_v13, %v2478_v7  ;;  %v1405_v10 = vsel %vm1270_vm4, %v1399_v3, %v1404_v6  ;;  %v1554_v24 = vmax.bf16 %v1539_v38, %v6115_v53  ;;  %v1793_v12 = vsel %vm964_vm2, %v1789_v43, %v6165_v20  ;;  %v6303_v20 = vpop.f32.mrb[17].mxu0 }
 0x292   : > { %v2583_v54 = vmax.bf16 %v2479_v23, %v2358_v9  ;;  %v2775_v18 = vsel %vm1270_vm4, %v2769_v11, %v2774_v52  ;;  %v1445_v47 = vmax.bf16 %v1405_v10, %v1268_v5  ;;  %v1940_v39 = vsel %vm1189_vm1, %v1938_v22, %v1939_v60  ;;  %v6308_v41 = vpop.f32.mrb[18].mxu0 }
 0x293   : > { %v2079_v3 = vrot.slane %v1786_v58, 2  ;;  %v2084_v45 = vrot.slane %v1790_v30, 2  ;;  %v1569_v1 = vmax.bf16 %v1554_v24, %v6210_v35  ;;  %v1870_v63 = vmax.bf16 %v1793_v12, %v6145_v16  ;;  %v6314_v36 = vpop.f32.mrb[19].mxu0 }
 0x294   : > { %v2695_v9 = vmax.bf16 %v2647_v32, %v2583_v54  ;;  %v6299_v15 = vmax.bf16 %v1492_v0, %v1445_v47  ;;  %v2194_v19 = vrot.slane %v6145_v16, 2  ;;  %v2195_v58 = vrot.slane %v6148_v2, 2  ;;  %v7151_v2 = vld [vmem:[#allocation18_spill] sm:$0xff] }
 0x295   : > { %v2080_v61 = vor.u32 %v2079_v3, %v2078_v21  ;;  %v2085_v60 = vor.u32 %v2084_v45, %v6169_v25  ;;  %v1982_v44 = vmax.bf16 %v1940_v39, %v1870_v63  ;;  %v2251_v27 = vmax.bf16 %v6074_v4, %v5973_v62  ;;  %v6346_v23 = vpop.f32.mrb[20].mxu0 }
 0x296   : > { %v2871_v30 = vmax.bf16 %v2775_v18, %v2695_v9  ;;  %v1584_v51 = vmax.bf16 %v1569_v1, %v6299_v15  ;;  %3522 = vmatprep.mubr.bf16.mxu0 %v6299_v15  ;;  %v2196_v16 = vsel %vm1447_vm3, %v2194_v19, %v2195_v58  ;;  %v850_v7 = vmax.bf16 %v7084_v59, %v7151_v2  ;;  %v6352_v18 = vpop.f32.mrb[21].mxu0 }
 0x297   : > { %3523 = vmatmul.mubr.bf16.gmra.mrb[72].mxu0 %v7150_v14  ;;  %v2086_v25 = vsel %vm1270_vm4, %v2080_v61, %v2085_v60  ;;  %v1540_v28 = vmax.bf16 %v6115_v53, %v6030_v37  ;;  %v2266_v50 = vmax.bf16 %v2251_v27, %v6156_v40  ;;  %v1541_v13 = vmax.bf16 %v6210_v35, %v6115_v53  ;;  %v6358_v3 = vpop.f32.mrb[22].mxu0 }
 0x298   : > { %v2951_v56 = vmax.bf16 %v2903_v46, %v2871_v30  ;;  %v1616_v32 = vrot.slane %v1584_v51, 7  ;;  %v2158_v8 = vmax.bf16 %v2086_v25, %v1982_v44  ;;  %v865_v62 = vmax.bf16 %v7084_v59, %v850_v7  ;;  %v6366_v61 = vpop.f32.mrb[23].mxu0 }
 0x299   : > { %v6330_v5 = vmax.bf16 %v1540_v28, %v6210_v35  ;;  %v2281_v52 = vmax.bf16 %v2266_v50, %v6246_v57  ;;  %v6371_v30 = vmax.bf16 %v1541_v13, %v6299_v15  ;;  %v1799_v14 = vor.u32 %v6257_v55, %v7061_v31 }
 0x29a   : > { %3209 = vmatprep.mubr.bf16.mxu1 %v2951_v56  ;;  %v6333_v6 = vsel %vm898_vm0, 0, %v1616_v32  ;;  %v6336_v37 = vsel %vm898_vm0, %v1616_v32, 0  ;;  %v6338_v46 = vmax.bf16 %v2196_v16, %v2158_v8  ;;  %v897_v58 = vrot.slane %v865_v62, 7 }
 0x29b   : > { %v1804_v0 = vshrl.u32 %v6333_v6, 16  ;;  %v1806_v53 = vshll.u32 %v6333_v6, 16  ;;  %v1810_v38 = vshll.u32 %v6336_v37, 16  ;;  %v1944_v43 = vrot.slane %v6333_v6, 1  ;;  %3210 = vmatmul.mubr.bf16.gmra.mrb[44].mxu1 %v6074_v4 }
 0x29c   : > { %v1945_v10 = vrot.slane %v6336_v37, 1  ;;  %v2099_v22 = vshrl.u32 %v6336_v37, 16  ;;  %v2296_v63 = vmax.bf16 %v2281_v52, %v6338_v46  ;;  %v6382_v16 = vsel %vm898_vm0, 0, %v897_v58 }
 0x29d   : > { %v1808_v47 = vrot.slane %v1806_v53, 1  ;;  %v1812_v24 = vrot.slane %v1810_v38, 1  ;;  %v6354_v12 = vrot.slane %v1804_v0, 1  ;;  %v6356_v39 = vrot.slane %v1806_v53, 2  ;;  %v6390_v52 = vpop.f32.mrb[24].mxu0 }
 0x29e   : > { %v1946_v45 = vsel %vm1189_vm1, %v1944_v43, %v1945_v10  ;;  %v6361_v9 = vrot.slane %v2099_v22, 1  ;;  %v6363_v1 = vrot.slane %v1810_v38, 2  ;;  %v2328_v44 = vrot.slane %v2296_v63, 7  ;;  %v6394_v10 = vpop.f32.mrb[25].mxu0 }
 0x29f   : > { %v1809_v60 = vor.u32 %v1808_v47, %v1804_v0  ;;  %v963_v2 = vsel %vm898_vm0, %v897_v58, 0  ;;  %v1941_v7 = vrot.slane %v6241_v48, 1  ;;  %v1115_v8 = vshrl.u32 %v6382_v16, 16 }
 0x2a0   : > { %v2361_v56 = vsel %vm898_vm0, 0, %v2328_v44  ;;  %v2392_v32 = vsel %vm898_vm0, %v2328_v44, 0  ;;  %v1117_v21 = vshll.u32 %v6382_v16, 16  ;;  %v1121_v54 = vshll.u32 %v963_v2, 16 }
 0x2a1   : > { %v1813_v25 = vsel %vm964_vm2, %v1809_v60, %v1812_v24  ;;  %v2480_v50 = vshrl.u32 %v2361_v56, 16  ;;  %v2482_v62 = vshll.u32 %v2361_v56, 16  ;;  %v2486_v55 = vshll.u32 %v2392_v32, 16  ;;  %v6396_v60 = vpop.f32.mrb[26].mxu0 }
 0x2a2   : > { %v1872_v28 = vmax.bf16 %v1813_v25, %v6333_v6  ;;  %v2648_v13 = vrot.slane %v2361_v56, 1  ;;  %v2649_v53 = vrot.slane %v2392_v32, 1  ;;  %v2779_v38 = vshrl.u32 %v2392_v32, 16  ;;  %v6399_v11 = vpop.f32.mrb[27].mxu0 }
 0x2a3   : > { %v2904_v43 = vrot.slane %v2361_v56, 2  ;;  %v2484_v22 = vrot.slane %v2482_v62, 1  ;;  %v2488_v47 = vrot.slane %v2486_v55, 1  ;;  %v2776_v24 = vrot.slane %v2480_v50, 1 }
 0x2a4   : > { %v6392_v0 = vmax.bf16 %v1946_v45, %v1872_v28  ;;  %v2777_v63 = vrot.slane %v2482_v62, 2  ;;  %v2650_v58 = vsel %vm1189_vm1, %v2648_v13, %v2649_v53  ;;  %v2781_v44 = vrot.slane %v2779_v38, 1 }
 0x2a5   : > { %v2782_v25 = vrot.slane %v2486_v55, 2  ;;  %v2905_v27 = vrot.slane %v2392_v32, 2  ;;  %v2485_v45 = vor.u32 %v2484_v22, %v2480_v50  ;;  %v1235_v42 = vrot.slane %v6382_v16, 1 }
 0x2a6   : > { %v2778_v28 = vor.u32 %v2777_v63, %v2776_v24  ;;  %v1236_v62 = vrot.slane %v963_v2, 1  ;;  %v1119_v31 = vrot.slane %v1117_v21, 1  ;;  %v1123_v13 = vrot.slane %v1121_v54, 1 }
 0x2a7   : > { %v2783_v19 = vor.u32 %v2782_v25, %v2781_v44  ;;  %v2906_v51 = vsel %vm1447_vm3, %v2904_v43, %v2905_v27  ;;  %v2489_v29 = vsel %vm964_vm2, %v2485_v45, %v2488_v47  ;;  %v1406_v53 = vrot.slane %v1115_v8, 1  ;;  %v6408_v27 = vpop.f32.mrb[28].mxu0 }
 0x2a8   : > { %v2584_v55 = vmax.bf16 %v2489_v29, %v2361_v56  ;;  %v1237_v50 = vsel %vm1189_vm1, %v1235_v42, %v1236_v62  ;;  %v1407_v38 = vrot.slane %v1117_v21, 2  ;;  %v1120_v22 = vor.u32 %v1119_v31, %v1115_v8  ;;  %v6412_v45 = vpop.f32.mrb[29].mxu0 }
 0x2a9   : > { %v2784_v32 = vsel %vm1270_vm4, %v2778_v28, %v2783_v19  ;;  %v1409_v24 = vshrl.u32 %v963_v2, 16  ;;  %v1412_v63 = vrot.slane %v1121_v54, 2  ;;  %v1493_v44 = vrot.slane %v6382_v16, 2  ;;  %v6419_v54 = vpop.f32.mrb[30].mxu0 }
 0x2aa   : > { %v2696_v43 = vmax.bf16 %v2650_v58, %v2584_v55  ;;  %v1408_v25 = vor.u32 %v1407_v38, %v1406_v53  ;;  %v1494_v17 = vrot.slane %v963_v2, 2  ;;  %v1803_v47 = vsel %vm964_vm2, %v1799_v14, %v6261_v49  ;;  %v6425_v58 = vpop.f32.mrb[31].mxu0 }
 0x2ab   : > { %v1124_v29 = vsel %vm964_vm2, %v1120_v22, %v1123_v13  ;;  %v1411_v19 = vrot.slane %v1409_v24, 1  ;;  %v1871_v42 = vmax.bf16 %v1803_v47, %v6241_v48  ;;  %v7152_v31 = vrot.slane %v6244_v33, 1 }
 0x2ac   : > { %v2872_v56 = vmax.bf16 %v2784_v32, %v2696_v43  ;;  %v1156_v8 = vmax.bf16 %v1124_v29, %v6382_v16  ;;  %v1495_v2 = vsel %vm1447_vm3, %v1493_v44, %v1494_v17  ;;  %v7153_v49 = vshrl.u32 %v6241_v48, 16 }
 0x2ad   : > { %v1943_v21 = vsel %vm1189_vm1, %v1941_v7, %v7152_v31  ;;  %v1413_v28 = vor.u32 %v1412_v63, %v1411_v19  ;;  %v7154_v13 = vshll.u32 %v6241_v48, 16  ;;  %v7155_v55 = vshll.u32 %v6244_v33, 16 }
 0x2ae   : > { %v2087_v14 = vrot.slane %v7153_v49, 1  ;;  %v1983_v62 = vmax.bf16 %v1943_v21, %v1871_v42  ;;  %v2952_v38 = vmax.bf16 %v2906_v51, %v2872_v56  ;;  %v1269_v22 = vmax.bf16 %v1237_v50, %v1156_v8 }
 0x2af   : > { %v2088_v53 = vrot.slane %v7154_v13, 2  ;;  %v2093_v7 = vrot.slane %v7155_v55, 2  ;;  %v2197_v32 = vrot.slane %v6241_v48, 2  ;;  %v2198_v16 = vrot.slane %v6244_v33, 2 }
 0x2b0   : > { %v1414_v17 = vsel %vm1270_vm4, %v1408_v25, %v1413_v28  ;;  %v2252_v63 = vmax.bf16 %v6156_v40, %v6074_v4  ;;  %3217 = vmatprep.mubr.bf16.mxu1 %v2952_v38  ;;  %v7156_v51 = vor.u32 %v6363_v1, %v6361_v9  ;;  %v7157_v48 = vor.u32 %v6356_v39, %v6354_v12  ;;  %v6456_v12 = vpop.f32.mrb[32].mxu0 }
 0x2b1   : > { %v2089_v24 = vor.u32 %v2088_v53, %v2087_v14  ;;  %v2094_v44 = vor.u32 %v2093_v7, %v6264_v34  ;;  %v1446_v43 = vmax.bf16 %v1414_v17, %v1269_v22  ;;  %v2199_v47 = vsel %vm1447_vm3, %v2197_v32, %v2198_v16  ;;  %3218 = vmatmul.mubr.bf16.gmra.mrb[48].mxu1 %v6156_v40  ;;  %v6464_v42 = vpop.f32.mrb[33].mxu0 }
 0x2b2   : > { %v2104_v33 = vsel %vm1270_vm4, %v7157_v48, %v7156_v51  ;;  %v7158_v50 = vrot.slane %v6336_v37, 2  ;;  %v7159_v25 = vrot.slane %v6333_v6, 2  ;;  %v2267_v29 = vmax.bf16 %v2252_v63, %v6246_v57  ;;  %v6476_v56 = vpop.f32.mrb[34].mxu0 }
 0x2b3   : > { %v2095_v4 = vsel %vm1270_vm4, %v2089_v24, %v2094_v44  ;;  %v2160_v19 = vmax.bf16 %v2104_v33, %v6392_v0  ;;  %v2253_v9 = vmax.bf16 %v6246_v57, %v6156_v40  ;;  %v1527_v39 = vmax.bf16 %v1495_v2, %v1446_v43  ;;  %v6487_v28 = vpop.f32.mrb[35].mxu0 }
 0x2b4   : > { %v2202_v34 = vsel %vm1447_vm3, %v7159_v25, %v7158_v50  ;;  %v2159_v1 = vmax.bf16 %v2095_v4, %v1983_v62  ;;  %v2254_v6 = vmax.bf16 %v6338_v46, %v6246_v57  ;;  %v6462_v37 = vadd.f32 %v6303_v20, %v6297_v26  ;;  %v7164_v62 = vld [vmem:[#allocation16_spill] sm:$0xff] }
 0x2b5   : > { %v2282_v31 = vmax.bf16 %v2267_v29, %v6338_v46  ;;  %v6467_v21 = vmax.bf16 %v2202_v34, %v2160_v19  ;;  %v6470_v0 = vmax.bf16 %v2253_v9, %v6338_v46  ;;  %v6474_v40 = vadd.f32 %v6314_v36, %v6308_v41  ;;  %3530 = vmatprep.mubr.bf16.mxu0 %v1527_v39  ;;  %v6529_v22 = vpop.f32.mrb[36].mxu0 }
 0x2b6   : > { %7160 = vst [vmem:[#allocation15_spill] sm:$0xff] %v6462_v37  ;;  %v7162_v8 = vmax.bf16 %v6299_v15, %v6210_v35  ;;  %v1571_v20 = vmax.bf16 %v6371_v30, %v1527_v39  ;;  %v7163_v2 = vmax.bf16 %v6330_v5, %v6299_v15  ;;  %v6485_v14 = vmax.bf16 %v2199_v47, %v2159_v1  ;;  %v6538_v44 = vpop.f32.mrb[37].mxu0 }
 0x2b7   : > { %7161 = vst [vmem:[#allocation24_spill] sm:$0xff] %v6474_v40  ;;  %3531 = vmatmul.mubr.bf16.gmra.mrb[76].mxu0 %v7164_v62  ;;  %v6492_v41 = vadd.f32 %v6352_v18, %v6346_v23  ;;  %v6496_v35 = vadd.f32 %v6366_v61, %v6358_v3  ;;  %v6500_v36 = vadd.f32 %v6394_v10, %v6390_v52  ;;  %v6542_v48 = vpop.f32.mrb[38].mxu0 }
 0x2b8   : > { %v1557_v26 = vmax.bf16 %v7162_v8, %v1527_v39  ;;  %v1585_v49 = vmax.bf16 %v7163_v2, %v1527_v39  ;;  %v6504_v15 = vadd.f32 %v6399_v11, %v6396_v60  ;;  %v1586_v30 = vmax.bf16 %v7084_v59, %v1571_v20  ;;  %v6553_v4 = vpop.f32.mrb[39].mxu0 }
 0x2b9   : > { %7165 = vst [vmem:[#allocation27_spill] sm:$0xff] %v6492_v41  ;;  %7166 = vst [vmem:[#allocation12_spill] sm:$0xff] %v6496_v35  ;;  %v6509_v23 = vmax.bf16 %v2282_v31, %v6485_v14  ;;  %v6514_v3 = vmax.bf16 %v2254_v6, %v6485_v14 }
 0x2ba   : > { %7167 = vst [vmem:[#allocation20_spill] sm:$0xff] %v6500_v36  ;;  %7168 = vst [vmem:[#allocation22_spill] sm:$0xff] %v6504_v15  ;;  %v1572_v5 = vmax.bf16 %v7084_v59, %v1557_v26  ;;  %v1617_v13 = vrot.slane %v1585_v49, 7  ;;  %v1618_v52 = vrot.slane %v1586_v30, 7 }
 0x2bc   : > { %v1587_v11 = vmax.bf16 %v7084_v59, %v1572_v5  ;;  %v6520_v10 = vsel %vm898_vm0, 0, %v1617_v13  ;;  %v6523_v60 = vsel %vm898_vm0, %v1617_v13, 0  ;;  %v6532_v16 = vsel %vm898_vm0, 0, %v1618_v52 }
 0x2bd   : > { %v1814_v53 = vshrl.u32 %v6520_v10, 16  ;;  %v1816_v55 = vshll.u32 %v6520_v10, 16  ;;  %v1820_v7 = vshll.u32 %v6523_v60, 16  ;;  %v1947_v38 = vrot.slane %v6520_v10, 1  ;;  %v6566_v61 = vpop.f32.mrb[40].mxu0 }
 0x2be   : > { %v1619_v32 = vrot.slane %v1587_v11, 7  ;;  %v6535_v17 = vsel %vm898_vm0, %v1618_v52, 0  ;;  %v1948_v24 = vrot.slane %v6523_v60, 1  ;;  %v1824_v47 = vshrl.u32 %v6532_v16, 16 }
 0x2bf   : > { %v1818_v63 = vrot.slane %v1816_v55, 1  ;;  %v1822_v43 = vrot.slane %v1820_v7, 1  ;;  %v1826_v51 = vshll.u32 %v6532_v16, 16  ;;  %v1830_v25 = vshll.u32 %v6535_v17, 16 }
 0x2c0   : > { %v6545_v33 = vsel %vm898_vm0, 0, %v1619_v32  ;;  %v6548_v50 = vsel %vm898_vm0, %v1619_v32, 0  ;;  %v1950_v31 = vrot.slane %v6532_v16, 1  ;;  %v1951_v8 = vrot.slane %v6535_v17, 1 }
 0x2c1   : > { %v1819_v29 = vor.u32 %v1818_v63, %v1814_v53  ;;  %v1828_v19 = vrot.slane %v1826_v51, 1  ;;  %v1834_v9 = vshrl.u32 %v6545_v33, 16  ;;  %v1836_v39 = vshll.u32 %v6545_v33, 16 }
 0x2c2   : > { %v1832_v1 = vrot.slane %v1830_v25, 1  ;;  %v1840_v6 = vshll.u32 %v6548_v50, 16  ;;  %v1949_v49 = vsel %vm1189_vm1, %v1947_v38, %v1948_v24  ;;  %v1952_v30 = vsel %vm1189_vm1, %v1950_v31, %v1951_v8 }
 0x2c3   : > { %v1823_v26 = vsel %vm964_vm2, %v1819_v29, %v1822_v43  ;;  %v1829_v20 = vor.u32 %v1828_v19, %v1824_v47  ;;  %v1838_v2 = vrot.slane %v1836_v39, 1  ;;  %v2105_v32 = vrot.slane %v1814_v53, 1  ;;  %v6571_v19 = vpop.f32.mrb[41].mxu0 }
 0x2c4   : > { %v1842_v62 = vrot.slane %v1840_v6, 1  ;;  %v1873_v5 = vmax.bf16 %v1823_v26, %v6520_v10  ;;  %v2106_v63 = vrot.slane %v1816_v55, 2  ;;  %v1954_v29 = vrot.slane %v6548_v50, 1 }
 0x2c5   : > { %v1833_v11 = vsel %vm964_vm2, %v1829_v20, %v1832_v1  ;;  %v1839_v52 = vor.u32 %v1838_v2, %v1834_v9  ;;  %v2108_v38 = vshrl.u32 %v6523_v60, 16  ;;  %v2111_v24 = vrot.slane %v1820_v7, 2  ;;  %v6576_v20 = vpop.f32.mrb[42].mxu0 }
 0x2c6   : > { %v1874_v43 = vmax.bf16 %v1833_v11, %v6532_v16  ;;  %v1985_v8 = vmax.bf16 %v1949_v49, %v1873_v5  ;;  %v2114_v26 = vrot.slane %v1824_v47, 1  ;;  %v2115_v1 = vrot.slane %v1826_v51, 2  ;;  %v6581_v13 = vpop.f32.mrb[43].mxu0 }
 0x2c7   : > { %v6574_v31 = vsel %vm964_vm2, %v1839_v52, %v1842_v62  ;;  %v2107_v55 = vor.u32 %v2106_v63, %v2105_v32  ;;  %v2110_v2 = vrot.slane %v2108_v38, 1  ;;  %v2117_v11 = vshrl.u32 %v6535_v17, 16 }
 0x2c8   : > { %v6583_v7 = vmax.bf16 %v1952_v30, %v1874_v43  ;;  %v2116_v34 = vor.u32 %v2115_v1, %v2114_v26  ;;  %v2120_v18 = vrot.slane %v1830_v25, 2  ;;  %v6585_v62 = vrot.slane %v1834_v9, 1  ;;  %v6602_v1 = vpop.f32.mrb[44].mxu0 }
 0x2c9   : > { %v2112_v49 = vor.u32 %v2111_v24, %v2110_v2  ;;  %v2119_v47 = vrot.slane %v2117_v11, 1  ;;  %v2126_v51 = vshrl.u32 %v6548_v50, 16  ;;  %v6588_v5 = vrot.slane %v1840_v6, 2  ;;  %7169 = vst [vmem:[#allocation29_spill] sm:$0xff] %v6602_v1 }
 0x2ca   : > { %v2203_v52 = vrot.slane %v6520_v10, 2  ;;  %v2204_v32 = vrot.slane %v6523_v60, 2  ;;  %v2206_v63 = vrot.slane %v6532_v16, 2  ;;  %v2207_v38 = vrot.slane %v6535_v17, 2 }
 0x2cb   : > { %v2113_v30 = vsel %vm1270_vm4, %v2107_v55, %v2112_v49  ;;  %v2121_v43 = vor.u32 %v2120_v18, %v2119_v47  ;;  %v6595_v25 = vrot.slane %v1836_v39, 2  ;;  %v6597_v9 = vrot.slane %v2126_v51, 1 }
 0x2cc   : > { %v2161_v24 = vmax.bf16 %v2113_v30, %v1985_v8  ;;  %v2205_v26 = vsel %vm1447_vm3, %v2203_v52, %v2204_v32  ;;  %v2208_v6 = vsel %vm1447_vm3, %v2206_v63, %v2207_v38  ;;  %v2329_v17 = vrot.slane %v6509_v23, 7  ;;  %v6611_v8 = vpop.f32.mrb[45].mxu0 }
 0x2cd   : > { %v2122_v60 = vsel %vm1270_vm4, %v2116_v34, %v2121_v43  ;;  %v7170_v18 = vmax.bf16 %v6470_v0, %v6485_v14  ;;  %7171 = vst [vmem:[#allocation28_spill] sm:$0xff] %v6611_v8  ;;  %v2284_v11 = vmax.bf16 %v6514_v3, %v6467_v21  ;;  %v7172_v34 = vmax.bf16 %v6485_v14, %v6338_v46  ;;  %v6622_v49 = vpop.f32.mrb[46].mxu0 }
 0x2ce   : > { %v2162_v2 = vmax.bf16 %v2122_v60, %v6583_v7  ;;  %7173 = vst [vmem:[#allocation14_spill] sm:$0xff] %v6622_v49  ;;  %v6624_v47 = vmax.bf16 %v2205_v26, %v2161_v24  ;;  %v2364_v0 = vsel %vm898_vm0, 0, %v2329_v17  ;;  %v2393_v51 = vsel %vm898_vm0, %v2329_v17, 0  ;;  %v6628_v32 = vpop.f32.mrb[47].mxu0 }
 0x2cf   : > { %v2298_v39 = vmax.bf16 %v7170_v18, %v6467_v21  ;;  %v2270_v23 = vmax.bf16 %v7172_v34, %v6467_v21  ;;  %7174 = vst [vmem:[#allocation21_spill] sm:$0xff] %v6628_v32  ;;  %v2490_v7 = vshrl.u32 %v2364_v0, 16  ;;  %v2492_v63 = vshll.u32 %v2364_v0, 16 }
 0x2d0   : > { %v2496_v38 = vshll.u32 %v2393_v51, 16  ;;  %v2651_v3 = vrot.slane %v2364_v0, 1  ;;  %v2652_v30 = vrot.slane %v2393_v51, 1  ;;  %v2788_v43 = vshrl.u32 %v2393_v51, 16 }
 0x2d1   : > { %v2330_v52 = vrot.slane %v2298_v39, 7  ;;  %v2907_v60 = vrot.slane %v2364_v0, 2  ;;  %v7175_v18 = vrot.slane %v6545_v33, 1  ;;  %v2494_v24 = vrot.slane %v2492_v63, 1 }
 0x2d2   : > { %v2785_v26 = vrot.slane %v2490_v7, 1  ;;  %v2786_v55 = vrot.slane %v2492_v63, 2  ;;  %v2908_v10 = vrot.slane %v2393_v51, 2  ;;  %v2498_v16 = vrot.slane %v2496_v38, 1 }
 0x2d3   : > { %v1955_v34 = vsel %vm1189_vm1, %v7175_v18, %v1954_v29  ;;  %v2653_v17 = vsel %vm1189_vm1, %v2651_v3, %v2652_v30  ;;  %v2790_v39 = vrot.slane %v2788_v43, 1  ;;  %v2791_v53 = vrot.slane %v2496_v38, 2 }
 0x2d4   : > { %v2495_v15 = vor.u32 %v2494_v24, %v2490_v7  ;;  %v2787_v36 = vor.u32 %v2786_v55, %v2785_v26  ;;  %v2367_v35 = vsel %vm898_vm0, 0, %v2330_v52  ;;  %v2394_v41 = vsel %vm898_vm0, %v2330_v52, 0 }
 0x2d5   : > { %v2792_v40 = vor.u32 %v2791_v53, %v2790_v39  ;;  %v2500_v37 = vshrl.u32 %v2367_v35, 16  ;;  %v2502_v32 = vshll.u32 %v2367_v35, 16  ;;  %v2506_v49 = vshll.u32 %v2394_v41, 16 }
 0x2d6   : > { %v2499_v29 = vsel %vm964_vm2, %v2495_v15, %v2498_v16  ;;  %v2909_v63 = vsel %vm1447_vm3, %v2907_v60, %v2908_v10  ;;  %v2654_v51 = vrot.slane %v2367_v35, 1  ;;  %v2797_v18 = vshrl.u32 %v2394_v41, 16 }
 0x2d7   : > { %v2585_v8 = vmax.bf16 %v2499_v29, %v2364_v0  ;;  %v2793_v3 = vsel %vm1270_vm4, %v2787_v36, %v2792_v40  ;;  %v2504_v38 = vrot.slane %v2502_v32, 1  ;;  %v2655_v7 = vrot.slane %v2394_v41, 1 }
 0x2d8   : > { %v2508_v55 = vrot.slane %v2506_v49, 1  ;;  %v2794_v30 = vrot.slane %v2500_v37, 1  ;;  %v2795_v43 = vrot.slane %v2502_v32, 2  ;;  %v2799_v24 = vrot.slane %v2797_v18, 1 }
 0x2d9   : > { %v2697_v52 = vmax.bf16 %v2653_v17, %v2585_v8  ;;  %v2505_v53 = vor.u32 %v2504_v38, %v2500_v37  ;;  %v2800_v26 = vrot.slane %v2506_v49, 2  ;;  %v2910_v39 = vrot.slane %v2367_v35, 2 }
 0x2da   : > { %v2796_v1 = vor.u32 %v2795_v43, %v2794_v30  ;;  %v2911_v59 = vrot.slane %v2394_v41, 2  ;;  %v2299_v15 = vmax.bf16 %v2284_v11, %v6624_v47  ;;  %v6640_v10 = vmax.bf16 %v2208_v6, %v2162_v2 }
 0x2db   : > { %v2873_v16 = vmax.bf16 %v2793_v3, %v2697_v52  ;;  %v2509_v0 = vsel %vm964_vm2, %v2505_v53, %v2508_v55  ;;  %v2801_v40 = vor.u32 %v2800_v26, %v2799_v24  ;;  %v2285_v36 = vmax.bf16 %v2270_v23, %v6624_v47 }
 0x2dc   : > { %v2586_v60 = vmax.bf16 %v2509_v0, %v2367_v35  ;;  %v2656_v32 = vsel %vm1189_vm1, %v2654_v51, %v2655_v7  ;;  %v2912_v8 = vsel %vm1447_vm3, %v2910_v39, %v2911_v59  ;;  %v2331_v37 = vrot.slane %v2299_v15, 7 }
 0x2dd   : > { %v2953_v49 = vmax.bf16 %v2909_v63, %v2873_v16  ;;  %v2802_v17 = vsel %vm1270_vm4, %v2796_v1, %v2801_v40  ;;  %v2300_v41 = vmax.bf16 %v2285_v36, %v6640_v10  ;;  %v7176_v6 = vmax.bf16 %v6574_v31, %v6545_v33 }
 0x2de   : > { %v2698_v11 = vmax.bf16 %v2656_v32, %v2586_v60  ;;  %v2370_v29 = vsel %vm898_vm0, 0, %v2331_v37  ;;  %v2395_v35 = vsel %vm898_vm0, %v2331_v37, 0  ;;  %v2125_v23 = vor.u32 %v6595_v25, %v6585_v62  ;;  %v6663_v25 = vpop.f32.mrb[16].mxu1 }
 0x2df   : > { %v6651_v2 = vmax.bf16 %v1955_v34, %v7176_v6  ;;  %3225 = vmatprep.mubr.bf16.mxu1 %v2953_v49  ;;  %v2510_v59 = vshrl.u32 %v2370_v29, 16  ;;  %v2512_v63 = vshll.u32 %v2370_v29, 16  ;;  %v2516_v51 = vshll.u32 %v2395_v35, 16 }
 0x2e0   : > { %v2657_v1 = vrot.slane %v2370_v29, 1  ;;  %3226 = vmatmul.mubr.bf16.gmra.mrb[52].mxu1 %v6246_v57  ;;  %v2874_v18 = vmax.bf16 %v2802_v17, %v2698_v11  ;;  %v2658_v3 = vrot.slane %v2395_v35, 1  ;;  %v2806_v31 = vshrl.u32 %v2395_v35, 16  ;;  %v6665_v57 = vpop.f32.mrb[17].mxu1 }
 0x2e1   : > { %v7177_v34 = vrot.slane %v6548_v50, 2  ;;  %v7178_v38 = vrot.slane %v6545_v33, 2  ;;  %v2514_v55 = vrot.slane %v2512_v63, 1  ;;  %v2803_v30 = vrot.slane %v2510_v59, 1  ;;  %v6668_v33 = vpop.f32.mrb[18].mxu1 }
 0x2e2   : > { %v2804_v43 = vrot.slane %v2512_v63, 2  ;;  %v2913_v62 = vrot.slane %v2370_v29, 2  ;;  %v2954_v24 = vmax.bf16 %v2912_v8, %v2874_v18  ;;  %v2518_v52 = vrot.slane %v2516_v51, 1  ;;  %v6676_v8 = vpop.f32.mrb[19].mxu1 }
 0x2e3   : > { %v2211_v7 = vsel %vm1447_vm3, %v7178_v38, %v7177_v34  ;;  %v2808_v53 = vrot.slane %v2806_v31, 1  ;;  %v2809_v26 = vrot.slane %v2516_v51, 2  ;;  %v2515_v39 = vor.u32 %v2514_v55, %v2510_v59 }
 0x2e4   : > { %v2659_v15 = vsel %vm1189_vm1, %v2657_v1, %v2658_v3  ;;  %v2914_v50 = vrot.slane %v2395_v35, 2  ;;  %v2332_v16 = vrot.slane %v2300_v41, 7  ;;  %3233 = vmatprep.mubr.bf16.mxu1 %v2954_v24  ;;  %v2805_v0 = vor.u32 %v2804_v43, %v2803_v30 }
 0x2e5   : > { %v2810_v40 = vor.u32 %v2809_v26, %v2808_v53  ;;  %v7179_v36 = vmax.bf16 %v6467_v21, %v6485_v14  ;;  %v2257_v32 = vmax.bf16 %v6624_v47, %v6467_v21  ;;  %v2519_v37 = vsel %vm964_vm2, %v2515_v39, %v2518_v52 }
 0x2e6   : > { %v2373_v49 = vsel %vm898_vm0, 0, %v2332_v16  ;;  %v2396_v17 = vsel %vm898_vm0, %v2332_v16, 0  ;;  %v7180_v41 = vor.u32 %v6588_v5, %v6597_v9  ;;  %v2587_v11 = vmax.bf16 %v2519_v37, %v2370_v29 }
 0x2e7   : > { %v2271_v60 = vmax.bf16 %v7179_v36, %v6624_v47  ;;  %v2915_v35 = vsel %vm1447_vm3, %v2913_v62, %v2914_v50  ;;  %v2520_v59 = vshrl.u32 %v2373_v49, 16  ;;  %v2522_v63 = vshll.u32 %v2373_v49, 16 }
 0x2e8   : > { %v2131_v6 = vsel %vm1270_vm4, %v2125_v23, %v7180_v41  ;;  %v2526_v51 = vshll.u32 %v2396_v17, 16  ;;  %v2660_v1 = vrot.slane %v2373_v49, 1  ;;  %v2661_v18 = vrot.slane %v2396_v17, 1  ;;  %3234 = vmatmul.mubr.bf16.gmra.mrb[56].mxu1 %v6338_v46 }
 0x2e9   : > { %v2815_v3 = vshrl.u32 %v2396_v17, 16  ;;  %v2699_v31 = vmax.bf16 %v2659_v15, %v2587_v11  ;;  %v2524_v34 = vrot.slane %v2522_v63, 1  ;;  %v2812_v38 = vrot.slane %v2520_v59, 1  ;;  %v6700_v11 = vpop.f32.mrb[20].mxu1 }
 0x2ea   : > { %v2813_v55 = vrot.slane %v2522_v63, 2  ;;  %v2811_v30 = vsel %vm1270_vm4, %v2805_v0, %v2810_v40  ;;  %v2528_v5 = vrot.slane %v2526_v51, 1  ;;  %v2818_v23 = vrot.slane %v2526_v51, 2  ;;  %v6695_v0 = vpop.f32.mrb[48].mxu0 }
 0x2eb   : > { %v2817_v9 = vrot.slane %v2815_v3, 1  ;;  %v2875_v29 = vmax.bf16 %v2811_v30, %v2699_v31  ;;  %v2525_v43 = vor.u32 %v2524_v34, %v2520_v59  ;;  %v2662_v62 = vsel %vm1189_vm1, %v2660_v1, %v2661_v18  ;;  %v7183_v18 = vld [vmem:[#allocation28_spill] sm:$0xff] }
 0x2ec   : > { %v2814_v24 = vor.u32 %v2813_v55, %v2812_v38  ;;  %v2916_v53 = vrot.slane %v2373_v49, 2  ;;  %v2163_v26 = vmax.bf16 %v2131_v6, %v6651_v2  ;;  %v2286_v46 = vmax.bf16 %v2271_v60, %v6640_v10  ;;  %v6702_v2 = vpop.f32.mrb[49].mxu0 }
 0x2ed   : > { %v2819_v52 = vor.u32 %v2818_v23, %v2817_v9  ;;  %v2955_v39 = vmax.bf16 %v2915_v35, %v2875_v29  ;;  %v2529_v15 = vsel %vm964_vm2, %v2525_v43, %v2528_v5  ;;  %v2272_v50 = vmax.bf16 %v2257_v32, %v6640_v10  ;;  %v6722_v6 = vpop.f32.mrb[50].mxu0 }
 0x2ee   : > { %v2258_v16 = vmax.bf16 %v6640_v10, %v6624_v47  ;;  %v2588_v40 = vmax.bf16 %v2529_v15, %v2373_v49  ;;  %v2917_v37 = vrot.slane %v2396_v17, 2  ;;  %v6698_v41 = vmax.bf16 %v2211_v7, %v2163_v26  ;;  %v6720_v17 = vpop.f32.mrb[21].mxu1  ;;  %v6729_v59 = vpop.f32.mrb[51].mxu0 }
 0x2ef   : > { %v2820_v36 = vsel %vm1270_vm4, %v2814_v24, %v2819_v52  ;;  %3241 = vmatprep.mubr.bf16.mxu1 %v2955_v39  ;;  %v6706_v60 = vadd.f32 %v6412_v45, %v6408_v27  ;;  %v6710_v32 = vadd.f32 %v6425_v58, %v6419_v54  ;;  %v6714_v49 = vadd.f32 %v6464_v42, %v6456_v12  ;;  %v6727_v58 = vpop.f32.mrb[22].mxu1 }
 0x2f0   : > { %v6718_v7 = vadd.f32 %v6487_v28, %v6476_v56  ;;  %v2700_v35 = vmax.bf16 %v2662_v62, %v2588_v40  ;;  %v2301_v27 = vmax.bf16 %v2286_v46, %v6698_v41  ;;  %v2287_v45 = vmax.bf16 %v2272_v50, %v6698_v41  ;;  %3242 = vmatmul.mubr.bf16.gmra.mrb[60].mxu1 %v6485_v14  ;;  %v6748_v63 = vpop.f32.mrb[23].mxu1 }
 0x2f1   : > { %v2273_v54 = vmax.bf16 %v2258_v16, %v6698_v41  ;;  %v6734_v12 = vadd.f32 %v6538_v44, %v6529_v22  ;;  %v6738_v42 = vadd.f32 %v6553_v4, %v6542_v48  ;;  %v6742_v56 = vadd.f32 %v6571_v19, %v6566_v61  ;;  %v7182_v4 = vld [vmem:[#allocation29_spill] sm:$0xff] }
 0x2f2   : > { %v6746_v28 = vadd.f32 %v6581_v13, %v6576_v20  ;;  %v2876_v51 = vmax.bf16 %v2820_v36, %v2700_v35  ;;  %v2918_v14 = vsel %vm1447_vm3, %v2916_v53, %v2917_v37  ;;  %v2333_v1 = vrot.slane %v2301_v27, 7  ;;  %v7184_v13 = vld [vmem:[#allocation14_spill] sm:$0xff]  ;;  %v7185_v19 = vld [vmem:[#allocation21_spill] sm:$0xff] }
 0x2f3   : > { %v7181_v22 = vmov 0   ;;  %v4196_v48 = vadd.f32 %v6665_v57, %v6663_v25  ;;  %v6756_v3 = vadd.f32 %v7183_v18, %v7182_v4  ;;  %v4199_v61 = vadd.f32 %v6676_v8, %v6668_v33 }
 0x2f4   : > { %v2302_v44 = vmax.bf16 %v7181_v22, %v2287_v45  ;;  %v6762_v20 = vadd.f32 %v7185_v19, %v7184_v13  ;;  %v2956_v31 = vmax.bf16 %v2918_v14, %v2876_v51  ;;  %v2376_v34 = vsel %vm898_vm0, 0, %v2333_v1 }
 0x2f5   : > { %v2397_v38 = vsel %vm898_vm0, %v2333_v1, 0  ;;  %v2530_v55 = vshrl.u32 %v2376_v34, 16  ;;  %v2532_v30 = vshll.u32 %v2376_v34, 16  ;;  %v2663_v57 = vrot.slane %v2376_v34, 1 }
 0x2f6   : > { %v2536_v5 = vshll.u32 %v2397_v38, 16  ;;  %v2334_v25 = vrot.slane %v2302_v44, 7  ;;  %3249 = vmatprep.mubr.bf16.mxu1 %v2956_v31  ;;  %v2664_v9 = vrot.slane %v2397_v38, 1  ;;  %v2824_v23 = vshrl.u32 %v2397_v38, 16 }
 0x2f7   : > { %v2288_v29 = vmax.bf16 %v7181_v22, %v2273_v54  ;;  %v2534_v33 = vrot.slane %v2532_v30, 1  ;;  %v2821_v8 = vrot.slane %v2530_v55, 1  ;;  %v2822_v43 = vrot.slane %v2532_v30, 2 }
 0x2f8   : > { %v2919_v62 = vrot.slane %v2376_v34, 2  ;;  %v2538_v24 = vrot.slane %v2536_v5, 1  ;;  %v2826_v52 = vrot.slane %v2824_v23, 1  ;;  %v2827_v53 = vrot.slane %v2536_v5, 2  ;;  %3250 = vmatmul.mubr.bf16.gmra.mrb[64].mxu1 %v6467_v21 }
 0x2f9   : > { %v2920_v26 = vrot.slane %v2397_v38, 2  ;;  %v2535_v46 = vor.u32 %v2534_v33, %v2530_v55  ;;  %v2823_v39 = vor.u32 %v2822_v43, %v2821_v8  ;;  %v2379_v15 = vsel %vm898_vm0, 0, %v2334_v25  ;;  %v7187_v43 = vld [vmem:[#allocation24_spill] sm:$0xff] }
 0x2fa   : > { %v2398_v50 = vsel %vm898_vm0, %v2334_v25, 0  ;;  %v2828_v16 = vor.u32 %v2827_v53, %v2826_v52  ;;  %v2540_v40 = vshrl.u32 %v2379_v15, 16  ;;  %v2542_v36 = vshll.u32 %v2379_v15, 16 }
 0x2fb   : > { %v2546_v37 = vshll.u32 %v2398_v50, 16  ;;  %v2539_v35 = vsel %vm964_vm2, %v2535_v46, %v2538_v24  ;;  %v2665_v27 = vsel %vm1189_vm1, %v2663_v57, %v2664_v9  ;;  %v2666_v45 = vrot.slane %v2379_v15, 1  ;;  %v7186_v57 = vld [vmem:[#allocation15_spill] sm:$0xff] }
 0x2fc   : > { %v2833_v54 = vshrl.u32 %v2398_v50, 16  ;;  %v2589_v51 = vmax.bf16 %v2539_v35, %v2376_v34  ;;  %v2829_v14 = vsel %vm1270_vm4, %v2823_v39, %v2828_v16  ;;  %v2544_v21 = vrot.slane %v2542_v36, 1  ;;  %v6778_v34 = vld [vmem:[%s7023_s5] ss:$0 sm:$0xff] }
 0x2fd   : > { %v2667_v1 = vrot.slane %v2398_v50, 1  ;;  %v2548_v44 = vrot.slane %v2546_v37, 1  ;;  %v2830_v4 = vrot.slane %v2540_v40, 1  ;;  %v2831_v18 = vrot.slane %v2542_v36, 2 }
 0x2fe   : > { %v2835_v13 = vrot.slane %v2833_v54, 1  ;;  %v2701_v19 = vmax.bf16 %v2665_v27, %v2589_v51  ;;  %v2545_v31 = vor.u32 %v2544_v21, %v2540_v40  ;;  %v2836_v38 = vrot.slane %v2546_v37, 2 }
 0x2ff   : > { %v2922_v55 = vrot.slane %v2379_v15, 2  ;;  %v2832_v30 = vor.u32 %v2831_v18, %v2830_v4  ;;  %v2923_v5 = vrot.slane %v2398_v50, 2  ;;  %v2303_v25 = vmax.bf16 %v7181_v22, %v2288_v29 }
 0x300   : > { %v3413_v9 = vadd.f32 %v7186_v57, %v4196_v48  ;;  %v2877_v23 = vmax.bf16 %v2829_v14, %v2701_v19  ;;  %v2549_v33 = vsel %vm964_vm2, %v2545_v31, %v2548_v44  ;;  %v2837_v8 = vor.u32 %v2836_v38, %v2835_v13 }
 0x301   : > { %v3416_v24 = vadd.f32 %v7187_v43, %v4199_v61  ;;  %v2921_v52 = vsel %vm1447_vm3, %v2919_v62, %v2920_v26  ;;  %v2590_v53 = vmax.bf16 %v2549_v33, %v2379_v15  ;;  %v2668_v46 = vsel %vm1189_vm1, %v2666_v45, %v2667_v1  ;;  %v6798_v62 = vld [vmem:[%s7024_s6] ss:$0 sm:$0xff]  ;;  %v4360_v26 = vpop.f32.mrb[52].mxu0  ;;  %v7188_v33 = vld [vmem:[#allocation27_spill] sm:$0xff] }
 0x302   : > { %v2335_v39 = vrot.slane %v2303_v25, 7  ;;  %v2957_v22 = vmax.bf16 %v2921_v52, %v2877_v23  ;;  %v2924_v48 = vsel %vm1447_vm3, %v2922_v55, %v2923_v5  ;;  %v3546_v29 = vmul.f32 %v6778_v34, %v3413_v9  ;;  %v4361_v35 = vpop.f32.mrb[53].mxu0 }
 0x303   : > { %v4202_v50 = vadd.f32 %v6720_v17, %v6700_v11  ;;  %v2702_v16 = vmax.bf16 %v2668_v46, %v2590_v53  ;;  %v2838_v40 = vsel %vm1270_vm4, %v2832_v30, %v2837_v8  ;;  %v3547_v51 = vmul.f32 %v6778_v34, %v3416_v24  ;;  %v4363_v14 = vpop.f32.mrb[54].mxu0 }
 0x304   : > { %v6790_v36 = vsel %vm898_vm0, 0, %v2335_v39  ;;  %v6793_v61 = vsel %vm898_vm0, %v2335_v39, 0  ;;  %3257 = vmatprep.mubr.bf16.mxu1 %v2957_v22  ;;  %v3585_v4 = vadd.f32 %v6798_v62, %v3546_v29  ;;  %v4364_v18 = vpop.f32.mrb[55].mxu0  ;;  %v6815_v43 = vadd.f32 %v6702_v2, %v6695_v0  ;;  %v7189_v2 = vld [vmem:[#allocation12_spill] sm:$0xff] }
 0x305   : > { %v2550_v15 = vshrl.u32 %v6790_v36, 16  ;;  %v2552_v11 = vshll.u32 %v6790_v36, 16  ;;  %v2556_v17 = vshll.u32 %v6793_v61, 16  ;;  %v2669_v37 = vrot.slane %v6790_v36, 1  ;;  %3258 = vmatmul.mubr.bf16.gmra.mrb[68].mxu1 %v6624_v47  ;;  %v4206_v47 = vpop.f32.mrb[24].mxu1 }
 0x306   : > { %v2878_v27 = vmax.bf16 %v2838_v40, %v2702_v16  ;;  %v2670_v45 = vrot.slane %v6793_v61, 1  ;;  %v2842_v54 = vshrl.u32 %v6793_v61, 16  ;;  %v2925_v38 = vrot.slane %v6790_v36, 2  ;;  %v4207_v57 = vpop.f32.mrb[25].mxu1 }
 0x307   : > { %v2554_v21 = vrot.slane %v2552_v11, 1  ;;  %v2839_v1 = vrot.slane %v2550_v15, 1  ;;  %v2840_v44 = vrot.slane %v2552_v11, 2  ;;  %v2845_v31 = vrot.slane %v2556_v17, 2  ;;  %v4209_v24 = vpop.f32.mrb[26].mxu1 }
 0x308   : > { %v2958_v13 = vmax.bf16 %v2924_v48, %v2878_v27  ;;  %v2844_v19 = vrot.slane %v2842_v54, 1  ;;  %v2558_v30 = vrot.slane %v2556_v17, 1  ;;  %v2671_v5 = vsel %vm1189_vm1, %v2669_v37, %v2670_v45  ;;  %v4210_v22 = vpop.f32.mrb[27].mxu1  ;;  %v7190_v17 = vld [vmem:[#allocation20_spill] sm:$0xff]  ;;  %v7191_v27 = vld [vmem:[#allocation22_spill] sm:$0xff] }
 0x309   : > { %v2555_v55 = vor.u32 %v2554_v21, %v2550_v15  ;;  %v2841_v25 = vor.u32 %v2840_v44, %v2839_v1  ;;  %v3586_v23 = vadd.f32 %v6798_v62, %v3547_v51  ;;  %v3421_v8 = vadd.f32 %v7188_v33, %v4202_v50 }
 0x30a   : > { %3265 = vmatprep.mubr.bf16.mxu1 %v2958_v13  ;;  %v2846_v9 = vor.u32 %v2845_v31, %v2844_v19  ;;  %v2926_v53 = vrot.slane %v6793_v61, 2  ;;  %v4205_v46 = vadd.f32 %v6748_v63, %v6727_v58  ;;  %v6823_v39 = vadd.f32 %v6729_v59, %v6722_v6 }
 0x30b   : > { %v2559_v52 = vsel %vm964_vm2, %v2555_v55, %v2558_v30  ;;  %v3617_v29 = vmax.f32 %v3585_v4, 0.0  ;;  %v3618_v50 = vmax.f32 %v3586_v23, 0.0  ;;  %v3548_v0 = vmul.f32 %v6778_v34, %v3421_v8 }
 0x30c   : > { %v2591_v48 = vmax.bf16 %v2559_v52, %v6790_v36  ;;  %v3424_v16 = vadd.f32 %v7189_v2, %v4205_v46  ;;  %v4208_v40 = vadd.f32 %v4207_v57, %v4206_v47  ;;  %v6828_v15 = vadd.f32 %v4361_v35, %v4360_v26 }
 0x30d   : > { %v4211_v61 = vadd.f32 %v4210_v22, %v4209_v24  ;;  %3266 = vmatmul.mubr.bf16.gmra.mrb[72].mxu1 %v6640_v10  ;;  %v2847_v6 = vsel %vm1270_vm4, %v2841_v25, %v2846_v9  ;;  %v4062_v59 = vpack.c.bf16 %v3618_v50, %v3617_v29  ;;  %v6832_v63 = vadd.f32 %v4364_v18, %v4363_v14 }
 0x30e   : > { %v2703_v58 = vmax.bf16 %v2671_v5, %v2591_v48  ;;  %v3587_v36 = vadd.f32 %v6798_v62, %v3548_v0  ;;  %v3549_v11 = vmul.f32 %v6778_v34, %v3424_v16  ;;  %v3429_v37 = vadd.f32 %v7190_v17, %v4208_v40 }
 0x30f   : > { %v3432_v45 = vadd.f32 %v7191_v27, %v4211_v61  ;;  %4063 = vst [vmem:[%s6840_s21] sm:$0xff] %v4062_v59   ;;  %v2927_v10 = vsel %vm1447_vm3, %v2925_v38, %v2926_v53 }
 0x310   : > { %v2879_v54 = vmax.bf16 %v2847_v6, %v2703_v58  ;;  %v3588_v26 = vadd.f32 %v6798_v62, %v3549_v11  ;;  %v3550_v35 = vmul.f32 %v6778_v34, %v3429_v37  ;;  %v3619_v21 = vmax.f32 %v3587_v36, 0.0 }
 0x311   : > { %v3551_v51 = vmul.f32 %v6778_v34, %v3432_v45 }
 0x312   : > { %v2959_v14 = vmax.bf16 %v2927_v10, %v2879_v54  ;;  %v3620_v1 = vmax.f32 %v3588_v26, 0.0  ;;  %v3589_v44 = vadd.f32 %v6798_v62, %v3550_v35  ;;  %v4366_v38 = vpop.f32.mrb[56].mxu0 }
 0x313   : > { %v3590_v4 = vadd.f32 %v6798_v62, %v3551_v51  ;;  %v4367_v47 = vpop.f32.mrb[57].mxu0 }
 0x314   : > { %3273 = vmatprep.mubr.bf16.mxu1 %v2959_v14  ;;  %v4067_v18 = vpack.c.bf16 %v3620_v1, %v3619_v21  ;;  %v3621_v13 = vmax.f32 %v3589_v44, 0.0  ;;  %v6852_v55 = vadd.f32 %v4367_v47, %v4366_v38  ;;  %v4369_v30 = vpop.f32.mrb[58].mxu0 }
 0x315   : > { %v3622_v19 = vmax.f32 %v3590_v4, 0.0  ;;  %3274 = vmatmul.mubr.bf16.gmra.mrb[76].mxu1 %v6698_v41  ;;  %v4370_v5 = vpop.f32.mrb[59].mxu0 }
 0x316   : > { %4139 = vst [vmem:[%s6840_s21 + $0x8] sm:$0xff] %v4067_v18   ;;  %v6854_v25 = vadd.f32 %v4370_v5, %v4369_v30 }
 0x317   : > { %v4072_v31 = vpack.c.bf16 %v3622_v19, %v3621_v13 }
 0x318   : > { %v4212_v57 = vpop.f32.mrb[28].mxu1 }
 0x319   : > { %4140 = vst [vmem:[%s6840_s21 + $0x10] sm:$0xff] %v4072_v31   ;;  %v4213_v9 = vpop.f32.mrb[29].mxu1 }
 0x31a   : > { %v4214_v23 = vadd.f32 %v4213_v9, %v4212_v57  ;;  %v4215_v33 = vpop.f32.mrb[30].mxu1 }
 0x31b   : > { %v4216_v8 = vpop.f32.mrb[31].mxu1 }
 0x31c   : > { %v3437_v24 = vadd.f32 %v6706_v60, %v4214_v23  ;;  %v4217_v41 = vadd.f32 %v4216_v8, %v4215_v33 }
 0x31e   : > { %v3552_v52 = vmul.f32 %v6778_v34, %v3437_v24  ;;  %v3440_v53 = vadd.f32 %v6710_v32, %v4217_v41 }
 0x320   : > { %v3591_v46 = vadd.f32 %v6798_v62, %v3552_v52  ;;  %v3553_v22 = vmul.f32 %v6778_v34, %v3440_v53 }
 0x322   : > { %v3592_v48 = vadd.f32 %v6798_v62, %v3553_v22  ;;  %v3623_v29 = vmax.f32 %v3591_v46, 0.0 }
 0x324   : > { %v3624_v50 = vmax.f32 %v3592_v48, 0.0 }
 0x326   : > { %v4077_v0 = vpack.c.bf16 %v3624_v50, %v3623_v29 }
 0x328   : > { %4141 = vst [vmem:[%s6840_s21 + $0x18] sm:$0xff] %v4077_v0  }
 0x32a   : > { %v4372_v2 = vpop.f32.mrb[60].mxu0 }
 0x32b   : > { %v4373_v16 = vpop.f32.mrb[61].mxu0 }
 0x32c   : > { %v6863_v40 = vadd.f32 %v4373_v16, %v4372_v2  ;;  %v4375_v60 = vpop.f32.mrb[62].mxu0 }
 0x32d   : > { %v4376_v61 = vpop.f32.mrb[63].mxu0 }
 0x32e   : > { %v4218_v58 = vpop.f32.mrb[32].mxu1  ;;  %v6865_v6 = vadd.f32 %v4376_v61, %v4375_v60 }
 0x32f   : > { %v4219_v32 = vpop.f32.mrb[33].mxu1 }
 0x330   : > { %v4220_v59 = vadd.f32 %v4219_v32, %v4218_v58  ;;  %v4221_v36 = vpop.f32.mrb[34].mxu1 }
 0x331   : > { %v4222_v11 = vpop.f32.mrb[35].mxu1 }
 0x332   : > { %v3445_v17 = vadd.f32 %v6714_v49, %v4220_v59  ;;  %v4223_v37 = vadd.f32 %v4222_v11, %v4221_v36 }
 0x334   : > { %v3554_v27 = vmul.f32 %v6778_v34, %v3445_v17  ;;  %v3448_v45 = vadd.f32 %v6718_v7, %v4223_v37 }
 0x336   : > { %v3593_v54 = vadd.f32 %v6798_v62, %v3554_v27  ;;  %v3555_v10 = vmul.f32 %v6778_v34, %v3448_v45 }
 0x338   : > { %v3594_v26 = vadd.f32 %v6798_v62, %v3555_v10  ;;  %v3625_v35 = vmax.f32 %v3593_v54, 0.0 }
 0x33a   : > { %v3626_v51 = vmax.f32 %v3594_v26, 0.0 }
 0x33c   : > { %v4378_v14 = vpop.f32.mrb[64].mxu0  ;;  %v4082_v21 = vpack.c.bf16 %v3626_v51, %v3625_v35 }
 0x33d   : > { %v4379_v1 = vpop.f32.mrb[65].mxu0 }
 0x33e   : > { %v6873_v44 = vadd.f32 %v4379_v1, %v4378_v14  ;;  %v4381_v4 = vpop.f32.mrb[66].mxu0  ;;  %4142 = vst [vmem:[%s6840_s21 + $0x20] sm:$0xff] %v4082_v21  }
 0x33f   : > { %v4382_v49 = vpop.f32.mrb[67].mxu0 }
 0x340   : > { %v6876_v18 = vadd.f32 %v4382_v49, %v4381_v4 }
 0x345   : > { %v4224_v13 = vpop.f32.mrb[36].mxu1 }
 0x346   : > { %v4225_v7 = vpop.f32.mrb[37].mxu1 }
 0x347   : > { %v4226_v19 = vadd.f32 %v4225_v7, %v4224_v13  ;;  %v4227_v31 = vpop.f32.mrb[38].mxu1 }
 0x348   : > { %v4228_v38 = vpop.f32.mrb[39].mxu1 }
 0x349   : > { %v3453_v47 = vadd.f32 %v6734_v12, %v4226_v19  ;;  %v4229_v30 = vadd.f32 %v4228_v38, %v4227_v31 }
 0x34b   : > { %v3556_v5 = vmul.f32 %v6778_v34, %v3453_v47  ;;  %v3456_v57 = vadd.f32 %v6738_v42, %v4229_v30 }
 0x34d   : > { %v3595_v9 = vadd.f32 %v6798_v62, %v3556_v5  ;;  %v3557_v23 = vmul.f32 %v6778_v34, %v3456_v57 }
 0x34f   : > { %v3596_v33 = vadd.f32 %v6798_v62, %v3557_v23  ;;  %v3627_v8 = vmax.f32 %v3595_v9, 0.0 }
 0x351   : > { %v3628_v24 = vmax.f32 %v3596_v33, 0.0 }
 0x353   : > { %v4384_v41 = vpop.f32.mrb[68].mxu0  ;;  %v4087_v52 = vpack.c.bf16 %v3628_v24, %v3627_v8 }
 0x354   : > { %v4385_v53 = vpop.f32.mrb[69].mxu0 }
 0x355   : > { %v6884_v46 = vadd.f32 %v4385_v53, %v4384_v41  ;;  %v4387_v22 = vpop.f32.mrb[70].mxu0  ;;  %4143 = vst [vmem:[%s6840_s21 + $0x28] sm:$0xff] %v4087_v52  }
 0x356   : > { %v4388_v12 = vpop.f32.mrb[71].mxu0 }
 0x357   : > { %v6887_v48 = vadd.f32 %v4388_v12, %v4387_v22 }
 0x359   : > { %v4230_v42 = vpop.f32.mrb[40].mxu1 }
 0x35a   : > { %v4231_v29 = vpop.f32.mrb[41].mxu1 }
 0x35b   : > { %v4232_v50 = vadd.f32 %v4231_v29, %v4230_v42  ;;  %v4233_v0 = vpop.f32.mrb[42].mxu1 }
 0x35c   : > { %v4234_v2 = vpop.f32.mrb[43].mxu1 }
 0x35d   : > { %v3461_v16 = vadd.f32 %v6742_v56, %v4232_v50  ;;  %v4235_v60 = vadd.f32 %v4234_v2, %v4233_v0 }
 0x35f   : > { %v3558_v61 = vmul.f32 %v6778_v34, %v3461_v16  ;;  %v3464_v58 = vadd.f32 %v6746_v28, %v4235_v60 }
 0x361   : > { %v3597_v32 = vadd.f32 %v6798_v62, %v3558_v61  ;;  %v3559_v59 = vmul.f32 %v6778_v34, %v3464_v58 }
 0x363   : > { %v3598_v36 = vadd.f32 %v6798_v62, %v3559_v59  ;;  %v3629_v11 = vmax.f32 %v3597_v32, 0.0 }
 0x365   : > { %v3630_v17 = vmax.f32 %v3598_v36, 0.0 }
 0x367   : > { %v4092_v37 = vpack.c.bf16 %v3630_v17, %v3629_v11 }
 0x369   : > { %4144 = vst [vmem:[%s6840_s21 + $0x30] sm:$0xff] %v4092_v37  }
 0x36a   : > { %v4390_v27 = vpop.f32.mrb[72].mxu0 }
 0x36b   : > { %v4391_v45 = vpop.f32.mrb[73].mxu0 }
 0x36c   : > { %v6896_v54 = vadd.f32 %v4391_v45, %v4390_v27  ;;  %v4393_v56 = vpop.f32.mrb[74].mxu0 }
 0x36d   : > { %v4394_v10 = vpop.f32.mrb[75].mxu0 }
 0x36e   : > { %v4236_v26 = vpop.f32.mrb[44].mxu1  ;;  %v6898_v35 = vadd.f32 %v4394_v10, %v4393_v56 }
 0x36f   : > { %v4237_v28 = vpop.f32.mrb[45].mxu1 }
 0x370   : > { %v4238_v51 = vadd.f32 %v4237_v28, %v4236_v26  ;;  %v4239_v14 = vpop.f32.mrb[46].mxu1 }
 0x371   : > { %v4240_v21 = vpop.f32.mrb[47].mxu1 }
 0x372   : > { %v3469_v1 = vadd.f32 %v6756_v3, %v4238_v51  ;;  %v4241_v4 = vadd.f32 %v4240_v21, %v4239_v14 }
 0x374   : > { %v3560_v49 = vmul.f32 %v6778_v34, %v3469_v1  ;;  %v3472_v13 = vadd.f32 %v6762_v20, %v4241_v4 }
 0x376   : > { %v3599_v7 = vadd.f32 %v6798_v62, %v3560_v49  ;;  %v3561_v19 = vmul.f32 %v6778_v34, %v3472_v13 }
 0x378   : > { %v3600_v31 = vadd.f32 %v6798_v62, %v3561_v19  ;;  %v3631_v38 = vmax.f32 %v3599_v7, 0.0 }
 0x37a   : > { %v3632_v47 = vmax.f32 %v3600_v31, 0.0 }
 0x37c   : > { %v4097_v30 = vpack.c.bf16 %v3632_v47, %v3631_v38 }
 0x37e   : > { %4145 = vst [vmem:[%s6840_s21 + $0x38] sm:$0xff] %v4097_v30  }
 0x384   : > { %v4242_v5 = vpop.f32.mrb[48].mxu1 }
 0x385   : > { %v4243_v57 = vpop.f32.mrb[49].mxu1 }
 0x386   : > { %v4244_v9 = vadd.f32 %v4243_v57, %v4242_v5  ;;  %v4245_v23 = vpop.f32.mrb[50].mxu1 }
 0x387   : > { %v4246_v3 = vpop.f32.mrb[51].mxu1 }
 0x388   : > { %v3477_v8 = vadd.f32 %v6815_v43, %v4244_v9  ;;  %v4247_v20 = vadd.f32 %v4246_v3, %v4245_v23 }
 0x38a   : > { %v4396_v33 = vpop.f32.mrb[76].mxu0  ;;  %v3562_v41 = vmul.f32 %v6778_v34, %v3477_v8  ;;  %v3480_v22 = vadd.f32 %v6823_v39, %v4247_v20 }
 0x38b   : > { %v4397_v24 = vpop.f32.mrb[77].mxu0 }
 0x38c   : > { %v6909_v52 = vadd.f32 %v4397_v24, %v4396_v33  ;;  %v4399_v53 = vpop.f32.mrb[78].mxu0  ;;  %v3601_v42 = vadd.f32 %v6798_v62, %v3562_v41  ;;  %v3563_v29 = vmul.f32 %v6778_v34, %v3480_v22 }
 0x38d   : > { %v4400_v12 = vpop.f32.mrb[79].mxu0 }
 0x38e   : > { %v6914_v50 = vadd.f32 %v4400_v12, %v4399_v53  ;;  %v3602_v0 = vadd.f32 %v6798_v62, %v3563_v29  ;;  %v3633_v2 = vmax.f32 %v3601_v42, 0.0 }
 0x390   : > { %v3634_v43 = vmax.f32 %v3602_v0, 0.0 }
 0x392   : > { %v4102_v16 = vpack.c.bf16 %v3634_v43, %v3633_v2 }
 0x394   : > { %4146 = vst [vmem:[%s6840_s21 + $0x40] sm:$0xff] %v4102_v16  }
 0x3b3   : > { %v4248_v60 = vpop.f32.mrb[52].mxu1 }
 0x3b4   : > { %v4249_v61 = vpop.f32.mrb[53].mxu1 }
 0x3b5   : > { %v4250_v58 = vadd.f32 %v4249_v61, %v4248_v60  ;;  %v4251_v32 = vpop.f32.mrb[54].mxu1 }
 0x3b6   : > { %v4252_v59 = vpop.f32.mrb[55].mxu1 }
 0x3b7   : > { %v3485_v39 = vadd.f32 %v6828_v15, %v4250_v58  ;;  %v4253_v36 = vadd.f32 %v4252_v59, %v4251_v32 }
 0x3b9   : > { %v3564_v11 = vmul.f32 %v6778_v34, %v3485_v39  ;;  %v3488_v17 = vadd.f32 %v6832_v63, %v4253_v36 }
 0x3bb   : > { %v3603_v37 = vadd.f32 %v6798_v62, %v3564_v11  ;;  %v3565_v27 = vmul.f32 %v6778_v34, %v3488_v17  ;;  %v4254_v45 = vpop.f32.mrb[56].mxu1 }
 0x3bc   : > { %v4255_v56 = vpop.f32.mrb[57].mxu1 }
 0x3bd   : > { %v3604_v10 = vadd.f32 %v6798_v62, %v3565_v27  ;;  %v4256_v26 = vadd.f32 %v4255_v56, %v4254_v45  ;;  %v4257_v28 = vpop.f32.mrb[58].mxu1  ;;  %v3635_v14 = vmax.f32 %v3603_v37, 0.0 }
 0x3be   : > { %v4258_v51 = vpop.f32.mrb[59].mxu1 }
 0x3bf   : > { %v3636_v21 = vmax.f32 %v3604_v10, 0.0  ;;  %v3493_v15 = vadd.f32 %v6852_v55, %v4256_v26  ;;  %v4259_v1 = vadd.f32 %v4258_v51, %v4257_v28 }
 0x3c1   : > { %v4107_v4 = vpack.c.bf16 %v3636_v21, %v3635_v14  ;;  %v3566_v63 = vmul.f32 %v6778_v34, %v3493_v15  ;;  %v3496_v49 = vadd.f32 %v6854_v25, %v4259_v1 }
 0x3c3   : > { %4147 = vst [vmem:[%s6840_s21 + $0x48] sm:$0xff] %v4107_v4   ;;  %v3605_v13 = vadd.f32 %v6798_v62, %v3566_v63  ;;  %v3567_v7 = vmul.f32 %v6778_v34, %v3496_v49  ;;  %v4260_v19 = vpop.f32.mrb[60].mxu1 }
 0x3c4   : > { %v4261_v31 = vpop.f32.mrb[61].mxu1 }
 0x3c5   : > { %v3606_v38 = vadd.f32 %v6798_v62, %v3567_v7  ;;  %v4262_v47 = vadd.f32 %v4261_v31, %v4260_v19  ;;  %v4263_v30 = vpop.f32.mrb[62].mxu1  ;;  %v3637_v55 = vmax.f32 %v3605_v13, 0.0 }
 0x3c6   : > { %v4264_v5 = vpop.f32.mrb[63].mxu1 }
 0x3c7   : > { %v3638_v57 = vmax.f32 %v3606_v38, 0.0  ;;  %v3501_v9 = vadd.f32 %v6863_v40, %v4262_v47  ;;  %v4265_v23 = vadd.f32 %v4264_v5, %v4263_v30 }
 0x3c9   : > { %v4112_v3 = vpack.c.bf16 %v3638_v57, %v3637_v55  ;;  %v3568_v25 = vmul.f32 %v6778_v34, %v3501_v9  ;;  %v3504_v33 = vadd.f32 %v6865_v6, %v4265_v23 }
 0x3cb   : > { %4148 = vst [vmem:[%s6840_s21 + $0x50] sm:$0xff] %v4112_v3   ;;  %v3607_v8 = vadd.f32 %v6798_v62, %v3568_v25  ;;  %v3569_v20 = vmul.f32 %v6778_v34, %v3504_v33  ;;  %v4266_v24 = vpop.f32.mrb[64].mxu1 }
 0x3cc   : > { %v4267_v41 = vpop.f32.mrb[65].mxu1 }
 0x3cd   : > { %v3608_v53 = vadd.f32 %v6798_v62, %v3569_v20  ;;  %v4268_v22 = vadd.f32 %v4267_v41, %v4266_v24  ;;  %v4269_v12 = vpop.f32.mrb[66].mxu1  ;;  %v3639_v40 = vmax.f32 %v3607_v8, 0.0 }
 0x3ce   : > { %v4270_v42 = vpop.f32.mrb[67].mxu1 }
 0x3cf   : > { %v3640_v29 = vmax.f32 %v3608_v53, 0.0  ;;  %v3509_v0 = vadd.f32 %v6873_v44, %v4268_v22  ;;  %v4271_v2 = vadd.f32 %v4270_v42, %v4269_v12 }
 0x3d1   : > { %v4117_v6 = vpack.c.bf16 %v3640_v29, %v3639_v40  ;;  %v3570_v43 = vmul.f32 %v6778_v34, %v3509_v0  ;;  %v3512_v16 = vadd.f32 %v6876_v18, %v4271_v2 }
 0x3d3   : > { %4149 = vst [vmem:[%s6840_s21 + $0x58] sm:$0xff] %v4117_v6   ;;  %v3609_v60 = vadd.f32 %v6798_v62, %v3570_v43  ;;  %v3571_v61 = vmul.f32 %v6778_v34, %v3512_v16 }
 0x3d5   : > { %v3610_v58 = vadd.f32 %v6798_v62, %v3571_v61  ;;  %v3641_v32 = vmax.f32 %v3609_v60, 0.0 }
 0x3d7   : > { %v3642_v59 = vmax.f32 %v3610_v58, 0.0 }
 0x3d8   : > { %v4272_v39 = vpop.f32.mrb[68].mxu1 }
 0x3d9   : > { %v4273_v36 = vpop.f32.mrb[69].mxu1  ;;  %v4122_v11 = vpack.c.bf16 %v3642_v59, %v3641_v32 }
 0x3da   : > { %v4274_v44 = vadd.f32 %v4273_v36, %v4272_v39  ;;  %v4275_v17 = vpop.f32.mrb[70].mxu1 }
 0x3db   : > { %v4276_v37 = vpop.f32.mrb[71].mxu1  ;;  %4150 = vst [vmem:[%s6840_s21 + $0x60] sm:$0xff] %v4122_v11  }
 0x3dc   : > { %v3517_v27 = vadd.f32 %v6884_v46, %v4274_v44  ;;  %v4277_v45 = vadd.f32 %v4276_v37, %v4275_v17 }
 0x3de   : > { %v3572_v18 = vmul.f32 %v6778_v34, %v3517_v27  ;;  %v3520_v56 = vadd.f32 %v6887_v48, %v4277_v45 }
 0x3e0   : > { %v3611_v10 = vadd.f32 %v6798_v62, %v3572_v18  ;;  %v3573_v26 = vmul.f32 %v6778_v34, %v3520_v56  ;;  %v4278_v28 = vpop.f32.mrb[72].mxu1 }
 0x3e1   : > { %v4279_v51 = vpop.f32.mrb[73].mxu1 }
 0x3e2   : > { %v3612_v14 = vadd.f32 %v6798_v62, %v3573_v26  ;;  %v4280_v21 = vadd.f32 %v4279_v51, %v4278_v28  ;;  %v4281_v15 = vpop.f32.mrb[74].mxu1  ;;  %v3643_v4 = vmax.f32 %v3611_v10, 0.0 }
 0x3e3   : > { %v4282_v1 = vpop.f32.mrb[75].mxu1 }
 0x3e4   : > { %v3644_v63 = vmax.f32 %v3612_v14, 0.0  ;;  %v3525_v46 = vadd.f32 %v6896_v54, %v4280_v21  ;;  %v4283_v49 = vadd.f32 %v4282_v1, %v4281_v15 }
 0x3e6   : > { %v4127_v13 = vpack.c.bf16 %v3644_v63, %v3643_v4  ;;  %v3574_v48 = vmul.f32 %v6778_v34, %v3525_v46  ;;  %v3528_v7 = vadd.f32 %v6898_v35, %v4283_v49 }
 0x3e8   : > { %4151 = vst [vmem:[%s6840_s21 + $0x68] sm:$0xff] %v4127_v13   ;;  %v3613_v19 = vadd.f32 %v6798_v62, %v3574_v48  ;;  %v3575_v31 = vmul.f32 %v6778_v34, %v3528_v7  ;;  %v4284_v38 = vpop.f32.mrb[76].mxu1 }
 0x3e9   : > { %v4285_v47 = vpop.f32.mrb[77].mxu1 }
 0x3ea   : > { %v3614_v30 = vadd.f32 %v6798_v62, %v3575_v31  ;;  %v4286_v5 = vadd.f32 %v4285_v47, %v4284_v38  ;;  %v4287_v54 = vpop.f32.mrb[78].mxu1  ;;  %v3645_v57 = vmax.f32 %v3613_v19, 0.0 }
 0x3eb   : > { %v4288_v55 = vpop.f32.mrb[79].mxu1 }
 0x3ec   : > { %v3646_v9 = vmax.f32 %v3614_v30, 0.0  ;;  %v3533_v23 = vadd.f32 %v6909_v52, %v4286_v5  ;;  %v4289_v35 = vadd.f32 %v4288_v55, %v4287_v54 }
 0x3ee   : > { %v4132_v3 = vpack.c.bf16 %v3646_v9, %v3645_v57  ;;  %v3576_v25 = vmul.f32 %v6778_v34, %v3533_v23  ;;  %v3536_v33 = vadd.f32 %v6914_v50, %v4289_v35 }
 0x3f0   : > { %4152 = vst [vmem:[%s6840_s21 + $0x70] sm:$0xff] %v4132_v3   ;;  %v3615_v8 = vadd.f32 %v6798_v62, %v3576_v25  ;;  %v3577_v20 = vmul.f32 %v6778_v34, %v3536_v33 }
 0x3f2   : > { %v3616_v24 = vadd.f32 %v6798_v62, %v3577_v20  ;;  %v3647_v41 = vmax.f32 %v3615_v8, 0.0 }
 0x3f4   : > { %v3648_v52 = vmax.f32 %v3616_v24, 0.0 }
 0x3f6   : > { %v4137_v50 = vpack.c.bf16 %v3648_v52, %v3647_v41 }
 0x3f8   : > { %4153 = vst [vmem:[%s6840_s21 + $0x78] sm:$0xff] %v4137_v50  }
 0x3f9   : > { %4693 = shalt.err (!%p4690_p1)
}
 0x3fa   : > { %s4694_s15 = scalar_lea.hbm %s6971_s30, 2048  ;;  %s4698_s21 = scalar_lea.hbm %s7025_s7, 4096 }
 0x3fb   : > { %p4695_p13 = scmp.ne.s32.totalorder %s6971_s30, %s4694_s15  ;;  %p4699_p4 = scmp.lt.u32.totalorder %s6971_s30, %s7025_s7 }
 0x3fc   : > { %p4700_p5 = scmp.lt.u32.totalorder %s4698_s21, %s4694_s15  ;;  %p4702_p11 = scmp.lt.u32.totalorder %s4694_s15, %s6971_s30 }
 0x3fd   : > { %p4696_p6 = pnand %p4695_p13, %p7192_p0 }
 0x3fe   : > { %p4701_p8 = por %p4700_p5, %p4699_p4 }
 0x3ff   : > { %p4697_p10 = pneg %p4696_p6 }
 0x400   : > { %p4703_p2 = por %p4702_p11, %p4701_p8 }
 0x402   : > { %p4704_p3 = pnand %p4703_p2, %p4697_p10 }
 0x404   : > { %4707 = shalt.err (!%p4704_p3)
}
 0x405   : > { %s4759_s13 = smov 64   ;;  %s4760_s29 = smov 4  }
 0x406   : > { %4476 = dma.vmem_to_hbm [thread:$0]  (%p7192_p0), %s6973_s22, 2048, %s6971_s30, %s3810_s9, %s4759_s13, %s4759_s13, %s4760_s29  }
 0x407 PF: > { %s3838_s28 = sand.u32 1, %s4738_s24   ;;  %p7193_p7 = scmp.ne.s32.totalorder %s7064_s8, 0 }
 0x408   : > { %p7194_p9 = scmp.ge.s32.totalorder %s4750_s27, 2  ;;  %s3839_s11 = scalar_lea.sflag [#allocation4], %s3838_s28 }
 0x40a   : > { %p4490_p12 = pnand %p7194_p9, %p7193_p7 }
 0x40c   : > { %4733 = dma.done.wait (!%p4490_p12), %s3839_s11, 2048  }
 0x40d   : > { %4735 = vsyncadd (!%p4490_p12), %s3839_s11, 4294965248  ;;  %p21_p1 = scmp.ge.s32.totalorder %s4917_s12, 4   ;;  %s7195_s24 = smov %s4742_s25 }
 0x40e   : > { %s7196_s25 = smov %s4746_s26  ;;  %s7197_s26 = smov %s4933_s17 }
 0x40f   : > { %s7198_s27 = smov %s4917_s12  ;;  %23 = sbr.rel (!%p21_p1) target bundleno = 6 (0x6), region = 102 }
 0x416   :  { %3844 = vsyncpa [#allocation3], 1 }
 0x417   :  { %3846 = vsyncpa [#allocation3 + $0x1], 1 }
 0x418   :  { %3847 = vsyncpa [#allocation6], 1 }
 0x419   :  { %3848 = vsyncpa [#allocation4], 1 }
 0x41a   :  { %3850 = vsyncpa [#allocation4 + $0x1], 1 }

</bundles_post_ra>
